<compile_context>
chip_gen: v5e
topology: v5e:2x2
jax: 0.10.0
libtpu: 0.0.40
codegen_flags: <defaults>
</compile_context>

<pallas_src>
import jax
import jax.numpy as jnp
import numpy as np
from jax import lax
from jax.experimental import pallas as pl
from jax.experimental.pallas import tpu as pltpu

HIDDEN = 256
TXT_DIM = 300
T2V_OUT = 40           # Time2Vec width: 39 sine features + 1 linear feature
T2V_SIN = T2V_OUT - 1
N_CLASSES = 3
SUBLANE = 8


def _w2v_rnn_kernel(tau_ref, xtxt_ref,
                    w_all_ref, b_all_ref,
                    w_t2v_ref, w_txt_ref, bias_ref,
                    whh_ref, wfc_ref, bfc_ref,
                    out_ref,
                    pre_scratch):
    M = tau_ref.shape[0]            # T * B_pad (static)
    B_pad = out_ref.shape[0]
    T = M // B_pad

    # ---- Phase 1: batched non-recurrent projection (all timesteps at once) --
    tau = tau_ref[...]                                   # (M, 1)
    feat = tau * w_all_ref[...] + b_all_ref[...]         # (M, 40) VPU broadcast
    lane = lax.broadcasted_iota(jnp.int32, feat.shape, 1)
    v_t2v = jnp.where(lane < T2V_SIN, jnp.sin(feat), feat)   # [sin(39) | linear(1)]

    pre_all = (jnp.dot(v_t2v, w_t2v_ref[...],
                       preferred_element_type=jnp.float32)
               + jnp.dot(xtxt_ref[...], w_txt_ref[...],
                         preferred_element_type=jnp.float32)
               + bias_ref[...])                          # bias = b_ih + b_hh
    pre_scratch[...] = pre_all                           # (M, HIDDEN) staged in VMEM

    # ---- Phase 2: serial recurrence (only h @ W_hh + tanh per step) ---------
    whh = whh_ref[...]                                   # hoisted load
    h0 = jnp.zeros((B_pad, HIDDEN), jnp.float32)

    def step(t, h):
        start = pl.multiple_of(t * B_pad, B_pad)         # sublane-aligned slice
        pre_t = pre_scratch[pl.ds(start, B_pad), :]
        return jnp.tanh(pre_t + jnp.dot(h, whh,
                                        preferred_element_type=jnp.float32))

    h_last = lax.fori_loop(0, T, step, h0, unroll=True)

    # ---- Phase 3: FC head + sigmoid, single write -----------------------
    logits = jnp.dot(h_last, wfc_ref[...],
                     preferred_element_type=jnp.float32) + bfc_ref[...]
    out_ref[...] = jax.nn.sigmoid(logits)


def w2v_t2v_rnn_forward(x_time, x_txt, params):
    """x_time: (B, T, 1) f32, x_txt: (B, T, 300) f32 -> (B, 3) f32."""
    B, T, _ = x_time.shape
    B_pad = ((B + SUBLANE - 1) // SUBLANE) * SUBLANE
    pad = B_pad - B

    def to_rows(x):
        # batch_first (B, T, F) -> time-major rows (T * B_pad, F)
        x = jnp.transpose(x, (1, 0, 2))
        if pad:
            x = jnp.pad(x, ((0, 0), (0, pad), (0, 0)))
        return x.reshape(T * B_pad, x.shape[-1])

    tau_rows = to_rows(x_time)          # (M, 1)
    txt_rows = to_rows(x_txt)           # (M, 300)
    M = T * B_pad

    # Fuse the Time2Vec parameters and the input-to-hidden weight once here.
    w_all = jnp.concatenate([params["t2v_w"], params["t2v_w0"]], axis=1)    # (1, 40)
    b_all = jnp.concatenate([params["t2v_b"], params["t2v_b0"]], axis=1)    # (1, 40)
    w_t2v = jnp.concatenate([params["wih_sin"], params["wih_lin"]], axis=0)  # (40, 256)
    w_txt = params["wih_txt"]                                                # (300, 256)
    bias = params["b_ih"] + params["b_hh"]                                   # (1, 256)
    weight_args = (w_all, b_all, w_t2v, w_txt, bias,
                   params["whh"], params["wfc"], params["b_fc"])

    def full2d(a):
        return pl.BlockSpec(a.shape, lambda i: (0, 0))

    grid_spec = pltpu.PrefetchScalarGridSpec(
        num_scalar_prefetch=0,
        grid=(1,),
        in_specs=[full2d(tau_rows), full2d(txt_rows)]
                 + [full2d(w) for w in weight_args],
        out_specs=pl.BlockSpec((B_pad, N_CLASSES), lambda i: (0, 0)),
        scratch_shapes=[pltpu.VMEM((M, HIDDEN), jnp.float32)],
    )

    out = pl.pallas_call(
        _w2v_rnn_kernel,
        out_shape=jax.ShapeDtypeStruct((B_pad, N_CLASSES), jnp.float32),
        grid_spec=grid_spec,
        compiler_params=pltpu.CompilerParams(
            dimension_semantics=("arbitrary",)),
    )(tau_rows, txt_rows, *weight_args)

    return out[:B]


def init_params(key):
    ks = jax.random.split(key, 12)
    scale = 0.1
    p = {
        # Time2Vec SineActivation(1, 40)
        "t2v_w":  scale * jax.random.normal(ks[0], (1, T2V_SIN), jnp.float32),
        "t2v_b":  scale * jax.random.normal(ks[1], (1, T2V_SIN), jnp.float32),
        "t2v_w0": scale * jax.random.normal(ks[2], (1, 1), jnp.float32),
        "t2v_b0": scale * jax.random.normal(ks[3], (1, 1), jnp.float32),
        # RNN(input=340, hidden=256): W_ih^T split into [sin(39) | lin(1) | txt(300)]
        "wih_sin": scale * jax.random.normal(ks[4], (T2V_SIN, HIDDEN), jnp.float32),
        "wih_lin": scale * jax.random.normal(ks[5], (1, HIDDEN), jnp.float32),
        "wih_txt": scale * jax.random.normal(ks[6], (TXT_DIM, HIDDEN), jnp.float32),
        "b_ih":    scale * jax.random.normal(ks[7], (1, HIDDEN), jnp.float32),
        "whh":     scale * jax.random.normal(ks[8], (HIDDEN, HIDDEN), jnp.float32),
        "b_hh":    scale * jax.random.normal(ks[9], (1, HIDDEN), jnp.float32),
        # fc: Linear(256, 3)
        "wfc":     scale * jax.random.normal(ks[10], (HIDDEN, N_CLASSES), jnp.float32),
        "b_fc":    scale * jax.random.normal(ks[11], (1, N_CLASSES), jnp.float32),
    }
    return p


def reference_forward(x_time, x_txt, p):
    """Pure-JAX reference mirroring the PyTorch forward."""
    B, T, _ = x_time.shape
    v1 = jnp.sin(jnp.einsum("bti,io->bto", x_time, p["t2v_w"]) + p["t2v_b"])
    v2 = jnp.einsum("bti,io->bto", x_time, p["t2v_w0"]) + p["t2v_b0"]
    x = jnp.concatenate([v1, v2, x_txt], axis=-1)                 # (B, T, 340)
    wih_t = jnp.concatenate([p["wih_sin"], p["wih_lin"], p["wih_txt"]], axis=0)

    def step(h, xt):
        h = jnp.tanh(xt @ wih_t + p["b_ih"] + h @ p["whh"] + p["b_hh"])
        return h, None

    h0 = jnp.zeros((B, HIDDEN), jnp.float32)
    h_last, _ = jax.lax.scan(step, h0, jnp.transpose(x, (1, 0, 2)))
    return jax.nn.sigmoid(h_last @ p["wfc"] + p["b_fc"])


if __name__ == "__main__":
    key = jax.random.PRNGKey(0)
    kp, kt, kx = jax.random.split(key, 3)

    B, T = 2, 8
    params = init_params(kp)
    x_time = jax.random.uniform(kt, (B, T, 1), jnp.float32)        # (B, T, 1)
    x_txt = jax.random.normal(kx, (B, T, TXT_DIM), jnp.float32)    # (B, T, 300)

    out = w2v_t2v_rnn_forward(x_time, x_txt, params)
    out = jax.block_until_ready(out)

    ref = reference_forward(x_time, x_txt, params)
    np.testing.assert_allclose(np.asarray(out), np.asarray(ref),
                               rtol=1e-5, atol=2e-5)
    assert not bool(jnp.isnan(out).any())
    print("KERNEL_OK")
</pallas_src>

<mosaic_0001>
module attributes {stable_mosaic.version = 11 : i64} {
  func.func @_w2v_rnn_kernel(%arg0: i32, %arg1: memref<64x1xf32, #tpu.memory_space<vmem>>, %arg2: memref<64x300xf32, #tpu.memory_space<vmem>>, %arg3: memref<1x40xf32, #tpu.memory_space<vmem>>, %arg4: memref<1x40xf32, #tpu.memory_space<vmem>>, %arg5: memref<40x256xf32, #tpu.memory_space<vmem>>, %arg6: memref<300x256xf32, #tpu.memory_space<vmem>>, %arg7: memref<1x256xf32, #tpu.memory_space<vmem>>, %arg8: memref<256x256xf32, #tpu.memory_space<vmem>>, %arg9: memref<256x3xf32, #tpu.memory_space<vmem>>, %arg10: memref<1x3xf32, #tpu.memory_space<vmem>>, %arg11: memref<8x3xf32, #tpu.memory_space<vmem>>, %arg12: memref<64x256xf32, #tpu.memory_space<vmem>>) attributes {dimension_semantics = [#tpu.dimension_semantics<arbitrary>], iteration_bounds = array<i64: 1>, scalar_prefetch = 0 : i64, scratch_operands = 1 : i64, tpu.core_type = #tpu.core_type<tc>, window_params = [{pipeline_mode = #tpu.pipeline_mode<synchronous>, transform_indices = @transform_0, window_bounds = array<i64: 64, 1>}, {pipeline_mode = #tpu.pipeline_mode<synchronous>, transform_indices = @transform_1, window_bounds = array<i64: 64, 300>}, {pipeline_mode = #tpu.pipeline_mode<synchronous>, transform_indices = @transform_2, window_bounds = array<i64: 1, 40>}, {pipeline_mode = #tpu.pipeline_mode<synchronous>, transform_indices = @transform_3, window_bounds = array<i64: 1, 40>}, {pipeline_mode = #tpu.pipeline_mode<synchronous>, transform_indices = @transform_4, window_bounds = array<i64: 40, 256>}, {pipeline_mode = #tpu.pipeline_mode<synchronous>, transform_indices = @transform_5, window_bounds = array<i64: 300, 256>}, {pipeline_mode = #tpu.pipeline_mode<synchronous>, transform_indices = @transform_6, window_bounds = array<i64: 1, 256>}, {pipeline_mode = #tpu.pipeline_mode<synchronous>, transform_indices = @transform_7, window_bounds = array<i64: 256, 256>}, {pipeline_mode = #tpu.pipeline_mode<synchronous>, transform_indices = @transform_8, window_bounds = array<i64: 256, 3>}, {pipeline_mode = #tpu.pipeline_mode<synchronous>, transform_indices = @transform_9, window_bounds = array<i64: 1, 3>}, {pipeline_mode = #tpu.pipeline_mode<synchronous>, transform_indices = @transform_10, window_bounds = array<i64: 8, 3>}]} {
    %c0 = arith.constant 0 : index
    %c0_0 = arith.constant 0 : index
    %0 = vector.load %arg1[%c0, %c0_0] : memref<64x1xf32, #tpu.memory_space<vmem>>, vector<64x1xf32>
    %c0_1 = arith.constant 0 : index
    %c0_2 = arith.constant 0 : index
    %1 = vector.load %arg3[%c0_1, %c0_2] : memref<1x40xf32, #tpu.memory_space<vmem>>, vector<1x40xf32>
    %2 = vector.broadcast %0 : vector<64x1xf32> to vector<64x40xf32>
    %3 = vector.broadcast %1 : vector<1x40xf32> to vector<64x40xf32>
    %4 = arith.mulf %2, %3 : vector<64x40xf32>
    %c0_3 = arith.constant 0 : index
    %c0_4 = arith.constant 0 : index
    %5 = vector.load %arg4[%c0_3, %c0_4] : memref<1x40xf32, #tpu.memory_space<vmem>>, vector<1x40xf32>
    %6 = vector.broadcast %5 : vector<1x40xf32> to vector<64x40xf32>
    %7 = arith.addf %4, %6 : vector<64x40xf32>
    %8 = tpu.iota {dimensions = array<i32: 1>} : vector<64x40xi32>
    %c39_i32 = arith.constant 39 : i32
    %9 = vector.broadcast %c39_i32 : i32 to vector<64x40xi32>
    %10 = arith.cmpi slt, %8, %9 : vector<64x40xi32>
    %11 = math.sin %7 : vector<64x40xf32>
    %12 = arith.select %10, %11, %7 : vector<64x40xi1>, vector<64x40xf32>
    %c0_5 = arith.constant 0 : index
    %c0_6 = arith.constant 0 : index
    %13 = vector.load %arg5[%c0_5, %c0_6] : memref<40x256xf32, #tpu.memory_space<vmem>>, vector<40x256xf32>
    %cst = arith.constant dense<0.000000e+00> : vector<64x256xf32>
    %14 = tpu.matmul %12, %13, %cst {dimension_numbers = #tpu.dot_dimension_numbers<[1], [0], [0], [1], [0, 0, 1, 1], [], []>} : vector<64x40xf32>, vector<40x256xf32>, vector<64x256xf32> -> vector<64x256xf32>
    %c0_7 = arith.constant 0 : index
    %c0_8 = arith.constant 0 : index
    %15 = vector.load %arg2[%c0_7, %c0_8] : memref<64x300xf32, #tpu.memory_space<vmem>>, vector<64x300xf32>
    %c0_9 = arith.constant 0 : index
    %c0_10 = arith.constant 0 : index
    %16 = vector.load %arg6[%c0_9, %c0_10] : memref<300x256xf32, #tpu.memory_space<vmem>>, vector<300x256xf32>
    %cst_11 = arith.constant dense<0.000000e+00> : vector<64x256xf32>
    %17 = tpu.matmul %15, %16, %cst_11 {dimension_numbers = #tpu.dot_dimension_numbers<[1], [0], [0], [1], [0, 0, 1, 1], [], []>} : vector<64x300xf32>, vector<300x256xf32>, vector<64x256xf32> -> vector<64x256xf32>
    %18 = arith.addf %14, %17 : vector<64x256xf32>
    %c0_12 = arith.constant 0 : index
    %c0_13 = arith.constant 0 : index
    %19 = vector.load %arg7[%c0_12, %c0_13] : memref<1x256xf32, #tpu.memory_space<vmem>>, vector<1x256xf32>
    %20 = vector.broadcast %19 : vector<1x256xf32> to vector<64x256xf32>
    %21 = arith.addf %18, %20 : vector<64x256xf32>
    %c0_14 = arith.constant 0 : index
    %c0_15 = arith.constant 0 : index
    %22 = vector.load %arg12[%c0_14, %c0_15] : memref<64x256xf32, #tpu.memory_space<vmem>>, vector<64x256xf32>
    tpu.vector_store %arg12[%c0_14, %c0_15], %21 {strides = array<i32>} : memref<64x256xf32, #tpu.memory_space<vmem>>, vector<64x256xf32>,
    %c0_16 = arith.constant 0 : index
    %c0_17 = arith.constant 0 : index
    %23 = vector.load %arg8[%c0_16, %c0_17] : memref<256x256xf32, #tpu.memory_space<vmem>>, vector<256x256xf32>
    %cst_18 = arith.constant 0.000000e+00 : f32
    %24 = vector.broadcast %cst_18 : f32 to vector<8x256xf32>
    %c0_i32 = arith.constant 0 : i32
    %c8_i32 = arith.constant 8 : i32
    %25 = arith.muli %c0_i32, %c8_i32 : i32
    %26 = tpu.assume_multiple %25, 8 : i32
    %27 = arith.index_cast %26 : i32 to index
    %c0_19 = arith.constant 0 : index
    %28 = vector.load %arg12[%27, %c0_19] : memref<64x256xf32, #tpu.memory_space<vmem>>, vector<8x256xf32>
    %cst_20 = arith.constant dense<0.000000e+00> : vector<8x256xf32>
    %29 = tpu.matmul %24, %23, %cst_20 {dimension_numbers = #tpu.dot_dimension_numbers<[1], [0], [0], [1], [0, 0, 1, 1], [], []>} : vector<8x256xf32>, vector<256x256xf32>, vector<8x256xf32> -> vector<8x256xf32>
    %30 = arith.addf %28, %29 : vector<8x256xf32>
    %31 = math.tanh %30 : vector<8x256xf32>
    %c1_i32 = arith.constant 1 : i32
    %c8_i32_21 = arith.constant 8 : i32
    %32 = arith.muli %c1_i32, %c8_i32_21 : i32
    %33 = tpu.assume_multiple %32, 8 : i32
    %34 = arith.index_cast %33 : i32 to index
    %c0_22 = arith.constant 0 : index
    %35 = vector.load %arg12[%34, %c0_22] : memref<64x256xf32, #tpu.memory_space<vmem>>, vector<8x256xf32>
    %cst_23 = arith.constant dense<0.000000e+00> : vector<8x256xf32>
    %36 = tpu.matmul %31, %23, %cst_23 {dimension_numbers = #tpu.dot_dimension_numbers<[1], [0], [0], [1], [0, 0, 1, 1], [], []>} : vector<8x256xf32>, vector<256x256xf32>, vector<8x256xf32> -> vector<8x256xf32>
    %37 = arith.addf %35, %36 : vector<8x256xf32>
    %38 = math.tanh %37 : vector<8x256xf32>
    %c2_i32 = arith.constant 2 : i32
    %c8_i32_24 = arith.constant 8 : i32
    %39 = arith.muli %c2_i32, %c8_i32_24 : i32
    %40 = tpu.assume_multiple %39, 8 : i32
    %41 = arith.index_cast %40 : i32 to index
    %c0_25 = arith.constant 0 : index
    %42 = vector.load %arg12[%41, %c0_25] : memref<64x256xf32, #tpu.memory_space<vmem>>, vector<8x256xf32>
    %cst_26 = arith.constant dense<0.000000e+00> : vector<8x256xf32>
    %43 = tpu.matmul %38, %23, %cst_26 {dimension_numbers = #tpu.dot_dimension_numbers<[1], [0], [0], [1], [0, 0, 1, 1], [], []>} : vector<8x256xf32>, vector<256x256xf32>, vector<8x256xf32> -> vector<8x256xf32>
    %44 = arith.addf %42, %43 : vector<8x256xf32>
    %45 = math.tanh %44 : vector<8x256xf32>
    %c3_i32 = arith.constant 3 : i32
    %c8_i32_27 = arith.constant 8 : i32
    %46 = arith.muli %c3_i32, %c8_i32_27 : i32
    %47 = tpu.assume_multiple %46, 8 : i32
    %48 = arith.index_cast %47 : i32 to index
    %c0_28 = arith.constant 0 : index
    %49 = vector.load %arg12[%48, %c0_28] : memref<64x256xf32, #tpu.memory_space<vmem>>, vector<8x256xf32>
    %cst_29 = arith.constant dense<0.000000e+00> : vector<8x256xf32>
    %50 = tpu.matmul %45, %23, %cst_29 {dimension_numbers = #tpu.dot_dimension_numbers<[1], [0], [0], [1], [0, 0, 1, 1], [], []>} : vector<8x256xf32>, vector<256x256xf32>, vector<8x256xf32> -> vector<8x256xf32>
    %51 = arith.addf %49, %50 : vector<8x256xf32>
    %52 = math.tanh %51 : vector<8x256xf32>
    %c4_i32 = arith.constant 4 : i32
    %c8_i32_30 = arith.constant 8 : i32
    %53 = arith.muli %c4_i32, %c8_i32_30 : i32
    %54 = tpu.assume_multiple %53, 8 : i32
    %55 = arith.index_cast %54 : i32 to index
    %c0_31 = arith.constant 0 : index
    %56 = vector.load %arg12[%55, %c0_31] : memref<64x256xf32, #tpu.memory_space<vmem>>, vector<8x256xf32>
    %cst_32 = arith.constant dense<0.000000e+00> : vector<8x256xf32>
    %57 = tpu.matmul %52, %23, %cst_32 {dimension_numbers = #tpu.dot_dimension_numbers<[1], [0], [0], [1], [0, 0, 1, 1], [], []>} : vector<8x256xf32>, vector<256x256xf32>, vector<8x256xf32> -> vector<8x256xf32>
    %58 = arith.addf %56, %57 : vector<8x256xf32>
    %59 = math.tanh %58 : vector<8x256xf32>
    %c5_i32 = arith.constant 5 : i32
    %c8_i32_33 = arith.constant 8 : i32
    %60 = arith.muli %c5_i32, %c8_i32_33 : i32
    %61 = tpu.assume_multiple %60, 8 : i32
    %62 = arith.index_cast %61 : i32 to index
    %c0_34 = arith.constant 0 : index
    %63 = vector.load %arg12[%62, %c0_34] : memref<64x256xf32, #tpu.memory_space<vmem>>, vector<8x256xf32>
    %cst_35 = arith.constant dense<0.000000e+00> : vector<8x256xf32>
    %64 = tpu.matmul %59, %23, %cst_35 {dimension_numbers = #tpu.dot_dimension_numbers<[1], [0], [0], [1], [0, 0, 1, 1], [], []>} : vector<8x256xf32>, vector<256x256xf32>, vector<8x256xf32> -> vector<8x256xf32>
    %65 = arith.addf %63, %64 : vector<8x256xf32>
    %66 = math.tanh %65 : vector<8x256xf32>
    %c6_i32 = arith.constant 6 : i32
    %c8_i32_36 = arith.constant 8 : i32
    %67 = arith.muli %c6_i32, %c8_i32_36 : i32
    %68 = tpu.assume_multiple %67, 8 : i32
    %69 = arith.index_cast %68 : i32 to index
    %c0_37 = arith.constant 0 : index
    %70 = vector.load %arg12[%69, %c0_37] : memref<64x256xf32, #tpu.memory_space<vmem>>, vector<8x256xf32>
    %cst_38 = arith.constant dense<0.000000e+00> : vector<8x256xf32>
    %71 = tpu.matmul %66, %23, %cst_38 {dimension_numbers = #tpu.dot_dimension_numbers<[1], [0], [0], [1], [0, 0, 1, 1], [], []>} : vector<8x256xf32>, vector<256x256xf32>, vector<8x256xf32> -> vector<8x256xf32>
    %72 = arith.addf %70, %71 : vector<8x256xf32>
    %73 = math.tanh %72 : vector<8x256xf32>
    %c7_i32 = arith.constant 7 : i32
    %c8_i32_39 = arith.constant 8 : i32
    %74 = arith.muli %c7_i32, %c8_i32_39 : i32
    %75 = tpu.assume_multiple %74, 8 : i32
    %76 = arith.index_cast %75 : i32 to index
    %c0_40 = arith.constant 0 : index
    %77 = vector.load %arg12[%76, %c0_40] : memref<64x256xf32, #tpu.memory_space<vmem>>, vector<8x256xf32>
    %cst_41 = arith.constant dense<0.000000e+00> : vector<8x256xf32>
    %78 = tpu.matmul %73, %23, %cst_41 {dimension_numbers = #tpu.dot_dimension_numbers<[1], [0], [0], [1], [0, 0, 1, 1], [], []>} : vector<8x256xf32>, vector<256x256xf32>, vector<8x256xf32> -> vector<8x256xf32>
    %79 = arith.addf %77, %78 : vector<8x256xf32>
    %80 = math.tanh %79 : vector<8x256xf32>
    %c8_i32_42 = arith.constant 8 : i32
    %c0_43 = arith.constant 0 : index
    %c0_44 = arith.constant 0 : index
    %81 = vector.load %arg9[%c0_43, %c0_44] : memref<256x3xf32, #tpu.memory_space<vmem>>, vector<256x3xf32>
    %cst_45 = arith.constant dense<0.000000e+00> : vector<8x3xf32>
    %82 = tpu.matmul %80, %81, %cst_45 {dimension_numbers = #tpu.dot_dimension_numbers<[1], [0], [0], [1], [0, 0, 1, 1], [], []>} : vector<8x256xf32>, vector<256x3xf32>, vector<8x3xf32> -> vector<8x3xf32>
    %c0_46 = arith.constant 0 : index
    %c0_47 = arith.constant 0 : index
    %83 = vector.load %arg10[%c0_46, %c0_47] : memref<1x3xf32, #tpu.memory_space<vmem>>, vector<1x3xf32>
    %84 = vector.broadcast %83 : vector<1x3xf32> to vector<8x3xf32>
    %85 = arith.addf %82, %84 : vector<8x3xf32>
    %86 = arith.negf %85 : vector<8x3xf32>
    %87 = math.exp %86 : vector<8x3xf32>
    %cst_48 = arith.constant 1.000000e+00 : f32
    %88 = vector.broadcast %cst_48 : f32 to vector<8x3xf32>
    %89 = arith.addf %88, %87 : vector<8x3xf32>
    %90 = arith.divf %88, %89 : vector<8x3xf32>
    %c0_49 = arith.constant 0 : index
    %c0_50 = arith.constant 0 : index
    %91 = vector.load %arg11[%c0_49, %c0_50] : memref<8x3xf32, #tpu.memory_space<vmem>>, vector<8x3xf32>
    tpu.vector_store %arg11[%c0_49, %c0_50], %90 {strides = array<i32>} : memref<8x3xf32, #tpu.memory_space<vmem>>, vector<8x3xf32>,
    return
  }
  func.func @transform_0(%arg0: i32) -> (i32, i32) {
    %c0_i32 = arith.constant 0 : i32
    %c0_i32_0 = arith.constant 0 : i32
    %c0_i32_1 = arith.constant 0 : i32
    return %c0_i32, %c0_i32_0 : i32, i32
  }
  func.func @transform_1(%arg0: i32) -> (i32, i32) {
    %c0_i32 = arith.constant 0 : i32
    %c0_i32_0 = arith.constant 0 : i32
    %c0_i32_1 = arith.constant 0 : i32
    return %c0_i32, %c0_i32_0 : i32, i32
  }
  func.func @transform_2(%arg0: i32) -> (i32, i32) {
    %c0_i32 = arith.constant 0 : i32
    %c0_i32_0 = arith.constant 0 : i32
    %c0_i32_1 = arith.constant 0 : i32
    return %c0_i32, %c0_i32_0 : i32, i32
  }
  func.func @transform_3(%arg0: i32) -> (i32, i32) {
    %c0_i32 = arith.constant 0 : i32
    %c0_i32_0 = arith.constant 0 : i32
    %c0_i32_1 = arith.constant 0 : i32
    return %c0_i32, %c0_i32_0 : i32, i32
  }
  func.func @transform_4(%arg0: i32) -> (i32, i32) {
    %c0_i32 = arith.constant 0 : i32
    %c0_i32_0 = arith.constant 0 : i32
    %c0_i32_1 = arith.constant 0 : i32
    return %c0_i32, %c0_i32_0 : i32, i32
  }
  func.func @transform_5(%arg0: i32) -> (i32, i32) {
    %c0_i32 = arith.constant 0 : i32
    %c0_i32_0 = arith.constant 0 : i32
    %c0_i32_1 = arith.constant 0 : i32
    return %c0_i32, %c0_i32_0 : i32, i32
  }
  func.func @transform_6(%arg0: i32) -> (i32, i32) {
    %c0_i32 = arith.constant 0 : i32
    %c0_i32_0 = arith.constant 0 : i32
    %c0_i32_1 = arith.constant 0 : i32
    return %c0_i32, %c0_i32_0 : i32, i32
  }
  func.func @transform_7(%arg0: i32) -> (i32, i32) {
    %c0_i32 = arith.constant 0 : i32
    %c0_i32_0 = arith.constant 0 : i32
    %c0_i32_1 = arith.constant 0 : i32
    return %c0_i32, %c0_i32_0 : i32, i32
  }
  func.func @transform_8(%arg0: i32) -> (i32, i32) {
    %c0_i32 = arith.constant 0 : i32
    %c0_i32_0 = arith.constant 0 : i32
    %c0_i32_1 = arith.constant 0 : i32
    return %c0_i32, %c0_i32_0 : i32, i32
  }
  func.func @transform_9(%arg0: i32) -> (i32, i32) {
    %c0_i32 = arith.constant 0 : i32
    %c0_i32_0 = arith.constant 0 : i32
    %c0_i32_1 = arith.constant 0 : i32
    return %c0_i32, %c0_i32_0 : i32, i32
  }
  func.func @transform_10(%arg0: i32) -> (i32, i32) {
    %c0_i32 = arith.constant 0 : i32
    %c0_i32_0 = arith.constant 0 : i32
    %c0_i32_1 = arith.constant 0 : i32
    return %c0_i32, %c0_i32_0 : i32, i32
  }
}

</mosaic_0001>

<bundles_post_ra>
// kernel: tpu_custom_call.1
= control target key start
LH: loop header
LB: loop body
LE: loop exit
PB: predicated region body
PF: predicated region fallthrough
CT: control target
= control target key end

     0   :  { %15 = vsyncpa [#allocation4], 0  ;;  %s5619_s0 = inlined_call_operand.vmem [shape: f32[64,1], index: 0, kind: input, shape index: {}]   ;;  %s5620_s1 = inlined_call_operand.vmem [shape: f32[64,300], index: 1, kind: input, shape index: {}]   ;;  %s5621_s2 = inlined_call_operand.vmem [shape: f32[1,40], index: 2, kind: input, shape index: {}]   ;;  %s5622_s3 = inlined_call_operand.vmem [shape: f32[1,40], index: 3, kind: input, shape index: {}]   ;;  %s5623_s4 = inlined_call_operand.vmem [shape: f32[40,256], index: 4, kind: input, shape index: {}]   ;;  %s5624_s5 = inlined_call_operand.hbm [shape: f32[300,256], index: 5, kind: input, shape index: {}]   ;;  %s5625_s6 = inlined_call_operand.vmem [shape: f32[1,256], index: 6, kind: input, shape index: {}]   ;;  %s5626_s7 = inlined_call_operand.hbm [shape: f32[256,256], index: 7, kind: input, shape index: {}]   ;;  %s5627_s8 = inlined_call_operand.vmem [shape: f32[256,3], index: 8, kind: input, shape index: {}]   ;;  %s5628_s9 = inlined_call_operand.vmem [shape: f32[1,3], index: 9, kind: input, shape index: {}]   ;;  %s5629_s10 = inlined_call_operand.vmem [shape: f32[8,3], index: 10, kind: output, shape index: {}]  }
   0x1   :  { %s31_s15 = sshll.u32 %s5624_s5, 4  ;;  %s32_s15 = int_to_ptr.hbm [resolvable:$true] %s31_s15 }
   0x2   :  { %16 = vsyncpa [#allocation6], 0  ;;  %s3074_s16 = smov [#allocation3]   ;;  %s46_s20 = sshll.u32 %s5626_s7, 4  ;;  %s47_s20 = int_to_ptr.hbm [resolvable:$true] %s46_s20 }
   0x3   :  { %s33_s17 = sshll.u32 %s3074_s16, 4  ;;  %s3075_s21 = smov 256   ;;  %s34_s17 = int_to_ptr.vmem [resolvable:$true] %s33_s17 }
   0x4   :  { %s3076_s22 = smov 16   ;;  %s3077_s23 = smov [#allocation5]  }
   0x5   :  { %39 = dma.hbm_to_vmem [thread:$0]  %s32_s15, 9728, %s34_s17, [#allocation4], %s3075_s21, %s3075_s21, %s3076_s22  }
   0x6   :  { %s48_s24 = sshll.u32 %s3077_s23, 4  ;;  %s49_s24 = int_to_ptr.vmem [resolvable:$true] %s48_s24 }
   0x7   :  { %54 = dma.hbm_to_vmem [thread:$0]  %s47_s20, 8192, %s49_s24, [#allocation6], %s3075_s21, %s3075_s21, %s3076_s22  }
   0x8   :  { %3070 = dma.done.wait [#allocation4], 9728  }
   0x9   :  { %3071 = vsyncadd [#allocation4], 4294957568 }
   0xa   :  { %3072 = dma.done.wait [#allocation6], 8192  }
   0xb   :  { %3073 = vsyncadd [#allocation6], 4294959104  ;;  %v5641_v0 = vmov 0   ;;  %v71_v1 = vld [vmem:[%s5619_s0 + $0x20] sm:$0xff]  ;;  %v69_v2 = vld [vmem:[%s5619_s0 + $0x10] sm:$0xff]  ;;  %vm1525_vm0 = vcmask 1043456  }
   0xc   :  { %2888 = vset.pattern.permute.xlu2 %v5641_v0  ;;  %2887 = vset.pattern.permute.xlu1 %v5641_v0  ;;  %v67_v3 = vld [vmem:[%s5619_s0] sm:$0xff]  ;;  %v1454_v4 = vld [vmem:[#allocation3 + $0xf0] sm:$0xff]  ;;  %v72_v9 = vld [vmem:[%s5619_s0 + $0x28] sm:$0xff]  ;;  %vm1500_vm1 = vcmask 359424  }
   0xd   :  { %2886 = vset.pattern.permute.xlu0 %v5641_v0  ;;  %98 = vperm.xlu2 %2888, %v71_v1   ;;  %v1452_v5 = vld [vmem:[#allocation3 + $0xe0] sm:$0xff]  ;;  %v1450_v6 = vld [vmem:[#allocation3 + $0xd0] sm:$0xff]  ;;  %v70_v10 = vld [vmem:[%s5619_s0 + $0x18] sm:$0xff] }
   0xe   :  { %88 = vperm.xlu1 %2887, %v69_v2   ;;  %78 = vperm.xlu0 %2886, %v67_v3   ;;  %v1498_v7 = vld [vmem:[#allocation3 + $0x250] sm:$0xf]  ;;  %v1496_v8 = vld [vmem:[#allocation3 + $0x240] sm:$0xff]  ;;  %v68_v11 = vld [vmem:[%s5619_s0 + $0x8] sm:$0xff] }
   0xf   :  { %1532 = vmatpush.msra.mxu0 %v1454_v4  ;;  %2833 = vmatpush.msk.msra.mxu2 %vm1525_vm0, %v1498_v7  ;;  %v1448_v12 = vld [vmem:[#allocation3 + $0xc0] sm:$0xff]  ;;  %v1494_v13 = vld [vmem:[#allocation3 + $0x230] sm:$0xff]  ;;  %v74_v19 = vld [vmem:[%s5619_s0 + $0x38] sm:$0xff] }
  0x10   :  { %v1446_v14 = vld [vmem:[#allocation3 + $0xb0] sm:$0xff]  ;;  %v1492_v15 = vld [vmem:[#allocation3 + $0x220] sm:$0xff]  ;;  %v3185_v30 = vld [vmem:[%s5620_s1 + $0x28] sm:$0xff] }
  0x11   :  { %1533 = vmatpush.msra.mxu0 %v1452_v5  ;;  %1625 = vmatpush.msra.mxu2 %v1496_v8  ;;  %v1444_v16 = vld [vmem:[#allocation3 + $0xa0] sm:$0xff]  ;;  %v1490_v17 = vld [vmem:[#allocation3 + $0x210] sm:$0xff]  ;;  %v3205_v35 = vld [vmem:[%s5620_s1 + $0x18] sm:$0xff] }
  0x12   :  { %v1442_v18 = vld [vmem:[#allocation3 + $0x90] sm:$0xff]  ;;  %v1488_v20 = vld [vmem:[#allocation3 + $0x200] sm:$0xff]  ;;  %v3211_v38 = vld [vmem:[%s5620_s1 + $0x58] sm:$0xff] }
  0x13   :  { %1534 = vmatpush.msra.mxu0 %v1450_v6  ;;  %1626 = vmatpush.msra.mxu2 %v1494_v13  ;;  %v73_v21 = vld [vmem:[%s5619_s0 + $0x30] sm:$0xff]  ;;  %v1440_v22 = vld [vmem:[#allocation3 + $0x80] sm:$0xff]  ;;  %v1487_v46 = vld [vmem:[#allocation3 + $0x1f8] sm:$0xff] }
  0x14   :  { %v3178_v23 = vld [vmem:[%s5620_s1 + $0x10] sm:$0xff]  ;;  %v1436_v25 = vld [vmem:[#allocation3 + $0x60] sm:$0xff]  ;;  %v1455_v49 = vld [vmem:[#allocation3 + $0xf8] sm:$0xff] }
  0x15   :  { %103 = vperm.xlu2 %2888, %v72_v9   ;;  %1535 = vmatpush.msra.mxu0 %v1448_v12  ;;  %v1438_v24 = vld [vmem:[#allocation3 + $0x70] sm:$0xff]  ;;  %v1432_v27 = vld [vmem:[#allocation3 + $0x40] sm:$0xff]  ;;  %v1485_v50 = vld [vmem:[#allocation3 + $0x1e8] sm:$0xff] }
  0x16   :  { %93 = vperm.xlu1 %2887, %v70_v10   ;;  %83 = vperm.xlu0 %2886, %v68_v11   ;;  %v1434_v26 = vld [vmem:[#allocation3 + $0x50] sm:$0xff]  ;;  %v1428_v29 = vld [vmem:[#allocation3 + $0x20] sm:$0xff]  ;;  %v3241_v52 = vld [vmem:[%s5620_s1 + $0x48] sm:$0xff] }
  0x17   :  { %1536 = vmatpush.msra.mxu0 %v1446_v14  ;;  %1627 = vmatpush.msra.mxu2 %v1492_v15  ;;  %v1430_v28 = vld [vmem:[#allocation3 + $0x30] sm:$0xff]  ;;  %v1424_v32 = vld [vmem:[#allocation3] sm:$0xff]  ;;  %v1453_v54 = vld [vmem:[#allocation3 + $0xe8] sm:$0xff] }
  0x18   :  { %v1426_v31 = vld [vmem:[#allocation3 + $0x10] sm:$0xff]  ;;  %v3192_v33 = vld [vmem:[%s5620_s1] sm:$0xff]  ;;  %1655 = vmatpush.msra.mxu3 %v1455_v49  ;;  %v1483_v55 = vld [vmem:[#allocation3 + $0x1d8] sm:$0xff] }
  0x19   :  { %1537 = vmatpush.msra.mxu0 %v1444_v16  ;;  %1628 = vmatpush.msra.mxu2 %v1490_v17  ;;  %v3198_v34 = vld [vmem:[%s5620_s1 + $0x40] sm:$0xff]  ;;  %v1486_v36 = vld [vmem:[#allocation3 + $0x1f0] sm:$0xff]  ;;  %v1451_v59 = vld [vmem:[#allocation3 + $0xd8] sm:$0xff] }
  0x1a   :  { %1573 = vmatpush.msra.mxu1 %v1486_v36  ;;  %v1484_v37 = vld [vmem:[#allocation3 + $0x1e0] sm:$0xff]  ;;  %v1482_v39 = vld [vmem:[#allocation3 + $0x1d0] sm:$0xff]  ;;  %1656 = vmatpush.msra.mxu3 %v1453_v54  ;;  %v1481_v60 = vld [vmem:[#allocation3 + $0x1c8] sm:$0xff] }
  0x1b   :  { %1538 = vmatpush.msra.mxu0 %v1442_v18  ;;  %1629 = vmatpush.msra.mxu2 %v1488_v20  ;;  %v1480_v40 = vld [vmem:[#allocation3 + $0x1c0] sm:$0xff]  ;;  %v3218_v41 = vld [vmem:[%s5620_s1 + $0x30] sm:$0xff]  ;;  %v3251_v62 = vld [vmem:[%s5620_s1 + $0x88] sm:$0xff] }
  0x1c   :  { %2834 = vmatmul.msk.f32.vlgmr.msra.gmra.mxu2 %vm1500_vm1, %v3178_v23  ;;  %1574 = vmatpush.msra.mxu1 %v1484_v37  ;;  %v1478_v42 = vld [vmem:[#allocation3 + $0x1b0] sm:$0xff]  ;;  %v1476_v43 = vld [vmem:[#allocation3 + $0x1a0] sm:$0xff]  ;;  %v1449_v1 = vld [vmem:[#allocation3 + $0xc8] sm:$0xff] }
  0x1d   :  { %1539 = vmatpush.msra.mxu0 %v1440_v22  ;;  %v3224_v44 = vld [vmem:[%s5620_s1 + $0x70] sm:$0xff]  ;;  %v3231_v47 = vld [vmem:[%s5621_s2] ss:$0 sm:$0xff]  ;;  %1696 = vmatpush.msrb.mxu2 %v1487_v46  ;;  %v1479_v2 = vld [vmem:[#allocation3 + $0x1b8] sm:$0xff] }
  0x1e   :  { %113 = vperm.xlu1 %2887, %v74_v19   ;;  %108 = vperm.xlu0 %2886, %v73_v21   ;;  %v1474_v45 = vld [vmem:[#allocation3 + $0x190] sm:$0xff]  ;;  %v1472_v48 = vld [vmem:[#allocation3 + $0x180] sm:$0xff]  ;;  %v1447_v4 = vld [vmem:[#allocation3 + $0xb8] sm:$0xff] }
  0x1f   :  { %1540 = vmatpush.msra.mxu0 %v1438_v24  ;;  %1575 = vmatpush.msra.mxu1 %v1482_v39  ;;  %v3236_v51 = vld [vmem:[%s5622_s3] ss:$0 sm:$0xff]  ;;  %v1470_v53 = vld [vmem:[#allocation3 + $0x170] sm:$0xff]  ;;  %v1477_v5 = vld [vmem:[#allocation3 + $0x1a8] sm:$0xff] }
  0x20   :  { %1697 = vmatpush.msrb.mxu2 %v1485_v50  ;;  %v1468_v58 = vld [vmem:[#allocation3 + $0x160] sm:$0xff]  ;;  %1657 = vmatpush.msra.mxu3 %v1451_v59  ;;  %v1466_v63 = vld [vmem:[#allocation3 + $0x150] sm:$0xff]  ;;  %v1445_v9 = vld [vmem:[#allocation3 + $0xa8] sm:$0xff] }
  0x21   :  { %1541 = vmatpush.msra.mxu0 %v1436_v25  ;;  %1576 = vmatpush.msra.mxu1 %v1480_v40  ;;  %v1464_v3 = vld [vmem:[#allocation3 + $0x140] sm:$0xff]  ;;  %v1462_v8 = vld [vmem:[#allocation3 + $0x130] sm:$0xff]  ;;  %v1475_v10 = vld [vmem:[#allocation3 + $0x198] sm:$0xff] }
  0x22   :  { %1698 = vmatpush.msrb.mxu2 %v1483_v55  ;;  %1658 = vmatpush.msra.mxu3 %v1449_v1  ;;  %v3258_v6 = vld [vmem:[%s5620_s1 + $0x60] sm:$0xff]  ;;  %v1443_v14 = vld [vmem:[#allocation3 + $0x98] sm:$0xff]  ;;  %v1473_v15 = vld [vmem:[#allocation3 + $0x188] sm:$0xff] }
  0x23   :  { %1542 = vmatpush.msra.mxu0 %v1434_v26  ;;  %1577 = vmatpush.msra.mxu1 %v1478_v42  ;;  %v1460_v13 = vld [vmem:[#allocation3 + $0x120] sm:$0xff]  ;;  %v1458_v17 = vld [vmem:[#allocation3 + $0x110] sm:$0xff]  ;;  %v1441_v18 = vld [vmem:[#allocation3 + $0x88] sm:$0xff] }
  0x24   :  { %2835 = vmatmul.msk.f32.gmra.mxu2 %vm1500_vm1, %v3185_v30  ;;  %1659 = vmatpush.msra.mxu3 %v1447_v4  ;;  %v3268_v16 = vld [vmem:[%s5620_s1 + $0xa0] sm:$0xff]  ;;  %v1471_v19 = vld [vmem:[#allocation3 + $0x178] sm:$0xff]  ;;  %v1469_v22 = vld [vmem:[#allocation3 + $0x168] sm:$0xff] }
  0x25   :  { %1543 = vmatpush.msra.mxu0 %v1432_v27  ;;  %1578 = vmatpush.msra.mxu1 %v1476_v43  ;;  %v1456_v20 = vld [vmem:[#allocation3 + $0x100] sm:$0xff]  ;;  %v1439_v21 = vld [vmem:[#allocation3 + $0x78] sm:$0xff]  ;;  %v1401_v25 = vld [vmem:[%s5620_s1 + $0x8] sm:$0xff] }
  0x26   :  { %1699 = vmatpush.msrb.mxu2 %v1481_v60  ;;  %1660 = vmatpush.msra.mxu3 %v1445_v9  ;;  %v3275_v24 = vld [vmem:[%s5620_s1 + $0x78] sm:$0xff]  ;;  %v1437_v26 = vld [vmem:[#allocation3 + $0x68] sm:$0xff]  ;;  %v3291_v42 = vld [vmem:[%s5620_s1 + $0x90] sm:$0xff] }
  0x27   :  { %1544 = vmatpush.msra.mxu0 %v1430_v28  ;;  %1579 = vmatpush.msra.mxu1 %v1474_v45  ;;  %v1467_v27 = vld [vmem:[#allocation3 + $0x158] sm:$0xff]  ;;  %v1461_v39 = vld [vmem:[#allocation3 + $0x128] sm:$0xff]  ;;  %v3296_v43 = vld [vmem:[%s5620_s1 + $0x20] sm:$0xff] }
  0x28   :  { %1700 = vmatpush.msrb.mxu2 %v1479_v2  ;;  %1661 = vmatpush.msra.mxu3 %v1443_v14  ;;  %v1435_v28 = vld [vmem:[#allocation3 + $0x58] sm:$0xff]  ;;  %v1457_v55 = vld [vmem:[#allocation3 + $0x108] sm:$0xff] }
  0x29   :  { %1545 = vmatpush.msra.mxu0 %v1428_v29  ;;  %1580 = vmatpush.msra.mxu1 %v1472_v48  ;;  %v1465_v29 = vld [vmem:[#allocation3 + $0x148] sm:$0xff]  ;;  %v1463_v36 = vld [vmem:[#allocation3 + $0x138] sm:$0xff] }
  0x2a   :  { %1701 = vmatpush.msrb.mxu2 %v1477_v5  ;;  %1662 = vmatpush.msra.mxu3 %v1441_v18  ;;  %v1431_v37 = vld [vmem:[#allocation3 + $0x38] sm:$0xff]  ;;  %v1429_v48 = vld [vmem:[#allocation3 + $0x28] sm:$0xff] }
  0x2b   :  { %1546 = vmatpush.msra.mxu0 %v1426_v31  ;;  %1581 = vmatpush.msra.mxu1 %v1470_v53  ;;  %v3284_v31 = vld [vmem:[%s5620_s1 + $0xb8] sm:$0xff]  ;;  %v1497_v60 = vld [vmem:[#allocation3 + $0x248] sm:$0xff] }
  0x2c   :  { %2836 = vmatmul.msk.f32.gmra.mxu2 %vm1500_vm1, %v3198_v34  ;;  %1663 = vmatpush.msra.mxu3 %v1439_v21  ;;  %v1459_v49 = vld [vmem:[#allocation3 + $0x118] sm:$0xff]  ;;  %v1399_v2 = vld [vmem:[%s5623_s4 + $0x48] sm:$0xff] }
  0x2d   :  { %1547 = vmatpush.msra.mxu0 %v1424_v32  ;;  %1582 = vmatpush.msra.mxu1 %v1468_v58  ;;  %v1433_v32 = vld [vmem:[#allocation3 + $0x48] sm:$0xff]  ;;  %v1427_v54 = vld [vmem:[#allocation3 + $0x18] sm:$0xff] }
  0x2e   :  { %1548 = vmatmul.f32.vlgmr.msra.gmra.mxu0 %v3192_v33  ;;  %1702 = vmatpush.msrb.mxu2 %v1475_v10  ;;  %v1425_v58 = vld [vmem:[#allocation3 + $0x8] sm:$0xff]  ;;  %v3324_v5 = vld [vmem:[%s5620_s1 + $0x38] sm:$0xff] }
  0x2f   :  { %1583 = vmatpush.msra.mxu1 %v1466_v63  ;;  %1664 = vmatpush.msra.mxu3 %v1437_v26  ;;  %v3319_v4 = vld [vmem:[%s5620_s1 + $0xa8] sm:$0xff]  ;;  %v1495_v9 = vld [vmem:[#allocation3 + $0x238] sm:$0xff] }
  0x30   :  { %1703 = vmatpush.msrb.mxu2 %v1473_v15  ;;  %v1397_v14 = vld [vmem:[%s5623_s4 + $0x38] sm:$0xff]  ;;  %v3331_v15 = vld [vmem:[#allocation5 + $0xf0] sm:$0xff] }
  0x31   :  { %1584 = vmatpush.msra.mxu1 %v1464_v3  ;;  %1665 = vmatpush.msra.mxu3 %v1435_v28  ;;  %v1491_v28 = vld [vmem:[#allocation3 + $0x218] sm:$0xff] }
  0x32   :  { %1704 = vmatpush.msrb.mxu2 %v1471_v19 }
  0x33   :  { %1585 = vmatpush.msra.mxu1 %v1462_v8  ;;  %1666 = vmatpush.msra.mxu3 %v1433_v32 }
  0x34   :  { %2837 = vmatmul.msk.f32.gmra.mxu2 %vm1500_vm1, %v3211_v38 }
  0x35   :  { %1586 = vmatpush.msra.mxu1 %v1460_v13  ;;  %1705 = vmatpush.msrb.mxu2 %v1469_v22  ;;  %v1395_v22 = vld [vmem:[%s5623_s4 + $0x28] sm:$0xff] }
  0x36   :  { %1551 = vmatmul.f32.gmra.mxu0 %v3205_v35  ;;  %1667 = vmatpush.msra.mxu3 %v1431_v37  ;;  %v1489_v37 = vld [vmem:[#allocation3 + $0x208] sm:$0xff] }
  0x37   :  { %1587 = vmatpush.msra.mxu1 %v1458_v17  ;;  %1706 = vmatpush.msrb.mxu2 %v1467_v27 }
  0x38   :  { %1668 = vmatpush.msra.mxu3 %v1429_v48 }
  0x39   :  { %1588 = vmatpush.msra.mxu1 %v1456_v20  ;;  %1707 = vmatpush.msrb.mxu2 %v1465_v29 }
  0x3a   :  { %1589 = vmatmul.f32.vlgmr.msra.gmra.mxu1 %v1401_v25  ;;  %1669 = vmatpush.msra.mxu3 %v1427_v54  ;;  %v3364_v54 = vld [vmem:[#allocation5 + $0x1f0] sm:$0xff] }
  0x3b   :  { %1708 = vmatpush.msrb.mxu2 %v1463_v36 }
  0x3c   :  { %2838 = vmatmul.msk.f32.gmra.mxu2 %vm1500_vm1, %v3224_v44  ;;  %1670 = vmatpush.msra.mxu3 %v1425_v58 }
  0x3d   :  { %1709 = vmatpush.msrb.mxu2 %v1461_v39  ;;  %1671 = vmatmul.f32.vlgmr.msra.gmra.mxu3 %v3192_v33  ;;  %v1493_v33 = vld [vmem:[#allocation3 + $0x228] sm:$0xff]  ;;  %v3351_v39 = vld [vmem:[#allocation5 + $0xd0] sm:$0xff] }
  0x3e   :  { %1554 = vmatmul.f32.gmra.mxu0 %v3218_v41  ;;  %1855 = vmatpush.msrb.mxu3 %v1399_v2 }
  0x3f   :  { %1710 = vmatpush.msrb.mxu2 %v1459_v49 }
  0x40   :  { %1856 = vmatpush.msrb.mxu3 %v1397_v14 }
  0x41   :  { %1711 = vmatpush.msrb.mxu2 %v1457_v55 }
  0x42   :  { %1592 = vmatmul.f32.gmra.mxu1 %v3296_v43  ;;  %1857 = vmatpush.msrb.mxu3 %v1395_v22 }
  0x43   :  { %1992 = vmatpush.msra.mxu2 %v3331_v15 }
  0x44   :  { %2839 = vmatmul.msk.f32.gmra.mxu2 %vm1500_vm1, %v3251_v62 }
  0x45   :  { %1674 = vmatmul.f32.gmra.mxu3 %v3205_v35  ;;  %v3377_v35 = vld [vmem:[#allocation5 + $0xb0] sm:$0xff] }
  0x46   :  { %1557 = vmatmul.f32.gmra.mxu0 %v3241_v52 }
  0x4a   :  { %1595 = vmatmul.f32.gmra.mxu1 %v3324_v5 }
  0x4c   :  { %2840 = vmatmul.msk.f32.gmra.mxu2 %vm1500_vm1, %v3268_v16 }
  0x4d   :  { %1677 = vmatmul.f32.gmra.mxu3 %v3218_v41  ;;  %v3440_v41 = vld [vmem:[#allocation5 + $0x80] sm:$0xff] }
  0x4e   :  { %1560 = vmatmul.f32.gmra.mxu0 %v3258_v6 }
  0x54   :  { %2841 = vmatmul.msk.f32.gmra.mxu2 %vm1500_vm1, %v3284_v31 }
  0x55   :  { %1680 = vmatmul.f32.gmra.mxu3 %v3241_v52  ;;  %v1398_v52 = vld [vmem:[%s5623_s4 + $0x40] sm:$0xff] }
  0x56   :  { %1563 = vmatmul.f32.gmra.mxu0 %v3275_v24 }
  0x5c   :  { %1712 = vmatmul.f32.vlgmr.msrb.gmra.mxu2 %v1401_v25  ;;  %v3343_v25 = vld [vmem:[#allocation5 + $0xe0] sm:$0xff] }
  0x5d   :  { %1993 = vmatpush.msra.mxu2 %v3343_v25  ;;  %1683 = vmatmul.f32.gmra.mxu3 %v3258_v6  ;;  %v1392_v6 = vld [vmem:[%s5623_s4 + $0x10] sm:$0xff] }
  0x5e   :  { %1566 = vmatmul.f32.gmra.mxu0 %v3291_v42 }
  0x5f   :  { %1994 = vmatpush.msra.mxu2 %v3351_v39 }
  0x64   :  { %1715 = vmatmul.f32.gmra.mxu2 %v3296_v43 }
  0x65   :  { %1686 = vmatmul.f32.gmra.mxu3 %v3275_v24 }
  0x66   :  { %1569 = vmatmul.f32.gmra.mxu0 %v3319_v4 }
  0x67   :  { %v99_v56 = vpop.permute.xlu2 %98 }
  0x68   :  { %v123_v57 = vmul.f32 %v3231_v47, %v99_v56 }
  0x6a   :  { %v3246_v61 = vadd.f32 %v3236_v51, %v123_v57  ;;  %v1499_v57 = vld [vmem:[#allocation3 + $0x258] sm:$0xf] }
  0x6b   :  { %2868 = vmatpush.msk.msrb.mxu1 %vm1525_vm0, %v1499_v57  ;;  %2842 = vmatpush.msk.msrb.mxu0 %vm1525_vm0, %v1499_v57  ;;  %v1393_v57 = vld [vmem:[%s5623_s4 + $0x18] sm:$0xff] }
  0x6c   :  { %5725 = vst [vmem:[#allocation9_spill] sm:$0xff] %v3246_v61  ;;  %v765_v45 = vand.u32 2139095040, %v3246_v61  ;;  %1858 = vmatpush.msrb.mxu3 %v1393_v57  ;;  %1718 = vmatmul.f32.gmra.mxu2 %v3324_v5 }
  0x6d   :  { %1748 = vmatpush.msrb.mxu0 %v1497_v60  ;;  %2869 = vmatpush.msrb.mxu1 %v1497_v60  ;;  %v3379_v60 = vld [vmem:[#allocation5 + $0x1e0] sm:$0xff] }
  0x6e   :  { %v766_v59 = vshrl.u32 %v765_v45, 23  ;;  %5730 = vst [vmem:[#allocation14_spill] sm:$0xff] %v3379_v60  ;;  %1689 = vmatmul.f32.gmra.mxu3 %v3291_v42 }
  0x6f   :  { %v104_v7 = vpop.permute.xlu2 %103  ;;  %1749 = vmatpush.msrb.mxu0 %v1495_v9  ;;  %2870 = vmatpush.msrb.mxu1 %v1495_v9 }
  0x70   :  { %v124_v11 = vmul.f32 %v3231_v47, %v104_v7  ;;  %v2821_v10 = vadd.s32 4294967169, %v766_v59 }
  0x71   :  { %1750 = vmatpush.msrb.mxu0 %v1493_v33  ;;  %2871 = vmatpush.msrb.mxu1 %v1493_v33  ;;  %v3406_v33 = vld [vmem:[#allocation5 + $0x1c0] sm:$0xff] }
  0x72   :  { %v3263_v12 = vadd.f32 %v3236_v51, %v124_v11  ;;  %v772_v29 = vadd.s32 1, %v2821_v10  ;;  %v3390_v10 = vld [vmem:[#allocation5 + $0x1d0] sm:$0xff]  ;;  %5734 = vst [vmem:[#allocation18_spill] sm:$0xff] %v3406_v33 }
  0x73   :  { %1751 = vmatpush.msrb.mxu0 %v1491_v28  ;;  %2872 = vmatpush.msrb.mxu1 %v1491_v28  ;;  %5732 = vst [vmem:[#allocation16_spill] sm:$0xff] %v3390_v10  ;;  %v3418_v28 = vld [vmem:[%s5620_s1 + $0x68] sm:$0xff] }
  0x74   :  { %5726 = vst [vmem:[#allocation10_spill] sm:$0xff] %v3263_v12  ;;  %v920_v63 = vand.u32 2139095040, %v3263_v12  ;;  %vm773_vm3 = vcmp.gt.s32.totalorder %v772_v29, 0 }
  0x75   :  { %1752 = vmatpush.msrb.mxu0 %v1489_v37  ;;  %2873 = vmatpush.msrb.mxu1 %v1489_v37  ;;  %v3426_v37 = vld [vmem:[#allocation5 + $0x90] sm:$0xff] }
  0x76   :  { %v921_v17 = vshrl.u32 %v920_v63, 23  ;;  %2843 = vmatmul.msk.f32.vlgmr.msrb.gmra.mxu0 %vm1500_vm1, %v3178_v23  ;;  %1692 = vmatmul.f32.gmra.mxu3 %v3319_v4 }
  0x77   :  { %2012 = vmatpush.msra.mxu0 %v3364_v54  ;;  %1814 = vmatpush.msra.mxu1 %v1398_v52 }
  0x78   :  { %v2824_v32 = vadd.s32 4294967169, %v921_v17  ;;  %v3402_v17 = vld [vmem:[#allocation5 + $0xa0] sm:$0xff] }
  0x79   :  { %2013 = vmatpush.msra.mxu0 %v3379_v60  ;;  %v5757_v60 = vmov 920167782  }
  0x7a   :  { %v927_v58 = vadd.s32 1, %v2824_v32 }
  0x7b   :  { %2014 = vmatpush.msra.mxu0 %v3390_v10 }
  0x7c   :  { %vm928_vm4 = vcmp.gt.s32.totalorder %v927_v58, 0 }
  0x7d   :  { %v3431_v5 = vsel %vm928_vm4, %v927_v58, 0  ;;  %2015 = vmatpush.msra.mxu0 %v3406_v33  ;;  %v5635_v58 = vmov 2475754826  }
  0x7e   :  { %5737 = vst [vmem:[#allocation21_spill] sm:$0xff] %v3431_v5  ;;  %2844 = vmatmul.msk.f32.gmra.mxu0 %vm1500_vm1, %v3185_v30 }
  0x80   :  { %v89_v40 = vpop.permute.xlu1 %88  ;;  %v79_v46 = vpop.permute.xlu0 %78 }
  0x81   :  { %v119_v50 = vmul.f32 %v3231_v47, %v79_v46  ;;  %v121_v53 = vmul.f32 %v3231_v47, %v89_v40  ;;  %v3357_v46 = vld [vmem:[%s5620_s1 + $0x50] sm:$0xff] }
  0x82   :  { %1598 = vmatmul.f32.gmra.mxu1 %v3357_v46  ;;  %1721 = vmatmul.f32.gmra.mxu2 %v3357_v46 }
  0x83   :  { %v3304_v56 = vadd.f32 %v3236_v51, %v119_v50  ;;  %v3314_v3 = vadd.f32 %v3236_v51, %v121_v53  ;;  %v3362_v53 = vld [vmem:[#allocation5 + $0xc0] sm:$0xff] }
  0x84   :  { %1995 = vmatpush.msra.mxu2 %v3362_v53 }
  0x85   :  { %v145_v1 = vand.u32 2139095040, %v3304_v56  ;;  %5727 = vst [vmem:[#allocation11_spill] sm:$0xff] %v3314_v3  ;;  %v455_v20 = vand.u32 2139095040, %v3314_v3  ;;  %v5630_v63 = vand.u32 2147483647, %v3304_v56 }
  0x86   :  { %1996 = vmatpush.msra.mxu2 %v3377_v35  ;;  %2845 = vmatmul.msk.f32.gmra.mxu0 %vm1500_vm1, %v3198_v34  ;;  %v1396_v34 = vld [vmem:[%s5623_s4 + $0x30] sm:$0xff] }
  0x87   :  { %v146_v7 = vshrl.u32 %v145_v1, 23  ;;  %v456_v40 = vshrl.u32 %v455_v20, 23  ;;  %v149_v20 = vand.u32 8388607, %v5630_v63  ;;  %1815 = vmatpush.msra.mxu1 %v1396_v34 }
  0x88   :  { %v94_v8 = vpop.permute.xlu1 %93  ;;  %v84_v13 = vpop.permute.xlu0 %83  ;;  %1997 = vmatpush.msra.mxu2 %v3402_v17 }
  0x89   :  { %v122_v11 = vmul.f32 %v3231_v47, %v94_v8  ;;  %v2809_v18 = vadd.s32 4294967169, %v146_v7  ;;  %v120_v19 = vmul.f32 %v3231_v47, %v84_v13  ;;  %v2815_v1 = vadd.s32 4294967169, %v456_v40  ;;  %v3428_v40 = vld [vmem:[#allocation5 + $0x1b0] sm:$0xff] }
  0x8a   :  { %v5633_v8 = vmov 920167782   ;;  %v5631_v13 = vmov 1326507024   ;;  %5736 = vst [vmem:[#allocation20_spill] sm:$0xff] %v3428_v40  ;;  %1601 = vmatmul.f32.gmra.mxu1 %v3418_v28  ;;  %v150_v57 = vor.u32 8388608, %v149_v20  ;;  %1998 = vmatpush.msra.mxu2 %v3426_v37 }
  0x8b   :  { %v3338_v21 = vadd.f32 %v3236_v51, %v122_v11  ;;  %v152_v26 = vadd.s32 1, %v2809_v18  ;;  %v3346_v27 = vadd.f32 %v3236_v51, %v120_v19  ;;  %v3393_v11 = vsel %vm773_vm3, %v772_v29, 0  ;;  %2016 = vmatpush.msra.mxu0 %v3428_v40  ;;  %v3459_v20 = vld [vmem:[#allocation5 + $0x190] sm:$0xff]  ;;  %1724 = vmatmul.f32.gmra.mxu2 %v3418_v28 }
  0x8c   :  { %v5637_v18 = vmov 2102212464   ;;  %v462_v22 = vadd.s32 1, %v2815_v1  ;;  %v3422_v29 = vand.u32 31, %v3393_v11  ;;  %5739 = vst [vmem:[#allocation23_spill] sm:$0xff] %v3459_v20  ;;  %1999 = vmatpush.msra.mxu2 %v3440_v41  ;;  %v3493_v46 = vshrl.u32 %v3393_v11, 5 }
  0x8d   :  { %5728 = vst [vmem:[#allocation12_spill] sm:$0xff] %v3338_v21  ;;  %vm153_vm2 = vcmp.gt.s32.totalorder %v152_v26, 0  ;;  %v300_v36 = vand.u32 2139095040, %v3346_v27  ;;  %v3511_v11 = vand.u32 31, %v3431_v5  ;;  %v1394_v5 = vld [vmem:[%s5623_s4 + $0x20] sm:$0xff] }
  0x8e   :  { %5729 = vst [vmem:[#allocation13_spill] sm:$0xff] %v3346_v27  ;;  %v154_v45 = vsel %vm153_vm2, %v152_v26, 0  ;;  %vm463_vm5 = vcmp.gt.s32.totalorder %v462_v22, 0  ;;  %1816 = vmatpush.msra.mxu1 %v1394_v5  ;;  %2846 = vmatmul.msk.f32.gmra.mxu0 %vm1500_vm1, %v3211_v38 }
  0x8f   :  { %v3359_v48 = vand.u32 31, %v154_v45  ;;  %v301_v49 = vshrl.u32 %v300_v36, 23  ;;  %v3410_v26 = vshrl.u32 %v154_v45, 5  ;;  %5735 = vst [vmem:[#allocation19_spill] sm:$0xff] %v3422_v29 }
  0x90   :  { %v114_v50 = vpop.permute.xlu1 %113  ;;  %v109_v55 = vpop.permute.xlu0 %108  ;;  %5741 = vst [vmem:[#allocation25_spill] sm:$0xff] %v3493_v46  ;;  %1817 = vmatpush.msra.mxu1 %v1392_v6 }
  0x91   :  { %v126_v43 = vmul.f32 %v3231_v47, %v114_v50  ;;  %v3372_v59 = vsub.s32 32, %v3359_v48  ;;  %v125_v7 = vmul.f32 %v3231_v47, %v109_v55  ;;  %v2812_v9 = vadd.s32 4294967169, %v301_v49  ;;  %v3442_v55 = vld [vmem:[#allocation5 + $0x1a0] sm:$0xff]  ;;  %5744 = vst [vmem:[#allocation28_spill] sm:$0xff] %v3511_v11 }
  0x92   :  { %v168_v19 = vshll.u32 %v5637_v18, %v3359_v48  ;;  %v610_v49 = vand.u32 2139095040, %v3338_v21  ;;  %v5643_v50 = vmov 683565275   ;;  %5738 = vst [vmem:[#allocation22_spill] sm:$0xff] %v3442_v55  ;;  %vm177_vm6 = vcmp.lt.s32.totalorder %v3410_v26, 4  ;;  %2017 = vmatpush.msra.mxu0 %v3442_v55 }
  0x93   :  { %v3383_v2 = vadd.f32 %v3236_v51, %v126_v43  ;;  %v169_v23 = vshrl.u32 %v5633_v8, %v3372_v59  ;;  %v172_v47 = vshrl.u32 %v5631_v13, %v3372_v59  ;;  %v3398_v14 = vadd.f32 %v3236_v51, %v125_v7 }
  0x94   :  { %v171_v51 = vshll.u32 %v5633_v8, %v3359_v48  ;;  %v307_v36 = vadd.s32 1, %v2812_v9  ;;  %v159_v43 = vshll.u32 %v5643_v50, %v3359_v48  ;;  %v160_v1 = vshrl.u32 %v5635_v58, %v3372_v59  ;;  %2018 = vmatpush.msra.mxu0 %v3459_v20  ;;  %v3592_v20 = vld [vmem:[#allocation5 + $0x130] sm:$0xff] }
  0x95   :  { %5731 = vst [vmem:[#allocation15_spill] sm:$0xff] %v3383_v2  ;;  %v170_v32 = vor.u32 %v169_v23, %v168_v19  ;;  %v162_v7 = vshll.u32 %v5635_v58, %v3359_v48  ;;  %v5639_v23 = vmov 2131351028   ;;  %v611_v8 = vshrl.u32 %v610_v49, 23  ;;  %v3464_v58 = vld [vmem:[#allocation5 + $0x70] sm:$0xff] }
  0x96   :  { %5733 = vst [vmem:[#allocation17_spill] sm:$0xff] %v3398_v14  ;;  %v173_v45 = vor.u32 %v172_v47, %v171_v51  ;;  %v163_v9 = vshrl.u32 %v5639_v23, %v3372_v59  ;;  %v165_v30 = vshll.u32 %v5639_v23, %v3359_v48  ;;  %v166_v47 = vshrl.u32 %v5637_v18, %v3372_v59  ;;  %v3469_v23 = vld [vmem:[#allocation5 + $0x180] sm:$0xff] }
  0x97   :  { %v183_v19 = vsel %vm177_vm6, %v170_v32, 920167782  ;;  %vm308_vm7 = vcmp.gt.s32.totalorder %v307_v36, 0  ;;  %v161_v51 = vor.u32 %v160_v1, %v159_v43  ;;  %vm174_vm8 = vcmp.lt.s32.totalorder %v3410_v26, 1  ;;  %5740 = vst [vmem:[#allocation24_spill] sm:$0xff] %v3469_v23  ;;  %v3481_v1 = vld [vmem:[%s5620_s1 + $0x80] sm:$0xff]  ;;  %2000 = vmatpush.msra.mxu2 %v3464_v58  ;;  %2019 = vmatpush.msra.mxu0 %v3469_v23 }
  0x98   :  { %v164_v63 = vor.u32 %v163_v9, %v162_v7  ;;  %v187_v13 = vsel %vm177_vm6, %v173_v45, 1326507024  ;;  %v167_v48 = vor.u32 %v166_v47, %v165_v30  ;;  %v464_v18 = vsel %vm463_vm5, %v462_v22, 0  ;;  %v1391_v22 = vld [vmem:[%s5623_s4 + $0x8] sm:$0xff]  ;;  %v3500_v9 = vld [vmem:[#allocation5 + $0x60] sm:$0xff]  ;;  %v3502_v30 = vld [vmem:[#allocation5 + $0x170] sm:$0xff]  ;;  %1604 = vmatmul.f32.gmra.mxu1 %v3481_v1  ;;  %1727 = vmatmul.f32.gmra.mxu2 %v3481_v1 }
  0x99   :  { %vm176_vm9 = vcmp.lt.s32.totalorder %v3410_v26, 3  ;;  %v3474_v45 = vshll.u32 %v150_v57, 8  ;;  %v309_v49 = vsel %vm308_vm7, %v307_v36, 0  ;;  %vm175_vm10 = vcmp.lt.s32.totalorder %v3410_v26, 2  ;;  %5743 = vst [vmem:[#allocation27_spill] sm:$0xff] %v3502_v30  ;;  %1859 = vmatpush.msrb.mxu3 %v1391_v22  ;;  %2001 = vmatpush.msra.mxu2 %v3500_v9  ;;  %v3609_v26 = vld [vmem:[#allocation5 + $0x120] sm:$0xff] }
  0x9a   :  { %v182_v43 = vsel %vm174_vm8, %v161_v51, %v164_v63  ;;  %v184_v57 = vsel %vm176_vm9, %v167_v48, %v183_v19  ;;  %v186_v36 = vsel %vm174_vm8, %v164_v63, %v167_v48  ;;  %v3496_v7 = vsub.s32 32, %v3422_v29  ;;  %2020 = vmatpush.msra.mxu0 %v3502_v30  ;;  %5749 = vst [vmem:[#allocation32_spill] sm:$0xff] %v3592_v20  ;;  %v3654_v1 = vld [vmem:[#allocation5] sm:$0xff] }
  0x9b   :  { %v3506_v47 = vsel %vm175_vm10, %v182_v43, %v184_v57  ;;  %v188_v19 = vsel %vm176_vm9, %v170_v32, %v187_v13  ;;  %v3513_v0 = vand.u32 31, %v464_v18  ;;  %v2818_v50 = vadd.s32 4294967169, %v611_v8  ;;  %v3526_v13 = vld [vmem:[#allocation5 + $0x50] sm:$0xff]  ;;  %v3528_v8 = vld [vmem:[#allocation5 + $0x160] sm:$0xff]  ;;  %5750 = vst [vmem:[#allocation33_spill] sm:$0xff] %v3609_v26  ;;  %2847 = vmatmul.msk.f32.gmra.mxu0 %vm1500_vm1, %v3224_v44 }
  0x9c   :  { %5742 = vst [vmem:[#allocation26_spill] sm:$0xff] %v3496_v7  ;;  %v189_v43 = vsel %vm175_vm10, %v186_v36, %v188_v19  ;;  %v3521_v57 = vand.u32 31, %v309_v49  ;;  %v5746_v32 = vmov 683565275   ;;  %v179_v12 = vsel %vm177_vm6, %v167_v48, 2102212464  ;;  %2002 = vmatpush.msra.mxu2 %v3526_v13  ;;  %2021 = vmatpush.msra.mxu0 %v3528_v8 }
  0x9d   :  { %5745 = vst [vmem:[#allocation29_spill] sm:$0xff] %v3528_v8  ;;  %v158_v22 = vshrl.u32 %v5746_v32, %v3372_v59  ;;  %v191_v46 = vand.u32 65535, %v3474_v45  ;;  %v192_v36 = vshrl.u32 %v3474_v45, 16  ;;  %v193_v19 = vand.u32 65535, %v189_v43  ;;  %v3544_v48 = vld [vmem:[#allocation5 + $0x150] sm:$0xff] }
  0x9e   :  { %v194_v7 = vshrl.u32 %v189_v43, 16  ;;  %v215_v29 = vand.u32 65535, %v3506_v47  ;;  %v3542_v59 = vshrl.u32 %v464_v18, 5  ;;  %5747 = vst [vmem:[#allocation30_spill] sm:$0xff] %v3544_v48  ;;  %v216_v11 = vshrl.u32 %v3506_v47, 16  ;;  %v3554_v43 = vld [vmem:[#allocation5 + $0x40] sm:$0xff]  ;;  %2022 = vmatpush.msra.mxu0 %v3544_v48 }
  0x9f   :  { %v178_v61 = vsel %vm174_vm8, %v158_v22, %v161_v51  ;;  %v3551_v21 = vsub.s32 32, %v3513_v0  ;;  %v180_v18 = vsel %vm176_vm9, %v164_v63, %v179_v12  ;;  %v3561_v30 = vmul.u32 %v193_v19, %v192_v36  ;;  %v3566_v22 = vld [vmem:[#allocation5 + $0x140] sm:$0xff]  ;;  %2003 = vmatpush.msra.mxu2 %v3554_v43 }
  0xa0   :  { %v3559_v52 = vmul.u32 %v194_v7, %v191_v46  ;;  %v3563_v51 = vadd.s32 1, %v2818_v50  ;;  %5748 = vst [vmem:[#allocation31_spill] sm:$0xff] %v3566_v22  ;;  %v3571_v23 = vmul.u32 %v216_v11, %v191_v46  ;;  %v3573_v8 = vmul.u32 %v215_v29, %v192_v36  ;;  %v3584_v50 = vld [vmem:[%s5620_s1 + $0x98] sm:$0xff]  ;;  %2023 = vmatpush.msra.mxu0 %v3566_v22 }
  0xa1   :  { %v3575_v12 = vshrl.u32 %v309_v49, 5  ;;  %v3578_v63 = vsub.s32 32, %v3521_v57  ;;  %v195_v34 = vmul.u32 %v193_v19, %v191_v46  ;;  %v3590_v49 = vld [vmem:[#allocation5 + $0x30] sm:$0xff]  ;;  %v3596_v28 = vsel %vm175_vm10, %v178_v61, %v180_v18  ;;  %1607 = vmatmul.f32.gmra.mxu1 %v3584_v50  ;;  %v3607_v61 = vld [vmem:[#allocation5 + $0x20] sm:$0xff]  ;;  %1730 = vmatmul.f32.gmra.mxu2 %v3584_v50 }
  0xa2   :  { %v199_v47 = vshll.u32 %v3559_v52, 16  ;;  %v198_v55 = vmul.u32 %v194_v7, %v192_v36  ;;  %v217_v40 = vmul.u32 %v215_v29, %v191_v46  ;;  %v221_v33 = vshll.u32 %v3571_v23, 16  ;;  %2004 = vmatpush.msra.mxu2 %v3590_v49  ;;  %2024 = vmatpush.msra.mxu0 %v3592_v20 }
  0xa3   :  { %v201_v19 = vshll.u32 %v3561_v30, 16  ;;  %v220_v10 = vmul.u32 %v216_v11, %v192_v36  ;;  %v5751_v29 = vmov 0   ;;  %v223_v46 = vshll.u32 %v3573_v8, 16  ;;  %v1390_v11 = vld [vmem:[%s5623_s4] sm:$0xff]  ;;  %2848 = vmatmul.msk.f32.gmra.mxu0 %vm1500_vm1, %v3251_v62 }
  0xa4   :  { %vm203_vm11 = vc.u32 %v195_v34, %v199_v47  ;;  %v205_v48 = vadd.s32 %v199_v47, %v195_v34  ;;  %vm225_vm12 = vc.u32 %v217_v40, %v221_v33  ;;  %v227_v7 = vadd.s32 %v221_v33, %v217_v40  ;;  %v3622_v34 = vld [vmem:[#allocation5 + $0x110] sm:$0xff]  ;;  %2005 = vmatpush.msra.mxu2 %v3607_v61 }
  0xa5   :  { %v204_v5 = vsel %vm203_vm11, 1, %v5751_v29  ;;  %v226_v38 = vsel %vm225_vm12, 1, %v5751_v29  ;;  %v5752_v18 = vand.u32 2147483647, %v3346_v27  ;;  %vm618_vm14 = vcmp.gt.s32.totalorder %v3563_v51, 0  ;;  %5753 = vst [vmem:[#allocation34_spill] sm:$0xff] %v3622_v34  ;;  %2025 = vmatpush.msra.mxu0 %v3609_v26  ;;  %1818 = vmatpush.msra.mxu1 %v1390_v11 }
  0xa6   :  { %v206_v36 = vadd.s32 %v204_v5, %v198_v55  ;;  %vm207_vm13 = vc.u32 %v205_v48, %v201_v19  ;;  %v200_v33 = vshrl.u32 %v3559_v52, 16  ;;  %v228_v20 = vadd.s32 %v226_v38, %v220_v10  ;;  %v3627_v55 = vld [vmem:[#allocation5 + $0x10] sm:$0xff] }
  0xa7   :  { %v304_v47 = vand.u32 8388607, %v5752_v18  ;;  %v208_v40 = vsel %vm207_vm13, 1, %v5751_v29  ;;  %vm229_vm15 = vc.u32 %v227_v7, %v223_v46  ;;  %v222_v19 = vshrl.u32 %v3571_v23, 16  ;;  %v3644_v23 = vld [vmem:[%s5620_s1 + $0xb0] sm:$0xff]  ;;  %2026 = vmatpush.msra.mxu0 %v3622_v34  ;;  %2006 = vmatpush.msra.mxu2 %v3627_v55 }
  0xa8   :  { %v210_v48 = vadd.s32 %v208_v40, %v206_v36  ;;  %v230_v5 = vsel %vm229_vm15, 1, %v5751_v29  ;;  %v3632_v6 = vadd.s32 %v227_v7, %v223_v46  ;;  %v314_v52 = vshll.u32 %v5746_v32, %v3521_v57 }
  0xa9   :  { %v232_v18 = vadd.s32 %v230_v5, %v228_v20  ;;  %v5754_v10 = vmov 2475754826   ;;  %v202_v20 = vshrl.u32 %v3561_v30, 16  ;;  %v5755_v7 = vmov 2131351028   ;;  %1610 = vmatmul.f32.gmra.mxu1 %v3644_v23  ;;  %2007 = vmatpush.msra.mxu2 %v3654_v1 }
  0xaa   :  { %v315_v38 = vshrl.u32 %v5754_v10, %v3578_v63  ;;  %v317_v22 = vshll.u32 %v5754_v10, %v3521_v57  ;;  %v211_v46 = vadd.s32 %v210_v48, %v200_v33  ;;  %v318_v11 = vshrl.u32 %v5755_v7, %v3578_v63  ;;  %1733 = vmatmul.f32.gmra.mxu2 %v3644_v23 }
  0xab   :  { %v320_v36 = vshll.u32 %v5755_v7, %v3521_v57  ;;  %v224_v40 = vshrl.u32 %v3573_v8, 16  ;;  %v233_v5 = vadd.s32 %v232_v18, %v222_v19  ;;  %v5756_v34 = vmov 2102212464   ;;  %2081 = vmatpush.msrb.mxu2 %v3331_v15 }
  0xac   :  { %v316_v26 = vor.u32 %v315_v38, %v314_v52  ;;  %v321_v30 = vshrl.u32 %v5756_v34, %v3578_v63  ;;  %v3659_v33 = vadd.s32 %v211_v46, %v202_v20  ;;  %v319_v48 = vor.u32 %v318_v11, %v317_v22 }
  0xad   :  { %v323_v27 = vshll.u32 %v5756_v34, %v3521_v57  ;;  %v324_v24 = vshrl.u32 %v5757_v60, %v3578_v63  ;;  %v234_v8 = vadd.s32 %v233_v5, %v224_v40  ;;  %v305_v19 = vor.u32 8388608, %v304_v47  ;;  %2082 = vmatpush.msrb.mxu2 %v3343_v25 }
  0xae   :  { %v322_v18 = vor.u32 %v321_v30, %v320_v36  ;;  %vm329_vm0 = vcmp.lt.s32.totalorder %v3575_v12, 1  ;;  %vm237_vm2 = vc.u32 %v3659_v33, %v3632_v6  ;;  %v326_v52 = vshll.u32 %v5757_v60, %v3521_v57 }
  0xaf   :  { %v325_v22 = vor.u32 %v324_v24, %v323_v27  ;;  %v5758_v38 = vmov 1326507024   ;;  %v235_v44 = vmul.u32 %v3474_v45, %v3596_v28  ;;  %v238_v46 = vadd.s32 1, %v234_v8  ;;  %2083 = vmatpush.msrb.mxu2 %v3351_v39 }
  0xb0   :  { %v327_v20 = vshrl.u32 %v5758_v38, %v3578_v63  ;;  %vm332_vm3 = vcmp.lt.s32.totalorder %v3575_v12, 4  ;;  %v337_v47 = vsel %vm329_vm0, %v316_v26, %v319_v48  ;;  %vm330_vm4 = vcmp.lt.s32.totalorder %v3575_v12, 2 }
  0xb1   :  { %vm331_vm5 = vcmp.lt.s32.totalorder %v3575_v12, 3  ;;  %v338_v27 = vsel %vm332_vm3, %v325_v22, 920167782  ;;  %v239_v57 = vsel %vm237_vm2, %v238_v46, %v234_v8  ;;  %v341_v28 = vsel %vm329_vm0, %v319_v48, %v322_v18  ;;  %2849 = vmatmul.msk.f32.vlgmr.msrb.gmra.mxu1 %vm1500_vm1, %v3268_v16  ;;  %2084 = vmatpush.msrb.mxu2 %v3362_v53 }
  0xb2   :  { %v328_v11 = vor.u32 %v327_v20, %v326_v52  ;;  %v339_v45 = vsel %vm331_vm5, %v322_v18, %v338_v27  ;;  %v3690_v36 = vshll.u32 %v305_v19, 8  ;;  %v619_v40 = vsel %vm618_vm14, %v3563_v51, 0 }
  0xb3   :  { %v240_v5 = vadd.s32 %v239_v57, %v235_v44  ;;  %v340_v30 = vsel %vm330_vm4, %v337_v47, %v339_v45  ;;  %v3701_v8 = vshrl.u32 %v619_v40, 5  ;;  %v334_v19 = vsel %vm332_vm3, %v322_v18, 2102212464  ;;  %2085 = vmatpush.msrb.mxu2 %v3377_v35 }
  0xb4   :  { %v342_v24 = vsel %vm332_vm3, %v328_v11, 1326507024  ;;  %v346_v51 = vand.u32 65535, %v3690_v36  ;;  %v370_v44 = vand.u32 65535, %v340_v30  ;;  %v371_v46 = vshrl.u32 %v340_v30, 16 }
  0xb5   :  { %5759 = vst [vmem:[#allocation35_spill] sm:$0xff] %v3701_v8  ;;  %v343_v52 = vsel %vm331_vm5, %v325_v22, %v342_v24  ;;  %v241_v50 = vadd.s32 536870912, %v240_v5  ;;  %v313_v42 = vshrl.u32 %v5746_v32, %v3578_v63  ;;  %v347_v18 = vshrl.u32 %v3690_v36, 16  ;;  %2086 = vmatpush.msrb.mxu2 %v3402_v17 }
  0xb6   :  { %v344_v20 = vsel %vm330_vm4, %v341_v28, %v343_v52  ;;  %v3719_v11 = vand.u32 31, %v619_v40  ;;  %v5760_v27 = vand.u32 2139095040, %v3383_v2  ;;  %v3725_v28 = vmul.u32 %v371_v46, %v346_v51 }
  0xb7   :  { %v348_v22 = vand.u32 65535, %v344_v20  ;;  %v349_v47 = vshrl.u32 %v344_v20, 16  ;;  %v242_v45 = vshrl.u32 %v241_v50, 30  ;;  %v333_v62 = vsel %vm329_vm0, %v313_v42, %v316_v26  ;;  %2087 = vmatpush.msrb.mxu2 %v3426_v37 }
  0xb8   :  { %v3723_v57 = vshrl.u32 %v5760_v27, 23  ;;  %v335_v16 = vsel %vm331_vm5, %v319_v48, %v334_v19  ;;  %v1075_v40 = vand.u32 2139095040, %v3398_v14  ;;  %v3733_v52 = vmul.u32 %v370_v44, %v347_v18 }
  0xb9   :  { %v351_v63 = vmul.u32 %v349_v47, %v346_v51  ;;  %v352_v30 = vmul.u32 %v348_v22, %v347_v18  ;;  %v243_v24 = vshll.u32 %v242_v45, 30  ;;  %v376_v20 = vshll.u32 %v3725_v28, 16  ;;  %2850 = vmatmul.msk.f32.gmra.mxu1 %vm1500_vm1, %v3284_v31  ;;  %2088 = vmatpush.msrb.mxu2 %v3440_v41 }
  0xba   :  { %vm144_vm6 = vcmp.lt.s32.totalorder %v3304_v56, 0  ;;  %v350_v50 = vmul.u32 %v348_v22, %v346_v51  ;;  %v372_v2 = vmul.u32 %v370_v44, %v346_v51  ;;  %v3743_v48 = vsel %vm330_vm4, %v333_v62, %v335_v16 }
  0xbb   :  { %v354_v27 = vshll.u32 %v351_v63, 16  ;;  %v3739_v26 = vsub.s32 %v240_v5, %v243_v24  ;;  %v353_v19 = vmul.u32 %v349_v47, %v347_v18  ;;  %v375_v42 = vmul.u32 %v371_v46, %v347_v18  ;;  %2089 = vmatpush.msrb.mxu2 %v3464_v58 }
  0xbc   :  { %v356_v14 = vshll.u32 %v352_v30, 16  ;;  %vm380_vm8 = vc.u32 %v372_v2, %v376_v20  ;;  %v378_v12 = vshll.u32 %v3733_v52, 16  ;;  %v382_v44 = vadd.s32 %v376_v20, %v372_v2 }
  0xbd   :  { %vm358_vm7 = vc.u32 %v350_v50, %v354_v27  ;;  %v360_v8 = vadd.s32 %v354_v27, %v350_v50  ;;  %vm245_vm9 = vcmp.lt.s32.totalorder %v3739_v26, 0  ;;  %v246_v23 = vsub.s32 0, %v3739_v26  ;;  %2090 = vmatpush.msrb.mxu2 %v3500_v9 }
  0xbe   :  { %v359_v5 = vsel %vm358_vm7, 1, %v5751_v29  ;;  %v381_v4 = vsel %vm380_vm8, 1, %v5751_v29  ;;  %v266_v18 = vsub.s32 4, %v242_v45  ;;  %v355_v16 = vshrl.u32 %v351_v63, 16 }
  0xbf   :  { %v361_v51 = vadd.s32 %v359_v5, %v353_v19  ;;  %vm362_vm10 = vc.u32 %v360_v8, %v356_v14  ;;  %v247_v46 = vsel %vm245_vm9, %v246_v23, %v3739_v26  ;;  %v383_v47 = vadd.s32 %v381_v4, %v375_v42  ;;  %2091 = vmatpush.msrb.mxu2 %v3526_v13 }
  0xc0   :  { %v363_v22 = vsel %vm362_vm10, 1, %v5751_v29  ;;  %v248_v62 = vclz %v247_v46  ;;  %vm384_vm11 = vc.u32 %v382_v44, %v378_v12  ;;  %v3759_v31 = vsub.s32 32, %v3719_v11 }
  0xc1   :  { %v365_v24 = vadd.s32 %v363_v22, %v361_v51  ;;  %v377_v14 = vshrl.u32 %v3725_v28, 16  ;;  %v385_v2 = vsel %vm384_vm11, 1, %v5751_v29  ;;  %v5678_v8 = vand.u32 2147483647, %v3314_v3  ;;  %2092 = vmatpush.msrb.mxu2 %v3554_v43  ;;  %v1984_v3 = vld [vmem:[#allocation5 + $0x1e8] sm:$0xff] }
  0xc2   :  { %v2810_v20 = vadd.s32 4294967294, %v248_v62  ;;  %v357_v50 = vshrl.u32 %v352_v30, 16  ;;  %v387_v19 = vadd.s32 %v385_v2, %v383_v47  ;;  %v3765_v63 = vshrl.u32 %v1075_v40, 23 }
  0xc3   :  { %v366_v27 = vadd.s32 %v365_v24, %v355_v16  ;;  %v5679_v42 = vmov 0.0   ;;  %v236_v23 = vadd.s32 %v3632_v6, %v3659_v33  ;;  %v3772_v28 = vsel %vm144_vm6, %v266_v18, %v242_v45  ;;  %2093 = vmatpush.msrb.mxu2 %v3590_v49 }
  0xc4   :  { %2008 = vmatmul.f32.vlgmr.msra.gmra.mxu2 %v5679_v42  ;;  %v390_v5 = vmul.u32 %v3690_v36, %v3743_v48  ;;  %v5761_v30 = vand.u32 2147483647, %v3304_v56  ;;  %vm2811_vm12 = vcmp.lt.s32.totalorder %v2810_v20, 0  ;;  %v379_v4 = vshrl.u32 %v3733_v52, 16  ;;  %v3822_v42 = vld [vmem:[#allocation5 + $0x100] sm:$0xff] }
  0xc5   :  { %v3782_v40 = vadd.s32 %v366_v27, %v357_v50  ;;  %v388_v46 = vadd.s32 %v387_v19, %v377_v14  ;;  %v251_v6 = vsel %vm2811_vm12, 0, %v2810_v20  ;;  %v3786_v33 = vadd.s32 %v382_v44, %v378_v12  ;;  %2094 = vmatpush.msrb.mxu2 %v3607_v61  ;;  %2027 = vmatpush.msra.mxu0 %v3822_v42 }
  0xc6   :  { %vm3778_vm1 = vcmp.le.f32.partialorder %v5761_v30, 0.7853982  ;;  %v3790_v36 = vand.u32 8388607, %v5678_v8  ;;  %v469_v45 = vshll.u32 %v5746_v32, %v3513_v0  ;;  %v252_v48 = vsub.s32 32, %v251_v6  ;;  %v1986_v8 = vld [vmem:[#allocation5 + $0x1f8] sm:$0xff] }
  0xc7   :  { %v256_v18 = vsub.s32 4294967266, %v251_v6  ;;  %v389_v22 = vadd.s32 %v388_v46, %v379_v4  ;;  %v470_v47 = vshrl.u32 %v5754_v10, %v3551_v21  ;;  %v253_v52 = vshll.u32 %v3739_v26, %v251_v6  ;;  %2052 = vmatpush.msra.mxu3 %v1986_v8  ;;  %2095 = vmatpush.msrb.mxu2 %v3627_v55 }
  0xc8   :  { %vm392_vm13 = vc.u32 %v3782_v40, %v3786_v33  ;;  %v472_v12 = vshll.u32 %v5754_v10, %v3513_v0  ;;  %v473_v44 = vshrl.u32 %v5755_v7, %v3551_v21  ;;  %v254_v62 = vshrl.u32 %v236_v23, %v252_v48  ;;  %2101 = vmatpush.msrb.mxu0 %v3364_v54 }
  0xc9   :  { %v257_v16 = vadd.s32 127, %v256_v18  ;;  %v393_v24 = vadd.s32 1, %v389_v22  ;;  %v475_v14 = vshll.u32 %v5755_v7, %v3513_v0  ;;  %v476_v26 = vshrl.u32 %v5756_v34, %v3551_v21  ;;  %2053 = vmatpush.msra.mxu3 %v1984_v3  ;;  %2096 = vmatpush.msrb.mxu2 %v3654_v1 }
  0xca   :  { %v478_v2 = vshll.u32 %v5756_v34, %v3513_v0  ;;  %v479_v20 = vshrl.u32 %v5757_v60, %v3551_v21  ;;  %v481_v50 = vshll.u32 %v5757_v60, %v3513_v0  ;;  %v255_v27 = vor.u32 %v254_v62, %v253_v52 }
  0xcb   :  { %v258_v19 = vshll.u32 %v257_v16, 23  ;;  %v394_v23 = vsel %vm392_vm13, %v393_v24, %v389_v22  ;;  %v482_v30 = vshrl.u32 %v5758_v38, %v3551_v21  ;;  %v139_v4 = vlaneseq  ;;  %2170 = vmatpush.msra.mxu2 %v3331_v15 }
  0xcc   :  { %v395_v46 = vadd.s32 %v394_v23, %v390_v5  ;;  %v3818_v6 = vor.u32 %v473_v44, %v472_v12  ;;  %v3820_v48 = vor.u32 %v476_v26, %v475_v14  ;;  %v480_v0 = vor.u32 %v479_v20, %v478_v2  ;;  %v1954_v5 = vld [vmem:[#allocation5 + $0xf8] sm:$0xff] }
  0xcd   :  { %v259_v18 = vor.u32 4788187, %v258_v19  ;;  %v483_v52 = vor.u32 %v482_v30, %v481_v50  ;;  %vm484_vm14 = vcmp.lt.s32.totalorder %v3542_v59, 1  ;;  %v269_v22 = vsel %vm3778_vm1, 0, %v3772_v28  ;;  %2032 = vmatpush.msrb.mxu1 %v1954_v5  ;;  %2171 = vmatpush.msra.mxu2 %v3343_v25 }
  0xce   :  { %v396_v12 = vadd.s32 536870912, %v395_v46  ;;  %v460_v44 = vor.u32 8388608, %v3790_v36  ;;  %vm487_vm15 = vcmp.lt.s32.totalorder %v3542_v59, 4  ;;  %v262_v16 = vcvt.s32.f32 %v255_v27 }
  0xcf   :  { %v260_v62 = vand.u32 2147483647, %v259_v18  ;;  %v5764_v24 = vmov 0.0   ;;  %v471_v14 = vor.u32 %v470_v47, %v469_v45  ;;  %vm486_vm0 = vcmp.lt.s32.totalorder %v3542_v59, 3  ;;  %2172 = vmatpush.msra.mxu2 %v3351_v39 }
  0xd0   :  { %2028 = vmatmul.f32.vlgmr.msra.gmra.mxu0 %v5764_v24  ;;  %v3835_v26 = vadd.s32 4294967169, %v3723_v57  ;;  %v3837_v8 = vshrl.u32 %v396_v12, 30  ;;  %vm485_vm2 = vcmp.lt.s32.totalorder %v3542_v59, 2  ;;  %v496_v28 = vsel %vm484_vm14, %v3818_v6, %v3820_v48  ;;  %v1950_v59 = vld [vmem:[#allocation5 + $0xd8] sm:$0xff] }
  0xd1   :  { %v263_v36 = vmul.f32 %v262_v16, %v260_v62  ;;  %v286_v2 = vadd.s32 3, %v269_v22  ;;  %v493_v45 = vsel %vm487_vm15, %v480_v0, 920167782  ;;  %v497_v57 = vsel %vm487_vm15, %v483_v52, 1326507024  ;;  %2173 = vmatpush.msra.mxu2 %v3362_v53 }
  0xd2   :  { %v3851_v3 = vadd.s32 4294967169, %v3765_v63  ;;  %v3853_v47 = vand.u32 127, %v139_v4  ;;  %v398_v20 = vshll.u32 %v3837_v8, 30  ;;  %v498_v50 = vsel %vm486_vm0, %v480_v0, %v497_v57  ;;  %v5765_v63 = vld [vmem:[#allocation14_spill] sm:$0xff] }
  0xd3   :  { %v264_v27 = vxor.u32 2147483648, %v263_v36  ;;  %v492_v19 = vsel %vm484_vm14, %v471_v14, %v3818_v6  ;;  %v499_v54 = vsel %vm485_vm2, %v496_v28, %v498_v50  ;;  %v3864_v23 = vshll.u32 %v460_v44, 8  ;;  %2102 = vmatpush.msrb.mxu0 %v5765_v63  ;;  %v5766_v44 = vld [vmem:[#allocation16_spill] sm:$0xff]  ;;  %2174 = vmatpush.msra.mxu2 %v3377_v35 }
  0xd4   :  { %v3868_v30 = vsub.s32 %v395_v46, %v398_v20  ;;  %v494_v4 = vsel %vm486_vm0, %v3820_v48, %v493_v45  ;;  %v503_v18 = vand.u32 65535, %v499_v54  ;;  %v504_v0 = vshrl.u32 %v499_v54, 16  ;;  %v5767_v46 = vld [vmem:[#allocation13_spill] sm:$0xff]  ;;  %v5769_v63 = vld [vmem:[#allocation20_spill] sm:$0xff] }
  0xd5   :  { %v265_v52 = vsel %vm144_vm6, %v264_v27, %v263_v36  ;;  %v3875_v22 = vand.u32 3, %v286_v2  ;;  %v501_v5 = vand.u32 65535, %v3864_v23  ;;  %v3879_v12 = vshrl.u32 %v3864_v23, 16  ;;  %2103 = vmatpush.msrb.mxu0 %v5766_v44  ;;  %v5768_v2 = vld [vmem:[#allocation18_spill] sm:$0xff]  ;;  %2175 = vmatpush.msra.mxu2 %v3402_v17 }
  0xd6   :  { %v3886_v15 = vsel %vm3778_vm1, %v3304_v56, %v265_v52  ;;  %vm299_vm3 = vcmp.lt.s32.totalorder %v5767_v46, 0  ;;  %vm400_vm4 = vcmp.lt.s32.totalorder %v3868_v30, 0  ;;  %v401_v62 = vsub.s32 0, %v3868_v30 }
  0xd7   :  { %v468_v16 = vshrl.u32 %v5746_v32, %v3551_v21  ;;  %v270_v28 = vmul.f32 %v3886_v15, %v3886_v15  ;;  %v3897_v25 = vsel %vm485_vm2, %v492_v19, %v494_v4  ;;  %v3899_v36 = vmul.u32 %v504_v0, %v501_v5  ;;  %2104 = vmatpush.msrb.mxu0 %v5768_v2 }
  0xd8   :  { %v3902_v51 = vmul.u32 %v503_v18, %v3879_v12  ;;  %v391_v45 = vadd.s32 %v3786_v33, %v3782_v40  ;;  %v402_v57 = vsel %vm400_vm4, %v401_v62, %v3868_v30  ;;  %v489_v21 = vsel %vm487_vm15, %v3820_v48, 2102212464  ;;  %v5770_v62 = vld [vmem:[#allocation22_spill] sm:$0xff]  ;;  %2176 = vmatpush.msra.mxu2 %v3426_v37 }
  0xd9   :  { %v505_v20 = vmul.u32 %v503_v18, %v501_v5  ;;  %v271_v50 = vmul.f32 -0.001358992, %v270_v28  ;;  %v278_v27 = vmul.f32 -0.00019511016, %v270_v28  ;;  %v403_v19 = vclz %v402_v57  ;;  %2105 = vmatpush.msrb.mxu0 %v5769_v63 }
  0xda   :  { %v509_v54 = vshll.u32 %v3899_v36, 16  ;;  %v421_v4 = vsub.s32 4, %v3837_v8  ;;  %v3917_v40 = vsel %vm484_vm14, %v468_v16, %v471_v14  ;;  %v508_v33 = vmul.u32 %v504_v0, %v3879_v12  ;;  %2177 = vmatpush.msra.mxu2 %v3440_v41 }
  0xdb   :  { %v526_v48 = vshrl.u32 %v3897_v25, 16  ;;  %v272_v39 = vadd.f32 0.041655596, %v271_v50  ;;  %v279_v18 = vadd.f32 0.008332121, %v278_v27  ;;  %v2813_v52 = vadd.s32 4294967294, %v403_v19  ;;  %2106 = vmatpush.msrb.mxu0 %v5770_v62 }
  0xdc   :  { %v511_v44 = vshll.u32 %v3902_v51, 16  ;;  %v490_v2 = vsel %vm486_vm0, %v3818_v6, %v489_v21  ;;  %vm513_vm5 = vc.u32 %v505_v20, %v509_v54  ;;  %v515_v14 = vadd.s32 %v509_v54, %v505_v20  ;;  %v5771_v50 = vld [vmem:[#allocation23_spill] sm:$0xff]  ;;  %2178 = vmatpush.msra.mxu2 %v3464_v58 }
  0xdd   :  { %v525_v16 = vand.u32 65535, %v3897_v25  ;;  %v273_v0 = vmul.f32 %v272_v39, %v270_v28  ;;  %v280_v57 = vmul.f32 %v279_v18, %v270_v28  ;;  %vm2814_vm6 = vcmp.lt.s32.totalorder %v2813_v52, 0  ;;  %2107 = vmatpush.msrb.mxu0 %v5771_v50  ;;  %v5775_v39 = vld [vmem:[#allocation24_spill] sm:$0xff] }
  0xde   :  { %v514_v53 = vsel %vm513_vm5, 1, %v5751_v29  ;;  %v5772_v27 = vand.u32 2147483647, %v5767_v46  ;;  %v406_v6 = vsel %vm2814_vm6, 0, %v2813_v52  ;;  %vm517_vm8 = vc.u32 %v515_v14, %v511_v44  ;;  %v5776_v14 = vld [vmem:[#allocation27_spill] sm:$0xff]  ;;  %2179 = vmatpush.msra.mxu2 %v3500_v9 }
  0xdf   :  { %v516_v21 = vadd.s32 %v514_v53, %v508_v33  ;;  %v3937_v20 = vmul.u32 %v526_v48, %v501_v5  ;;  %v274_v35 = vadd.f32 -0.4999988, %v273_v0  ;;  %v281_v25 = vadd.f32 -0.16666654, %v280_v57  ;;  %2108 = vmatpush.msrb.mxu0 %v5775_v39 }
  0xe0   :  { %vm3933_vm7 = vcmp.le.f32.partialorder %v5772_v27, 0.7853982  ;;  %v407_v54 = vsub.s32 32, %v406_v6  ;;  %v3943_v63 = vsel %vm299_vm3, %v421_v4, %v3837_v8  ;;  %vm289_vm9 = vcmp.eq.s32.totalorder %v3875_v22, 0  ;;  %2180 = vmatpush.msra.mxu2 %v3526_v13 }
  0xe1   :  { %v411_v18 = vsub.s32 4294967266, %v406_v6  ;;  %v518_v33 = vsel %vm517_vm8, 1, %v5751_v29  ;;  %v527_v52 = vmul.u32 %v525_v16, %v501_v5  ;;  %v3949_v44 = vmul.u32 %v525_v16, %v3879_v12  ;;  %2109 = vmatpush.msrb.mxu0 %v5776_v14  ;;  %v5780_v14 = vld [vmem:[#allocation12_spill] sm:$0xff] }
  0xe2   :  { %v275_v17 = vmul.f32 %v274_v35, %v270_v28  ;;  %v282_v62 = vmul.f32 %v281_v25, %v270_v28  ;;  %vm288_vm10 = vcmp.lt.s32.totalorder %v3875_v22, 2  ;;  %v408_v8 = vshll.u32 %v3868_v30, %v406_v6  ;;  %v1952_v25 = vld [vmem:[#allocation5 + $0xe8] sm:$0xff]  ;;  %2181 = vmatpush.msra.mxu2 %v3554_v43 }
  0xe3   :  { %v409_v4 = vshrl.u32 %v391_v45, %v407_v54  ;;  %vm285_vm11 = vweird.f32 %v3304_v56  ;;  %v412_v0 = vadd.s32 127, %v411_v18  ;;  %v520_v57 = vadd.s32 %v518_v33, %v516_v21  ;;  %v5777_v45 = vld [vmem:[#allocation29_spill] sm:$0xff]  ;;  %v1980_v54 = vld [vmem:[#allocation5 + $0x1c8] sm:$0xff]  ;;  %2033 = vmatpush.msrb.mxu1 %v1952_v25 }
  0xe4   :  { %v531_v5 = vshll.u32 %v3937_v20, 16  ;;  %v533_v16 = vshll.u32 %v3949_v44, 16  ;;  %vm141_vm1 = vcmp.lt.s32.totalorder %v3853_v47, 39  ;;  %v276_v37 = vadd.f32 1.0, %v275_v17  ;;  %2110 = vmatpush.msrb.mxu0 %v5777_v45  ;;  %2182 = vmatpush.msra.mxu2 %v3590_v49 }
  0xe5   :  { %v283_v28 = vadd.f32 1.0, %v282_v62  ;;  %v510_v53 = vshrl.u32 %v3899_v36, 16  ;;  %v530_v30 = vmul.u32 %v526_v48, %v3879_v12  ;;  %v410_v50 = vor.u32 %v409_v4, %v408_v8  ;;  %v5778_v36 = vld [vmem:[#allocation30_spill] sm:$0xff]  ;;  %v1982_v48 = vld [vmem:[#allocation5 + $0x1d8] sm:$0xff]  ;;  %v5779_v8 = vld [vmem:[#allocation31_spill] sm:$0xff]  ;;  %2034 = vmatpush.msrb.mxu1 %v1950_v59 }
  0xe6   :  { %v413_v27 = vshll.u32 %v412_v0, 23  ;;  %vm535_vm12 = vc.u32 %v527_v52, %v531_v5  ;;  %v537_v6 = vadd.s32 %v531_v5, %v527_v52  ;;  %vm292_vm13 = vcmp.eq.s32.totalorder %v3875_v22, 2  ;;  %2111 = vmatpush.msrb.mxu0 %v5778_v36  ;;  %2054 = vmatpush.msra.mxu3 %v1982_v48  ;;  %v5781_v5 = vld [vmem:[#allocation32_spill] sm:$0xff] }
  0xe7   :  { %v284_v21 = vmul.f32 %v283_v28, %v3886_v15  ;;  %v293_v41 = vxor.u32 2147483648, %v276_v37  ;;  %v3969_v35 = vsel %vm485_vm2, %v3917_v40, %v490_v2  ;;  %v521_v39 = vadd.s32 %v520_v57, %v510_v53  ;;  %2183 = vmatpush.msra.mxu2 %v3607_v61 }
  0xe8   :  { %v414_v12 = vor.u32 4788187, %v413_v27  ;;  %v536_v18 = vsel %vm535_vm12, 1, %v5751_v29  ;;  %vm539_vm14 = vc.u32 %v537_v6, %v533_v16  ;;  %v424_v15 = vsel %vm3933_vm7, 0, %v3943_v63  ;;  %2112 = vmatpush.msrb.mxu0 %v5779_v8  ;;  %2055 = vmatpush.msra.mxu3 %v1980_v54  ;;  %v5782_v27 = vld [vmem:[#allocation33_spill] sm:$0xff] }
  0xe9   :  { %v290_v58 = vxor.u32 2147483648, %v284_v21  ;;  %v538_v40 = vadd.s32 %v536_v18, %v530_v30  ;;  %v540_v2 = vsel %vm539_vm14, 1, %v5751_v29  ;;  %v417_v52 = vcvt.s32.f32 %v410_v50  ;;  %2184 = vmatpush.msra.mxu2 %v3627_v55 }
  0xea   :  { %v415_v33 = vand.u32 2147483647, %v414_v12  ;;  %v512_v17 = vshrl.u32 %v3902_v51, 16  ;;  %v532_v62 = vshrl.u32 %v3937_v20, 16  ;;  %v294_v63 = vsel %vm292_vm13, %v293_v41, %v284_v21  ;;  %2113 = vmatpush.msrb.mxu0 %v5781_v5  ;;  %v5783_v21 = vld [vmem:[#allocation34_spill] sm:$0xff] }
  0xeb   :  { %v291_v9 = vsel %vm289_vm9, %v276_v37, %v290_v58  ;;  %v542_v4 = vadd.s32 %v540_v2, %v538_v40  ;;  %v607_v0 = vand.u32 2147483647, %v5780_v14  ;;  %vm1778_vm15 = vcmask 326656   ;;  %2185 = vmatpush.msra.mxu2 %v3654_v1 }
  0xec   :  { %v295_v51 = vsel %vm288_vm10, %v291_v9, %v294_v63  ;;  %v418_v20 = vmul.f32 %v417_v52, %v415_v33  ;;  %v3989_v57 = vadd.s32 %v521_v39, %v512_v17  ;;  %v441_v37 = vadd.s32 3, %v424_v15  ;;  %2114 = vmatpush.msrb.mxu0 %v5782_v27  ;;  %v2928_v15 = vld [vmem:[#allocation5 + $0x1f0] sm:$0xff]  ;;  %v2931_v27 = vld [vmem:[#allocation5 + $0x1c0] sm:$0xff] }
  0xed   :  { %v296_v13 = vsel %vm285_vm11, nan, %v295_v51  ;;  %v534_v28 = vshrl.u32 %v3949_v44, 16  ;;  %v543_v53 = vadd.s32 %v542_v4, %v532_v62  ;;  %v3999_v45 = vadd.s32 %v537_v6, %v533_v16  ;;  %v5784_v17 = vld [vmem:[#allocation35_spill] sm:$0xff]  ;;  %v2929_v62 = vld [vmem:[#allocation5 + $0x1e0] sm:$0xff] }
  0xee   :  { %v1382_v22 = vsel %vm141_vm1, %v296_v13, %v3304_v56  ;;  %v419_v30 = vxor.u32 2147483648, %v418_v20  ;;  %v545_v50 = vmul.u32 %v3864_v23, %v3969_v35  ;;  %v614_v44 = vand.u32 8388607, %v607_v0  ;;  %2115 = vmatpush.msrb.mxu0 %v5783_v21 }
  0xef   :  { %2851 = vmatmul.msk.f32.vlgmr.msra.gmra.mxu1 %vm1778_vm15, %v1382_v22  ;;  %2859 = vmatmul.msk.f32.vlgmr.msrb.gmra.mxu3 %vm1778_vm15, %v1382_v22  ;;  %v544_v43 = vadd.s32 %v543_v53, %v534_v28  ;;  %v627_v56 = vshll.u32 %v5754_v10, %v3719_v11  ;;  %v628_v16 = vshrl.u32 %v5755_v7, %v3759_v31  ;;  %vm639_vm2 = vcmp.lt.s32.totalorder %v5784_v17, 1 }
  0xf0   :  { %v420_v23 = vsel %vm299_vm3, %v419_v30, %v418_v20  ;;  %vm547_vm0 = vc.u32 %v3989_v57, %v3999_v45  ;;  %v630_v49 = vshll.u32 %v5755_v7, %v3719_v11  ;;  %v631_v6 = vshrl.u32 %v5756_v34, %v3759_v31  ;;  %2116 = vmatpush.msrb.mxu0 %v3822_v42  ;;  %v2930_v20 = vld [vmem:[#allocation5 + $0x1d0] sm:$0xff] }
  0xf1   :  { %v4025_v41 = vsel %vm3933_vm7, %v5767_v46, %v420_v23  ;;  %v548_v35 = vadd.s32 1, %v544_v43  ;;  %v624_v36 = vshll.u32 %v5746_v32, %v3719_v11  ;;  %v633_v12 = vshll.u32 %v5756_v34, %v3719_v11 }
  0xf2   :  { %v425_v48 = vmul.f32 %v4025_v41, %v4025_v41  ;;  %v625_v25 = vshrl.u32 %v5754_v10, %v3759_v31  ;;  %v634_v19 = vshrl.u32 %v5757_v60, %v3759_v31  ;;  %v636_v54 = vshll.u32 %v5757_v60, %v3719_v11  ;;  %2190 = vmatpush.msra.mxu0 %v2928_v15 }
  0xf3   :  { %v549_v39 = vsel %vm547_vm0, %v548_v35, %v544_v43  ;;  %v615_v18 = vor.u32 8388608, %v614_v44  ;;  %v4041_v58 = vor.u32 %v628_v16, %v627_v56  ;;  %v637_v61 = vshrl.u32 %v5758_v38, %v3759_v31  ;;  %v5786_v43 = vld [vmem:[#allocation28_spill] sm:$0xff] }
  0xf4   :  { %v426_v59 = vmul.f32 -0.001358992, %v425_v48  ;;  %v433_v40 = vmul.f32 -0.00019511016, %v425_v48  ;;  %v550_v2 = vadd.s32 %v549_v39, %v545_v50  ;;  %v4046_v33 = vor.u32 %v631_v6, %v630_v49  ;;  %2191 = vmatpush.msra.mxu0 %v2929_v62 }
  0xf5   :  { %v635_v52 = vor.u32 %v634_v19, %v633_v12  ;;  %v638_v11 = vor.u32 %v637_v61, %v636_v54  ;;  %vm642_vm3 = vcmp.lt.s32.totalorder %v5784_v17, 4  ;;  %vm641_vm4 = vcmp.lt.s32.totalorder %v5784_v17, 3  ;;  %v2933_v61 = vld [vmem:[#allocation5 + $0x1a0] sm:$0xff] }
  0xf6   :  { %v427_v8 = vadd.f32 0.041655596, %v426_v59  ;;  %v434_v9 = vadd.f32 0.008332121, %v433_v40  ;;  %v551_v63 = vadd.s32 536870912, %v550_v2  ;;  %v4052_v55 = vand.u32 3, %v441_v37  ;;  %2192 = vmatpush.msra.mxu0 %v2930_v20 }
  0xf7   :  { %v4054_v4 = vor.u32 %v625_v25, %v624_v36  ;;  %vm640_vm5 = vcmp.lt.s32.totalorder %v5784_v17, 2  ;;  %v652_v51 = vsel %vm642_vm3, %v638_v11, 1326507024  ;;  %v651_v1 = vsel %vm639_vm2, %v4041_v58, %v4046_v33  ;;  %v5785_v37 = vld [vmem:[#allocation21_spill] sm:$0xff]  ;;  %v2932_v36 = vld [vmem:[#allocation5 + $0x1b0] sm:$0xff] }
  0xf8   :  { %v428_v5 = vmul.f32 %v427_v8, %v425_v48  ;;  %v435_v13 = vmul.f32 %v434_v9, %v425_v48  ;;  %v4059_v28 = vshrl.u32 %v551_v63, 30  ;;  %v4066_v53 = vshrl.u32 %v5785_v37, 5  ;;  %2193 = vmatpush.msra.mxu0 %v2931_v27  ;;  %v2934_v11 = vld [vmem:[#allocation5 + $0x190] sm:$0xff] }
  0xf9   :  { %v648_v22 = vsel %vm642_vm3, %v635_v52, 920167782  ;;  %v653_v30 = vsel %vm641_vm4, %v635_v52, %v652_v51  ;;  %v4072_v50 = vshll.u32 %v615_v18, 8  ;;  %v4075_v44 = vsub.s32 32, %v5786_v43  ;;  %v5787_v63 = vld [vmem:[#allocation11_spill] sm:$0xff] }
  0xfa   :  { %v429_v56 = vadd.f32 -0.4999988, %v428_v5  ;;  %v436_v16 = vadd.f32 -0.16666654, %v435_v13  ;;  %v553_v23 = vshll.u32 %v4059_v28, 30  ;;  %v4079_v49 = vadd.s32 1, %v3835_v26  ;;  %2194 = vmatpush.msra.mxu0 %v2932_v36 }
  0xfb   :  { %v4082_v6 = vadd.s32 1, %v3851_v3  ;;  %v647_v21 = vsel %vm639_vm2, %v4054_v4, %v4041_v58  ;;  %v654_v35 = vsel %vm640_vm5, %v651_v1, %v653_v30  ;;  %vm443_vm6 = vcmp.lt.s32.totalorder %v4052_v55, 2  ;;  %v2935_v1 = vld [vmem:[#allocation5 + $0x180] sm:$0xff] }
  0xfc   :  { %v430_v12 = vmul.f32 %v429_v56, %v425_v48  ;;  %v437_v25 = vmul.f32 %v436_v16, %v425_v48  ;;  %v4091_v19 = vsub.s32 %v550_v2, %v553_v23  ;;  %v649_v26 = vsel %vm641_vm4, %v4046_v33, %v648_v22  ;;  %2195 = vmatpush.msra.mxu0 %v2933_v61 }
  0xfd   :  { %vm440_vm7 = vweird.f32 %v5767_v46  ;;  %v4098_v3 = vand.u32 65535, %v4072_v50  ;;  %v4101_v54 = vshrl.u32 %v4072_v50, 16  ;;  %v658_v39 = vand.u32 65535, %v654_v35 }
  0xfe   :  { %v659_v18 = vshrl.u32 %v654_v35, 16  ;;  %v431_v48 = vadd.f32 1.0, %v430_v12  ;;  %v438_v15 = vadd.f32 1.0, %v437_v25  ;;  %vm555_vm8 = vcmp.lt.s32.totalorder %v4091_v19, 0  ;;  %2196 = vmatpush.msra.mxu0 %v2934_v11 }
  0xff   :  { %v556_v59 = vsub.s32 0, %v4091_v19  ;;  %vm444_vm9 = vcmp.eq.s32.totalorder %v4052_v55, 0  ;;  %v4108_v40 = vsel %vm640_vm5, %v647_v21, %v649_v26  ;;  %v4114_v52 = vmul.u32 %v658_v39, %v4101_v54  ;;  %v2937_v26 = vld [vmem:[#allocation5 + $0x160] sm:$0xff] }
 0x100   :  { %v4111_v2 = vmul.u32 %v659_v18, %v4098_v3  ;;  %v439_v62 = vmul.f32 %v438_v15, %v4025_v41  ;;  %vm447_vm10 = vcmp.eq.s32.totalorder %v4052_v55, 2  ;;  %v448_v8 = vxor.u32 2147483648, %v431_v48  ;;  %2197 = vmatpush.msra.mxu0 %v2935_v1 }
 0x101   :  { %v557_v9 = vsel %vm555_vm8, %v556_v59, %v4091_v19  ;;  %vm454_vm11 = vcmp.lt.s32.totalorder %v5787_v63, 0  ;;  %v546_v51 = vadd.s32 %v3999_v45, %v3989_v57  ;;  %v623_v5 = vshrl.u32 %v5746_v32, %v3759_v31  ;;  %v2936_v31 = vld [vmem:[#allocation5 + $0x170] sm:$0xff] }
 0x102   :  { %v558_v20 = vclz %v557_v9  ;;  %v664_v13 = vshll.u32 %v4111_v2, 16  ;;  %v445_v37 = vxor.u32 2147483648, %v439_v62  ;;  %v644_v41 = vsel %vm642_vm3, %v4046_v33, 2102212464  ;;  %2198 = vmatpush.msra.mxu0 %v2936_v31  ;;  %v5791_v31 = vld [vmem:[#allocation9_spill] sm:$0xff] }
 0x103   :  { %v660_v22 = vmul.u32 %v658_v39, %v4098_v3  ;;  %v680_v30 = vand.u32 65535, %v4108_v40  ;;  %v449_v27 = vsel %vm447_vm10, %v448_v8, %v439_v62  ;;  %v663_v57 = vmul.u32 %v659_v18, %v4101_v54 }
 0x104   :  { %v2816_v56 = vadd.s32 4294967294, %v558_v20  ;;  %v666_v45 = vshll.u32 %v4114_v52, 16  ;;  %v446_v16 = vsel %vm444_vm9, %v431_v48, %v445_v37  ;;  %v681_v21 = vshrl.u32 %v4108_v40, 16  ;;  %2199 = vmatpush.msra.mxu0 %v2937_v26  ;;  %v2938_v40 = vld [vmem:[#allocation5 + $0x150] sm:$0xff] }
 0x105   :  { %vm668_vm12 = vc.u32 %v660_v22, %v664_v13  ;;  %v670_v23 = vadd.s32 %v664_v13, %v660_v22  ;;  %v450_v33 = vsel %vm443_vm6, %v446_v16, %v449_v27  ;;  %v5788_v35 = vand.u32 2147483647, %v5787_v63  ;;  %v2939_v13 = vld [vmem:[#allocation5 + $0x140] sm:$0xff] }
 0x106   :  { %vm2817_vm14 = vcmp.lt.s32.totalorder %v2816_v56, 0  ;;  %v576_v12 = vsub.s32 4, %v4059_v28  ;;  %v669_v25 = vsel %vm668_vm12, 1, %v5751_v29  ;;  %v451_v39 = vsel %vm440_vm7, nan, %v450_v33  ;;  %2200 = vmatpush.msra.mxu0 %v2938_v40  ;;  %v1948_v33 = vld [vmem:[#allocation5 + $0xc8] sm:$0xff] }
 0x107   :  { %vm4139_vm13 = vcmp.le.f32.partialorder %v5788_v35, 0.7853982  ;;  %v561_v18 = vsel %vm2817_vm14, 0, %v2816_v56  ;;  %v671_v61 = vadd.s32 %v669_v25, %v663_v57  ;;  %vm672_vm0 = vc.u32 %v670_v23, %v666_v45  ;;  %v1978_v23 = vld [vmem:[#allocation5 + $0x1b8] sm:$0xff]  ;;  %v2941_v35 = vld [vmem:[#allocation5 + $0x120] sm:$0xff]  ;;  %2035 = vmatpush.msrb.mxu1 %v1948_v33 }
 0x108   :  { %v1383_v55 = vsel %vm141_vm1, %v451_v39, %v5767_v46  ;;  %v562_v48 = vsub.s32 32, %v561_v18  ;;  %v566_v15 = vsub.s32 4294967266, %v561_v18  ;;  %v643_v59 = vsel %vm639_vm2, %v623_v5, %v4054_v4  ;;  %2201 = vmatpush.msra.mxu0 %v2939_v13  ;;  %2056 = vmatpush.msra.mxu3 %v1978_v23 }
 0x109   :  { %2852 = vmatmul.msk.f32.gmra.mxu1 %vm1778_vm15, %v1383_v55  ;;  %2860 = vmatmul.msk.f32.gmra.mxu3 %vm1778_vm15, %v1383_v55  ;;  %v645_v11 = vsel %vm641_vm4, %v4041_v58, %v644_v41  ;;  %v673_v62 = vsel %vm672_vm0, 1, %v5751_v29  ;;  %v683_v46 = vmul.u32 %v681_v21, %v4098_v3  ;;  %v4161_v8 = vmul.u32 %v680_v30, %v4101_v54 }
 0x10a   :  { %v563_v9 = vshll.u32 %v4091_v19, %v561_v18  ;;  %v564_v4 = vshrl.u32 %v546_v51, %v562_v48  ;;  %v567_v20 = vadd.s32 127, %v566_v15  ;;  %v675_v5 = vadd.s32 %v673_v62, %v671_v61  ;;  %v2940_v51 = vld [vmem:[#allocation5 + $0x130] sm:$0xff] }
 0x10b   :  { %v4167_v1 = vsel %vm454_vm11, %v576_v12, %v4059_v28  ;;  %v665_v58 = vshrl.u32 %v4111_v2, 16  ;;  %v682_v37 = vmul.u32 %v680_v30, %v4098_v3  ;;  %v686_v41 = vshll.u32 %v683_v46, 16  ;;  %2202 = vmatpush.msra.mxu0 %v2940_v51  ;;  %v1976_v2 = vld [vmem:[#allocation5 + $0x1a8] sm:$0xff]  ;;  %v2942_v61 = vld [vmem:[#allocation5 + $0x110] sm:$0xff] }
 0x10c   :  { %v565_v22 = vor.u32 %v564_v4, %v563_v9  ;;  %v568_v27 = vshll.u32 %v567_v20, 23  ;;  %v685_v56 = vmul.u32 %v681_v21, %v4101_v54  ;;  %v688_v19 = vshll.u32 %v4161_v8, 16  ;;  %v1946_v21 = vld [vmem:[#allocation5 + $0xb8] sm:$0xff]  ;;  %2057 = vmatpush.msra.mxu3 %v1976_v2 }
 0x10d   :  { %v676_v57 = vadd.s32 %v675_v5, %v665_v58  ;;  %vm690_vm2 = vc.u32 %v682_v37, %v686_v41  ;;  %v692_v45 = vadd.s32 %v686_v41, %v682_v37  ;;  %v762_v16 = vand.u32 2147483647, %v5791_v31  ;;  %2203 = vmatpush.msra.mxu0 %v2941_v35  ;;  %2036 = vmatpush.msrb.mxu1 %v1946_v21 }
 0x10e   :  { %v569_v28 = vor.u32 4788187, %v568_v27  ;;  %v646_v3 = vsel %vm640_vm5, %v643_v59, %v645_v11  ;;  %v691_v30 = vsel %vm690_vm2, 1, %v5751_v29  ;;  %v579_v54 = vsel %vm4139_vm13, 0, %v4167_v1  ;;  %v5792_v11 = vld [vmem:[#allocation19_spill] sm:$0xff] }
 0x10f   :  { %v667_v12 = vshrl.u32 %v4114_v52, 16  ;;  %v693_v25 = vadd.s32 %v691_v30, %v685_v56  ;;  %vm694_vm3 = vc.u32 %v692_v45, %v688_v19  ;;  %v572_v39 = vcvt.s32.f32 %v565_v22  ;;  %2204 = vmatpush.msra.mxu0 %v2942_v61  ;;  %v5794_v30 = vld [vmem:[#allocation25_spill] sm:$0xff] }
 0x110   :  { %v570_v26 = vand.u32 2147483647, %v569_v28  ;;  %v687_v18 = vshrl.u32 %v683_v46, 16  ;;  %v695_v17 = vsel %vm694_vm3, 1, %v5751_v29  ;;  %vm1083_vm4 = vcmp.gt.s32.totalorder %v4082_v6, 0  ;;  %v5793_v46 = vld [vmem:[#allocation26_spill] sm:$0xff] }
 0x111   :  { %v4183_v55 = vadd.s32 %v676_v57, %v667_v12  ;;  %v689_v48 = vshrl.u32 %v4161_v8, 16  ;;  %v4186_v15 = vadd.s32 %v692_v45, %v688_v19  ;;  %v697_v52 = vadd.s32 %v695_v17, %v693_v25  ;;  %2205 = vmatpush.msra.mxu0 %v3822_v42 }
 0x112   :  { %v573_v59 = vmul.f32 %v572_v39, %v570_v26  ;;  %v769_v40 = vand.u32 8388607, %v762_v16  ;;  %v782_v62 = vshll.u32 %v5754_v10, %v5792_v11  ;;  %v783_v9 = vshrl.u32 %v5755_v7, %v5793_v46 }
 0x113   :  { %v698_v4 = vadd.s32 %v697_v52, %v687_v18  ;;  %v785_v20 = vshll.u32 %v5755_v7, %v5792_v11  ;;  %v786_v8 = vshrl.u32 %v5756_v34, %v5793_v46  ;;  %v788_v5 = vshll.u32 %v5756_v34, %v5792_v11 }
 0x114   :  { %v574_v13 = vxor.u32 2147483648, %v573_v59  ;;  %v779_v1 = vshll.u32 %v5746_v32, %v5792_v11  ;;  %v789_v58 = vshrl.u32 %v5757_v60, %v5793_v46  ;;  %v791_v42 = vshll.u32 %v5757_v60, %v5792_v11 }
 0x115   :  { %v699_v37 = vadd.s32 %v698_v4, %v689_v48  ;;  %vm702_vm5 = vc.u32 %v4183_v55, %v4186_v15  ;;  %v780_v41 = vshrl.u32 %v5754_v10, %v5793_v46  ;;  %v792_v22 = vshrl.u32 %v5758_v38, %v5793_v46 }
 0x116   :  { %v575_v27 = vsel %vm454_vm11, %v574_v13, %v573_v59  ;;  %v770_v56 = vor.u32 8388608, %v769_v40  ;;  %v4215_v19 = vor.u32 %v783_v9, %v782_v62  ;;  %v787_v51 = vor.u32 %v786_v8, %v785_v20 }
 0x117   :  { %v4220_v57 = vsel %vm4139_vm13, %v5787_v63, %v575_v27  ;;  %v703_v45 = vadd.s32 1, %v699_v37  ;;  %v790_v28 = vor.u32 %v789_v58, %v788_v5  ;;  %v793_v23 = vor.u32 %v792_v22, %v791_v42 }
 0x118   :  { %v580_v33 = vmul.f32 %v4220_v57, %v4220_v57  ;;  %v700_v2 = vmul.u32 %v4072_v50, %v646_v3  ;;  %vm794_vm6 = vcmp.lt.s32.totalorder %v5794_v30, 1  ;;  %vm797_vm7 = vcmp.lt.s32.totalorder %v5794_v30, 4 }
 0x119   :  { %v596_v35 = vadd.s32 3, %v579_v54  ;;  %v704_v21 = vsel %vm702_vm5, %v703_v45, %v699_v37  ;;  %v4230_v36 = vor.u32 %v780_v41, %v779_v1  ;;  %vm795_vm8 = vcmp.lt.s32.totalorder %v5794_v30, 2 }
 0x11a   :  { %v581_v12 = vmul.f32 -0.001358992, %v580_v33  ;;  %v588_v25 = vmul.f32 -0.00019511016, %v580_v33  ;;  %v705_v26 = vadd.s32 %v704_v21, %v700_v2  ;;  %vm796_vm9 = vcmp.lt.s32.totalorder %v5794_v30, 3 }
 0x11b   :  { %v803_v50 = vsel %vm797_vm7, %v790_v28, 920167782  ;;  %v806_v3 = vsel %vm794_vm6, %v4215_v19, %v787_v51  ;;  %v807_v54 = vsel %vm797_vm7, %v793_v23, 1326507024  ;;  %v4241_v39 = vshll.u32 %v770_v56, 8 }
 0x11c   :  { %v4246_v18 = vsel %vm1083_vm4, %v4082_v6, 0  ;;  %v582_v17 = vadd.f32 0.041655596, %v581_v12  ;;  %v589_v61 = vadd.f32 0.008332121, %v588_v25  ;;  %v706_v48 = vadd.s32 536870912, %v705_v26 }
 0x11d   :  { %v4248_v52 = vand.u32 3, %v596_v35  ;;  %v808_v59 = vsel %vm796_vm9, %v790_v28, %v807_v54  ;;  %v811_v40 = vand.u32 65535, %v4241_v39  ;;  %v4254_v11 = vshrl.u32 %v4241_v39, 16 }
 0x11e   :  { %v583_v62 = vmul.f32 %v582_v17, %v580_v33  ;;  %v590_v9 = vmul.f32 %v589_v61, %v580_v33  ;;  %v707_v4 = vshrl.u32 %v706_v48, 30  ;;  %v809_v6 = vsel %vm795_vm8, %v806_v3, %v808_v59 }
 0x11f   :  { %v802_v20 = vsel %vm794_vm6, %v4230_v36, %v4215_v19  ;;  %v804_v8 = vsel %vm796_vm9, %v787_v51, %v803_v50  ;;  %v813_v5 = vand.u32 65535, %v809_v6  ;;  %v814_v13 = vshrl.u32 %v809_v6, 16 }
 0x120   :  { %v584_v1 = vadd.f32 -0.4999988, %v583_v62  ;;  %v591_v58 = vadd.f32 -0.16666654, %v590_v9  ;;  %vm609_vm10 = vcmp.lt.s32.totalorder %v5780_v14, 0  ;;  %v708_v42 = vshll.u32 %v707_v4, 30 }
 0x121   :  { %v778_v37 = vshrl.u32 %v5746_v32, %v5793_v46  ;;  %v799_v41 = vsel %vm797_vm7, %v787_v51, 2102212464  ;;  %v815_v22 = vmul.u32 %v813_v5, %v811_v40  ;;  %v4269_v27 = vmul.u32 %v814_v13, %v811_v40 }
 0x122   :  { %v4272_v56 = vmul.u32 %v813_v5, %v4254_v11  ;;  %v585_v45 = vmul.f32 %v584_v1, %v580_v33  ;;  %v592_v28 = vmul.f32 %v591_v58, %v580_v33  ;;  %vm598_vm11 = vcmp.lt.s32.totalorder %v4248_v52, 2 }
 0x123   :  { %v4275_v23 = vsub.s32 %v705_v26, %v708_v42  ;;  %v805_v2 = vsel %vm795_vm8, %v802_v20, %v804_v8  ;;  %vm595_vm12 = vweird.f32 %v5787_v63  ;;  %v818_v46 = vmul.u32 %v814_v13, %v4254_v11 }
 0x124   :  { %v819_v51 = vshll.u32 %v4269_v27, 16  ;;  %v821_v35 = vshll.u32 %v4272_v56, 16  ;;  %v835_v21 = vand.u32 65535, %v805_v2  ;;  %v586_v12 = vadd.f32 1.0, %v585_v45 }
 0x125   :  { %v593_v25 = vadd.f32 1.0, %v592_v28  ;;  %vm710_vm13 = vcmp.lt.s32.totalorder %v4275_v23, 0  ;;  %v711_v33 = vsub.s32 0, %v4275_v23  ;;  %vm4287_vm14 = vcmp.le.f32.partialorder %v607_v0, 0.7853982 }
 0x126   :  { %v731_v50 = vsub.s32 4, %v707_v4  ;;  %vm823_vm0 = vc.u32 %v815_v22, %v819_v51  ;;  %v825_v3 = vadd.s32 %v819_v51, %v815_v22  ;;  %v836_v54 = vshrl.u32 %v805_v2, 16 }
 0x127   :  { %v594_v17 = vmul.f32 %v593_v25, %v4220_v57  ;;  %v603_v61 = vxor.u32 2147483648, %v586_v12  ;;  %v712_v48 = vsel %vm710_vm13, %v711_v33, %v4275_v23  ;;  %v824_v59 = vsel %vm823_vm0, 1, %v5751_v29 }
 0x128   :  { %vm1238_vm2 = vcmp.gt.s32.totalorder %v4079_v49, 0  ;;  %vm599_vm3 = vcmp.eq.s32.totalorder %v4248_v52, 0  ;;  %vm602_vm4 = vcmp.eq.s32.totalorder %v4248_v52, 2  ;;  %v713_v0 = vclz %v712_v48 }
 0x129   :  { %vm827_vm5 = vc.u32 %v825_v3, %v821_v35  ;;  %v600_v62 = vxor.u32 2147483648, %v594_v17  ;;  %v701_v9 = vadd.s32 %v4186_v15, %v4183_v55  ;;  %v798_v57 = vsel %vm794_vm6, %v778_v37, %v4230_v36 }
 0x12a   :  { %v826_v6 = vadd.s32 %v824_v59, %v818_v46  ;;  %v2819_v20 = vadd.s32 4294967294, %v713_v0  ;;  %v732_v8 = vsel %vm609_vm10, %v731_v50, %v707_v4  ;;  %v800_v5 = vsel %vm796_vm9, %v4215_v19, %v799_v41  ;;  %v1974_v59 = vld [vmem:[#allocation5 + $0x198] sm:$0xff]  ;;  %v1944_v0 = vld [vmem:[#allocation5 + $0xa8] sm:$0xff] }
 0x12b   :  { %v828_v13 = vsel %vm827_vm5, 1, %v5751_v29  ;;  %v601_v1 = vsel %vm599_vm3, %v586_v12, %v600_v62  ;;  %v604_v58 = vsel %vm602_vm4, %v603_v61, %v594_v17  ;;  %v838_v42 = vmul.u32 %v836_v54, %v811_v40  ;;  %v5797_v61 = vld [vmem:[#allocation10_spill] sm:$0xff]  ;;  %2058 = vmatpush.msra.mxu3 %v1974_v59  ;;  %2037 = vmatpush.msrb.mxu1 %v1944_v0 }
 0x12c   :  { %v839_v55 = vmul.u32 %v835_v21, %v4254_v11  ;;  %v605_v15 = vsel %vm598_vm11, %v601_v1, %v604_v58  ;;  %vm2820_vm6 = vcmp.lt.s32.totalorder %v2819_v20, 0  ;;  %v820_v36 = vshrl.u32 %v4269_v27, 16  ;;  %v1972_v62 = vld [vmem:[#allocation5 + $0x188] sm:$0xff] }
 0x12d   :  { %v837_v37 = vmul.u32 %v835_v21, %v811_v40  ;;  %v606_v4 = vsel %vm595_vm12, nan, %v605_v15  ;;  %v716_v22 = vsel %vm2820_vm6, 0, %v2819_v20  ;;  %v830_v45 = vadd.s32 %v828_v13, %v826_v6  ;;  %v1942_v20 = vld [vmem:[#allocation5 + $0x98] sm:$0xff]  ;;  %2059 = vmatpush.msra.mxu3 %v1972_v62 }
 0x12e   :  { %v841_v19 = vshll.u32 %v838_v42, 16  ;;  %v1384_v41 = vsel %vm141_vm1, %v606_v4, %v5787_v63  ;;  %v717_v28 = vsub.s32 32, %v716_v22  ;;  %v721_v2 = vsub.s32 4294967266, %v716_v22  ;;  %2038 = vmatpush.msrb.mxu1 %v1942_v20 }
 0x12f   :  { %v840_v46 = vmul.u32 %v836_v54, %v4254_v11  ;;  %2853 = vmatmul.msk.f32.gmra.mxu1 %vm1778_vm15, %v1384_v41  ;;  %2861 = vmatmul.msk.f32.gmra.mxu3 %vm1778_vm15, %v1384_v41  ;;  %v718_v52 = vshll.u32 %v4275_v23, %v716_v22  ;;  %v734_v40 = vsel %vm4287_vm14, 0, %v732_v8  ;;  %v4325_v27 = vsel %vm795_vm8, %v798_v57, %v800_v5 }
 0x130   :  { %v843_v51 = vshll.u32 %v839_v55, 16  ;;  %v719_v35 = vshrl.u32 %v701_v9, %v717_v28  ;;  %v722_v63 = vadd.s32 127, %v721_v2  ;;  %vm845_vm7 = vc.u32 %v837_v37, %v841_v19 }
 0x131   :  { %v847_v21 = vadd.s32 %v841_v19, %v837_v37  ;;  %v822_v11 = vshrl.u32 %v4272_v56, 16  ;;  %v831_v12 = vadd.s32 %v830_v45, %v820_v36  ;;  %v842_v25 = vshrl.u32 %v838_v42, 16 }
 0x132   :  { %v846_v33 = vsel %vm845_vm7, 1, %v5751_v29  ;;  %v720_v50 = vor.u32 %v719_v35, %v718_v52  ;;  %v723_v23 = vshll.u32 %v722_v63, 23  ;;  %v4332_v30 = vsel %vm1238_vm2, %v4079_v49, 0 }
 0x133   :  { %v848_v3 = vadd.s32 %v846_v33, %v840_v46  ;;  %vm849_vm9 = vc.u32 %v847_v21, %v843_v51  ;;  %v4335_v54 = vand.u32 31, %v4246_v18  ;;  %v917_v56 = vand.u32 2147483647, %v5797_v61 }
 0x134   :  { %v850_v17 = vsel %vm849_vm9, 1, %v5751_v29  ;;  %v724_v48 = vor.u32 4788187, %v723_v23  ;;  %v844_v9 = vshrl.u32 %v839_v55, 16  ;;  %v751_v6 = vadd.s32 3, %v734_v40 }
 0x135   :  { %v852_v57 = vadd.s32 %v850_v17, %v848_v3  ;;  %v4339_v8 = vadd.s32 %v831_v12, %v822_v11  ;;  %v4341_v49 = vadd.s32 %v847_v21, %v843_v51  ;;  %v855_v5 = vmul.u32 %v4241_v39, %v4325_v27 }
 0x136   :  { %v725_v13 = vand.u32 2147483647, %v724_v48  ;;  %v727_v1 = vcvt.s32.f32 %v720_v50  ;;  %v937_v42 = vshll.u32 %v5754_v10, %v5786_v43  ;;  %v924_v55 = vand.u32 8388607, %v917_v56 }
 0x137   :  { %v853_v58 = vadd.s32 %v852_v57, %v842_v25  ;;  %v938_v15 = vshrl.u32 %v5755_v7, %v4075_v44  ;;  %v940_v36 = vshll.u32 %v5755_v7, %v5786_v43  ;;  %v941_v39 = vshrl.u32 %v5756_v34, %v4075_v44 }
 0x138   :  { %v728_v37 = vmul.f32 %v727_v1, %v725_v13  ;;  %v934_v22 = vshll.u32 %v5746_v32, %v5786_v43  ;;  %v943_v45 = vshll.u32 %v5756_v34, %v5786_v43  ;;  %vm857_vm8 = vc.u32 %v4339_v8, %v4341_v49 }
 0x139   :  { %v854_v4 = vadd.s32 %v853_v58, %v844_v9  ;;  %v4361_v19 = vor.u32 %v938_v15, %v937_v42  ;;  %v944_v41 = vshrl.u32 %v5757_v60, %v4075_v44  ;;  %v946_v28 = vshll.u32 %v5757_v60, %v5786_v43 }
 0x13a   :  { %v729_v2 = vxor.u32 2147483648, %v728_v37  ;;  %v942_v52 = vor.u32 %v941_v39, %v940_v36  ;;  %v947_v40 = vshrl.u32 %v5758_v38, %v4075_v44  ;;  %v925_v27 = vor.u32 8388608, %v924_v55 }
 0x13b   :  { %v858_v46 = vadd.s32 1, %v854_v4  ;;  %v935_v51 = vshrl.u32 %v5754_v10, %v4075_v44  ;;  %v945_v35 = vor.u32 %v944_v41, %v943_v45  ;;  %vm949_vm11 = vcmp.lt.s32.totalorder %v4066_v53, 1 }
 0x13c   :  { %v730_v63 = vsel %vm609_vm10, %v729_v2, %v728_v37  ;;  %v948_v11 = vor.u32 %v947_v40, %v946_v28  ;;  %vm952_vm12 = vcmp.lt.s32.totalorder %v4066_v53, 4  ;;  %v4376_v43 = vsub.s32 32, %v4335_v54 }
 0x13d   :  { %v859_v21 = vsel %vm857_vm8, %v858_v46, %v854_v4  ;;  %v4381_v12 = vsel %vm4287_vm14, %v5780_v14, %v730_v63  ;;  %vm951_vm13 = vcmp.lt.s32.totalorder %v4066_v53, 3  ;;  %v4386_v50 = vand.u32 3, %v751_v6 }
 0x13e   :  { %v860_v25 = vadd.s32 %v859_v21, %v855_v5  ;;  %v735_v33 = vmul.f32 %v4381_v12, %v4381_v12  ;;  %vm950_vm10 = vcmp.lt.s32.totalorder %v4066_v53, 2  ;;  %v961_v23 = vsel %vm949_vm11, %v4361_v19, %v942_v52 }
 0x13f   :  { %v936_v17 = vor.u32 %v935_v51, %v934_v22  ;;  %v962_v26 = vsel %vm952_vm12, %v948_v11, 1326507024  ;;  %v4394_v48 = vshll.u32 %v925_v27, 8  ;;  %vm764_vm14 = vcmp.lt.s32.totalorder %v5791_v31, 0 }
 0x140   :  { %v861_v3 = vadd.s32 536870912, %v860_v25  ;;  %v736_v59 = vmul.f32 -0.001358992, %v735_v33  ;;  %v743_v0 = vmul.f32 -0.00019511016, %v735_v33  ;;  %v963_v9 = vsel %vm951_vm13, %v945_v35, %v962_v26 }
 0x141   :  { %v958_v62 = vsel %vm952_vm12, %v945_v35, 920167782  ;;  %v964_v6 = vsel %vm950_vm10, %v961_v23, %v963_v9  ;;  %v966_v20 = vand.u32 65535, %v4394_v48  ;;  %v967_v5 = vshrl.u32 %v4394_v48, 16 }
 0x142   :  { %v862_v57 = vshrl.u32 %v861_v3, 30  ;;  %v737_v13 = vadd.f32 0.041655596, %v736_v59  ;;  %v744_v1 = vadd.f32 0.008332121, %v743_v0  ;;  %v968_v58 = vand.u32 65535, %v964_v6 }
 0x143   :  { %v969_v42 = vshrl.u32 %v964_v6, 16  ;;  %v933_v15 = vshrl.u32 %v5746_v32, %v4075_v44  ;;  %v957_v36 = vsel %vm949_vm11, %v936_v17, %v4361_v19  ;;  %v959_v39 = vsel %vm951_vm13, %v942_v52, %v958_v62 }
 0x144   :  { %v863_v55 = vshll.u32 %v862_v57, 30  ;;  %v738_v37 = vmul.f32 %v737_v13, %v735_v33  ;;  %v745_v4 = vmul.f32 %v744_v1, %v735_v33  ;;  %v856_v22 = vadd.s32 %v4341_v49, %v4339_v8 }
 0x145   :  { %v971_v45 = vmul.u32 %v969_v42, %v966_v20  ;;  %v954_v28 = vsel %vm952_vm12, %v942_v52, 2102212464  ;;  %v970_v2 = vmul.u32 %v968_v58, %v966_v20  ;;  %v4418_v44 = vmul.u32 %v968_v58, %v967_v5 }
 0x146   :  { %v4414_v41 = vsub.s32 %v860_v25, %v863_v55  ;;  %v739_v46 = vadd.f32 -0.4999988, %v738_v37  ;;  %v746_v40 = vadd.f32 -0.16666654, %v745_v4  ;;  %vm757_vm0 = vcmp.eq.s32.totalorder %v4386_v50, 2 }
 0x147   :  { %v960_v27 = vsel %vm950_vm10, %v957_v36, %v959_v39  ;;  %v974_v51 = vshll.u32 %v971_v45, 16  ;;  %vm754_vm2 = vcmp.eq.s32.totalorder %v4386_v50, 0  ;;  %v886_v49 = vsub.s32 4, %v862_v57 }
 0x148   :  { %vm865_vm3 = vcmp.lt.s32.totalorder %v4414_v41, 0  ;;  %v866_v8 = vsub.s32 0, %v4414_v41  ;;  %v973_v35 = vmul.u32 %v969_v42, %v967_v5  ;;  %v740_v52 = vmul.f32 %v739_v46, %v735_v33 }
 0x149   :  { %v747_v63 = vmul.f32 %v746_v40, %v735_v33  ;;  %vm753_vm4 = vcmp.lt.s32.totalorder %v4386_v50, 2  ;;  %v976_v21 = vshll.u32 %v4418_v44, 16  ;;  %v990_v11 = vand.u32 65535, %v960_v27 }
 0x14a   :  { %vm750_vm5 = vweird.f32 %v5780_v14  ;;  %vm4431_vm6 = vcmp.le.f32.partialorder %v762_v16, 0.7853982  ;;  %v867_v23 = vsel %vm865_vm3, %v866_v8, %v4414_v41  ;;  %vm978_vm7 = vc.u32 %v970_v2, %v974_v51 }
 0x14b   :  { %v980_v3 = vadd.s32 %v974_v51, %v970_v2  ;;  %v991_v26 = vshrl.u32 %v960_v27, 16  ;;  %v741_v59 = vadd.f32 1.0, %v740_v52  ;;  %v748_v33 = vadd.f32 1.0, %v747_v63 }
 0x14c   :  { %v868_v0 = vclz %v867_v23  ;;  %v979_v62 = vsel %vm978_vm7, 1, %v5751_v29  ;;  %v887_v9 = vsel %vm764_vm14, %v886_v49, %v862_v57  ;;  %v953_v6 = vsel %vm949_vm11, %v933_v15, %v936_v17 }
 0x14d   :  { %v955_v16 = vsel %vm951_vm13, %v4361_v19, %v954_v28  ;;  %v981_v13 = vadd.s32 %v979_v62, %v973_v35  ;;  %v749_v1 = vmul.f32 %v748_v33, %v4381_v12  ;;  %v758_v58 = vxor.u32 2147483648, %v741_v59  ;;  %v4469_v33 = vld [vmem:[#allocation5 + $0x178] sm:$0xff]  ;;  %v4473_v62 = vld [vmem:[#allocation5 + $0x168] sm:$0xff] }
 0x14e   :  { %v2822_v42 = vadd.s32 4294967294, %v868_v0  ;;  %vm982_vm9 = vc.u32 %v980_v3, %v976_v21  ;;  %v975_v55 = vshrl.u32 %v971_v45, 16  ;;  %v993_v39 = vmul.u32 %v991_v26, %v966_v20  ;;  %v4471_v0 = vld [vmem:[#allocation5 + $0x88] sm:$0xff]  ;;  %2060 = vmatpush.msra.mxu3 %v4469_v33 }
 0x14f   :  { %v983_v36 = vsel %vm982_vm9, 1, %v5751_v29  ;;  %v994_v37 = vmul.u32 %v990_v11, %v967_v5  ;;  %v755_v4 = vxor.u32 2147483648, %v749_v1  ;;  %v992_v2 = vmul.u32 %v990_v11, %v966_v20  ;;  %2039 = vmatpush.msrb.mxu1 %v4471_v0 }
 0x150   :  { %vm2823_vm8 = vcmp.lt.s32.totalorder %v2822_v42, 0  ;;  %v985_v57 = vadd.s32 %v983_v36, %v981_v13  ;;  %v759_v17 = vsel %vm757_vm0, %v758_v58, %v749_v1  ;;  %v995_v19 = vmul.u32 %v991_v26, %v967_v5  ;;  %2061 = vmatpush.msra.mxu3 %v4473_v62 }
 0x151   :  { %v871_v15 = vsel %vm2823_vm8, 0, %v2822_v42  ;;  %v996_v28 = vshll.u32 %v993_v39, 16  ;;  %v756_v12 = vsel %vm754_vm2, %v741_v59, %v755_v4  ;;  %v977_v51 = vshrl.u32 %v4418_v44, 16 }
 0x152   :  { %v872_v46 = vsub.s32 32, %v871_v15  ;;  %v873_v45 = vshll.u32 %v4414_v41, %v871_v15  ;;  %v876_v40 = vsub.s32 4294967266, %v871_v15  ;;  %v760_v27 = vsel %vm753_vm4, %v756_v12, %v759_v17 }
 0x153   :  { %v986_v8 = vadd.s32 %v985_v57, %v975_v55  ;;  %v998_v20 = vshll.u32 %v994_v37, 16  ;;  %v761_v49 = vsel %vm750_vm5, nan, %v760_v27  ;;  %vm1000_vm11 = vc.u32 %v992_v2, %v996_v28 }
 0x154   :  { %v874_v35 = vshrl.u32 %v856_v22, %v872_v46  ;;  %v877_v5 = vadd.s32 127, %v876_v40  ;;  %v1385_v52 = vsel %vm141_vm1, %v761_v49, %v5780_v14  ;;  %v956_v41 = vsel %vm950_vm10, %v953_v6, %v955_v16  ;;  %v5800_v14 = vld [vmem:[#allocation17_spill] sm:$0xff] }
 0x155   :  { %v1001_v50 = vsel %vm1000_vm11, 1, %v5751_v29  ;;  %v1002_v63 = vadd.s32 %v996_v28, %v992_v2  ;;  %2854 = vmatmul.msk.f32.gmra.mxu1 %vm1778_vm15, %v1385_v52  ;;  %2862 = vmatmul.msk.f32.gmra.mxu3 %vm1778_vm15, %v1385_v52  ;;  %v889_v22 = vsel %vm4431_vm6, 0, %v887_v9  ;;  %v4466_v23 = vadd.s32 %v986_v8, %v977_v51  ;;  %v4480_v9 = vld [vmem:[#allocation5 + $0x78] sm:$0xff] }
 0x156   :  { %v875_v44 = vor.u32 %v874_v35, %v873_v45  ;;  %v878_v21 = vshll.u32 %v877_v5, 23  ;;  %v1003_v11 = vadd.s32 %v1001_v50, %v995_v19  ;;  %v997_v3 = vshrl.u32 %v993_v39, 16  ;;  %2040 = vmatpush.msrb.mxu1 %v4480_v9 }
 0x157   :  { %vm1004_vm12 = vc.u32 %v1002_v63, %v998_v20  ;;  %v1072_v53 = vand.u32 2147483647, %v5800_v14  ;;  %v4476_v16 = vadd.s32 %v1002_v63, %v998_v20  ;;  %v999_v13 = vshrl.u32 %v994_v37, 16 }
 0x158   :  { %v879_v26 = vor.u32 4788187, %v878_v21  ;;  %v882_v59 = vcvt.s32.f32 %v875_v44  ;;  %v1005_v6 = vsel %vm1004_vm12, 1, %v5751_v29  ;;  %v4483_v58 = vand.u32 31, %v4332_v30 }
 0x159   :  { %v1007_v1 = vadd.s32 %v1005_v6, %v1003_v11  ;;  %v4486_v55 = vshrl.u32 %v4246_v18, 5  ;;  %v906_v36 = vadd.s32 3, %v889_v22  ;;  %v1010_v4 = vmul.u32 %v4394_v48, %v956_v41 }
 0x15a   :  { %v880_v42 = vand.u32 2147483647, %v879_v26  ;;  %vm1012_vm13 = vc.u32 %v4466_v23, %v4476_v16  ;;  %v1079_v37 = vand.u32 8388607, %v1072_v53  ;;  %v1093_v2 = vshrl.u32 %v5755_v7, %v4376_v43 }
 0x15b   :  { %v1008_v39 = vadd.s32 %v1007_v1, %v997_v3  ;;  %v1089_v17 = vshll.u32 %v5746_v32, %v4335_v54  ;;  %v1092_v15 = vshll.u32 %v5754_v10, %v4335_v54  ;;  %v1096_v48 = vshrl.u32 %v5756_v34, %v4376_v43 }
 0x15c   :  { %v883_v57 = vmul.f32 %v882_v59, %v880_v42  ;;  %v1095_v28 = vshll.u32 %v5755_v7, %v4335_v54  ;;  %v1098_v12 = vshll.u32 %v5756_v34, %v4335_v54  ;;  %v1099_v46 = vshrl.u32 %v5757_v60, %v4376_v43 }
 0x15d   :  { %v1009_v18 = vadd.s32 %v1008_v39, %v999_v13  ;;  %v1090_v40 = vshrl.u32 %v5754_v10, %v4376_v43  ;;  %v1101_v27 = vshll.u32 %v5757_v60, %v4335_v54  ;;  %v1102_v51 = vshrl.u32 %v5758_v38, %v4376_v43 }
 0x15e   :  { %v884_v19 = vxor.u32 2147483648, %v883_v57  ;;  %v4517_v20 = vor.u32 %v1093_v2, %v1092_v15  ;;  %v1097_v49 = vor.u32 %v1096_v48, %v1095_v28  ;;  %v1100_v35 = vor.u32 %v1099_v46, %v1098_v12 }
 0x15f   :  { %v1013_v45 = vadd.s32 1, %v1009_v18  ;;  %v1080_v41 = vor.u32 8388608, %v1079_v37  ;;  %v1103_v54 = vor.u32 %v1102_v51, %v1101_v27  ;;  %vm1104_vm10 = vcmp.lt.s32.totalorder %v4486_v55, 1 }
 0x160   :  { %v885_v8 = vsel %vm764_vm14, %v884_v19, %v883_v57  ;;  %vm1107_vm14 = vcmp.lt.s32.totalorder %v4486_v55, 4  ;;  %v1091_v44 = vor.u32 %v1090_v40, %v1089_v17  ;;  %vm1106_vm0 = vcmp.lt.s32.totalorder %v4486_v55, 3 }
 0x161   :  { %v888_v5 = vsel %vm4431_vm6, %v5791_v31, %v885_v8  ;;  %v1014_v52 = vsel %vm1012_vm13, %v1013_v45, %v1009_v18  ;;  %v1113_v21 = vsel %vm1107_vm14, %v1100_v35, 920167782  ;;  %v1117_v25 = vsel %vm1107_vm14, %v1103_v54, 1326507024 }
 0x162   :  { %v890_v50 = vmul.f32 %v888_v5, %v888_v5  ;;  %v1015_v63 = vadd.s32 %v1014_v52, %v1010_v4  ;;  %v1116_v26 = vsel %vm1104_vm10, %v4517_v20, %v1097_v49  ;;  %v1118_v59 = vsel %vm1106_vm0, %v1100_v35, %v1117_v25 }
 0x163   :  { %v4537_v6 = vshll.u32 %v1080_v41, 8  ;;  %vm1105_vm2 = vcmp.lt.s32.totalorder %v4486_v55, 2  ;;  %v4542_v39 = vand.u32 3, %v906_v36  ;;  %v1112_v4 = vsel %vm1104_vm10, %v1091_v44, %v4517_v20  ;;  %v4636_v55 = vld [vmem:[#allocation5 + $0x58] sm:$0xff] }
 0x164   :  { %v891_v22 = vmul.f32 -0.001358992, %v890_v50  ;;  %v898_v11 = vmul.f32 -0.00019511016, %v890_v50  ;;  %v1016_v3 = vadd.s32 536870912, %v1015_v63  ;;  %v1114_v57 = vsel %vm1106_vm0, %v1097_v49, %v1113_v21 }
 0x165   :  { %v1119_v37 = vsel %vm1105_vm2, %v1116_v26, %v1118_v59  ;;  %v4552_v2 = vsub.s32 32, %v4483_v58  ;;  %v1121_v36 = vand.u32 65535, %v4537_v6  ;;  %v4557_v48 = vshrl.u32 %v4537_v6, 16 }
 0x166   :  { %v892_v13 = vadd.f32 0.041655596, %v891_v22  ;;  %v899_v1 = vadd.f32 0.008332121, %v898_v11  ;;  %v4539_v42 = vshrl.u32 %v1016_v3, 30  ;;  %v1123_v19 = vand.u32 65535, %v1119_v37 }
 0x167   :  { %v1124_v28 = vshrl.u32 %v1119_v37, 16  ;;  %v1115_v40 = vsel %vm1105_vm2, %v1112_v4, %v1114_v57  ;;  %vm909_vm3 = vcmp.eq.s32.totalorder %v4542_v39, 0  ;;  %vm912_vm4 = vcmp.eq.s32.totalorder %v4542_v39, 2 }
 0x168   :  { %v893_v18 = vmul.f32 %v892_v13, %v890_v50  ;;  %v900_v17 = vmul.f32 %v899_v1, %v890_v50  ;;  %v1018_v15 = vshll.u32 %v4539_v42, 30  ;;  %v1088_v27 = vshrl.u32 %v5746_v32, %v4376_v43 }
 0x169   :  { %v1126_v51 = vmul.u32 %v1124_v28, %v1121_v36  ;;  %v4568_v8 = vmul.u32 %v1123_v19, %v4557_v48  ;;  %vm908_vm5 = vcmp.lt.s32.totalorder %v4542_v39, 2  ;;  %vm905_vm7 = vweird.f32 %v5791_v31 }
 0x16a   :  { %v894_v12 = vadd.f32 -0.4999988, %v893_v18  ;;  %v901_v46 = vadd.f32 -0.16666654, %v900_v17  ;;  %v4559_v45 = vsub.s32 %v1015_v63, %v1018_v15  ;;  %v1109_v54 = vsel %vm1107_vm14, %v1097_v49, 2102212464  ;;  %v4588_v15 = vpop.f32.mrf.mxu2 }
 0x16b   :  { %v1125_v63 = vmul.u32 %v1123_v19, %v1121_v36  ;;  %v1129_v21 = vshll.u32 %v1126_v51, 16  ;;  %v1145_v43 = vand.u32 65535, %v1115_v40  ;;  %v1146_v3 = vshrl.u32 %v1115_v40, 16 }
 0x16c   :  { %v895_v35 = vmul.f32 %v894_v12, %v890_v50  ;;  %v902_v52 = vmul.f32 %v901_v46, %v890_v50  ;;  %vm1020_vm6 = vcmp.lt.s32.totalorder %v4559_v45, 0  ;;  %v1021_v41 = vsub.s32 0, %v4559_v45 }
 0x16d   :  { %vm919_vm9 = vcmp.lt.s32.totalorder %v5797_v61, 0  ;;  %v1128_v26 = vmul.u32 %v1124_v28, %v4557_v48  ;;  %v1131_v59 = vshll.u32 %v4568_v8, 16  ;;  %vm1133_vm8 = vc.u32 %v1125_v63, %v1129_v21 }
 0x16e   :  { %v896_v25 = vadd.f32 1.0, %v895_v35  ;;  %v903_v22 = vadd.f32 1.0, %v902_v52  ;;  %v1022_v11 = vsel %vm1020_vm6, %v1021_v41, %v4559_v45  ;;  %v1134_v49 = vsel %vm1133_vm8, 1, %v5751_v29 }
 0x16f   :  { %v1023_v50 = vclz %v1022_v11  ;;  %v1135_v4 = vadd.s32 %v1129_v21, %v1125_v63  ;;  %v1011_v57 = vadd.s32 %v4476_v16, %v4466_v23  ;;  %v1108_v18 = vsel %vm1104_vm10, %v1088_v27, %v1091_v44 }
 0x170   :  { %v904_v13 = vmul.f32 %v903_v22, %v888_v5  ;;  %v913_v1 = vxor.u32 2147483648, %v896_v25  ;;  %v1110_v17 = vsel %vm1106_vm0, %v4517_v20, %v1109_v54  ;;  %v1130_v28 = vshrl.u32 %v1126_v51, 16 }
 0x171   :  { %v2825_v37 = vadd.s32 4294967294, %v1023_v50  ;;  %v1136_v5 = vadd.s32 %v1134_v49, %v1128_v26  ;;  %vm1137_vm11 = vc.u32 %v1135_v4, %v1131_v59  ;;  %vm4594_vm12 = vcmp.le.f32.partialorder %v917_v56, 0.7853982  ;;  %v4621_v4 = vpop.f32.mrf.mxu0 }
 0x172   :  { %v910_v19 = vxor.u32 2147483648, %v904_v13  ;;  %v914_v12 = vsel %vm912_vm4, %v913_v1, %v904_v13  ;;  %v1138_v16 = vsel %vm1137_vm11, 1, %v5751_v29  ;;  %v1148_v44 = vmul.u32 %v1146_v3, %v1121_v36 }
 0x173   :  { %vm2826_vm13 = vcmp.lt.s32.totalorder %v2825_v37, 0  ;;  %v1140_v40 = vadd.s32 %v1138_v16, %v1136_v5  ;;  %v1149_v27 = vmul.u32 %v1145_v43, %v4557_v48  ;;  %v1041_v54 = vsub.s32 4, %v4539_v42  ;;  %v5804_v5 = vld [vmem:[#allocation15_spill] sm:$0xff] }
 0x174   :  { %v911_v20 = vsel %vm909_vm3, %v896_v25, %v910_v19  ;;  %v1026_v46 = vsel %vm2826_vm13, 0, %v2825_v37  ;;  %v1147_v63 = vmul.u32 %v1145_v43, %v1121_v36  ;;  %v1151_v21 = vshll.u32 %v1148_v44, 16  ;;  %v4625_v37 = vld [vmem:[#allocation5 + $0x68] sm:$0xff] }
 0x175   :  { %v915_v51 = vsel %vm908_vm5, %v911_v20, %v914_v12  ;;  %v1027_v35 = vsub.s32 32, %v1026_v46  ;;  %v1028_v56 = vshll.u32 %v4559_v45, %v1026_v46  ;;  %v1031_v52 = vsub.s32 4294967266, %v1026_v46  ;;  %2041 = vmatpush.msrb.mxu1 %v4625_v37 }
 0x176   :  { %v916_v41 = vsel %vm905_vm7, nan, %v915_v51  ;;  %v1141_v50 = vadd.s32 %v1140_v40, %v1130_v28  ;;  %v1150_v39 = vmul.u32 %v1146_v3, %v4557_v48  ;;  %v1153_v45 = vshll.u32 %v1149_v27, 16 }
 0x177   :  { %v1386_v25 = vsel %vm141_vm1, %v916_v41, %v5791_v31  ;;  %v1029_v22 = vshrl.u32 %v1011_v57, %v1027_v35  ;;  %v1032_v11 = vadd.s32 127, %v1031_v52  ;;  %vm1155_vm10 = vc.u32 %v1147_v63, %v1151_v21  ;;  %v4623_v57 = vld [vmem:[#allocation5 + $0x158] sm:$0xff]  ;;  %2042 = vmatpush.msrb.mxu1 %v4636_v55 }
 0x178   :  { %2855 = vmatmul.msk.f32.gmra.mxu1 %vm1778_vm15, %v1386_v25  ;;  %2863 = vmatmul.msk.f32.gmra.mxu3 %vm1778_vm15, %v1386_v25  ;;  %v1157_v26 = vadd.s32 %v1151_v21, %v1147_v63  ;;  %v1132_v36 = vshrl.u32 %v4568_v8, 16  ;;  %v1156_v43 = vsel %vm1155_vm10, 1, %v5751_v29  ;;  %v1042_v31 = vsel %vm919_vm9, %v1041_v54, %v4539_v42  ;;  %v4627_v8 = vld [vmem:[#allocation5 + $0x148] sm:$0xff]  ;;  %v4632_v42 = vpop.f32.mrf.mxu2 }
 0x179   :  { %v1030_v59 = vor.u32 %v1029_v22, %v1028_v56  ;;  %v1033_v13 = vshll.u32 %v1032_v11, 23  ;;  %v1111_v1 = vsel %vm1105_vm2, %v1108_v18, %v1110_v17  ;;  %v1158_v49 = vadd.s32 %v1156_v43, %v1150_v39  ;;  %5803 = vst [vmem:[#allocation14_spill] sm:$0xff] %v4632_v42  ;;  %2062 = vmatpush.msra.mxu3 %v4623_v57 }
 0x17a   :  { %vm1159_vm14 = vc.u32 %v1157_v26, %v1153_v45  ;;  %v4629_v19 = vadd.s32 %v1141_v50, %v1132_v36  ;;  %v1152_v18 = vshrl.u32 %v1148_v44, 16  ;;  %v1227_v12 = vand.u32 2147483647, %v5804_v5 }
 0x17b   :  { %v1034_v48 = vor.u32 4788187, %v1033_v13  ;;  %v1037_v3 = vcvt.s32.f32 %v1030_v59  ;;  %v1160_v28 = vsel %vm1159_vm14, 1, %v5751_v29  ;;  %v4640_v16 = vshrl.u32 %v4332_v30, 5  ;;  %2063 = vmatpush.msra.mxu3 %v4627_v8 }
 0x17c   :  { %v1162_v17 = vadd.s32 %v1160_v28, %v1158_v49  ;;  %v4642_v46 = vadd.s32 %v1157_v26, %v1153_v45  ;;  %v1044_v40 = vsel %vm4594_vm12, 0, %v1042_v31  ;;  %v1154_v51 = vshrl.u32 %v1149_v27, 16 }
 0x17d   :  { %v1035_v20 = vand.u32 2147483647, %v1034_v48  ;;  %v1165_v44 = vmul.u32 %v4537_v6, %v1111_v1  ;;  %v1245_v30 = vshrl.u32 %v5754_v10, %v4552_v2  ;;  %v1248_v52 = vshrl.u32 %v5755_v7, %v4552_v2 }
 0x17e   :  { %v1163_v35 = vadd.s32 %v1162_v17, %v1152_v18  ;;  %vm1167_vm0 = vc.u32 %v4629_v19, %v4642_v46  ;;  %v1234_v54 = vand.u32 8388607, %v1227_v12  ;;  %v1244_v27 = vshll.u32 %v5746_v32, %v4483_v58 }
 0x17f   :  { %v1038_v56 = vmul.f32 %v1037_v3, %v1035_v20  ;;  %v1251_v6 = vshrl.u32 %v5756_v34, %v4552_v2  ;;  %v1247_v21 = vshll.u32 %v5754_v10, %v4483_v58  ;;  %v1253_v25 = vshll.u32 %v5756_v34, %v4483_v58 }
 0x180   :  { %v1164_v41 = vadd.s32 %v1163_v35, %v1154_v51  ;;  %v1254_v22 = vshrl.u32 %v5757_v60, %v4552_v2  ;;  %v1250_v50 = vshll.u32 %v5755_v7, %v4483_v58  ;;  %v1256_v39 = vshll.u32 %v5757_v60, %v4483_v58  ;;  %v4690_v1 = vpop.f32.mrf.mxu2 }
 0x181   :  { %v1039_v63 = vxor.u32 2147483648, %v1038_v56  ;;  %v1257_v45 = vshrl.u32 %v5758_v38, %v4552_v2  ;;  %v4675_v10 = vor.u32 %v1245_v30, %v1244_v27  ;;  %v4677_v59 = vor.u32 %v1248_v52, %v1247_v21  ;;  %v4687_v38 = vpop.f32.mrf.mxu0 }
 0x182   :  { %v1168_v11 = vadd.s32 1, %v1164_v41  ;;  %v1255_v34 = vor.u32 %v1254_v22, %v1253_v25  ;;  %v4685_v60 = vor.u32 %v1251_v6, %v1250_v50  ;;  %5805 = vst [vmem:[#allocation16_spill] sm:$0xff] %v4687_v38  ;;  %v1235_v31 = vor.u32 8388608, %v1234_v54  ;;  %v4909_v38 = vld [vmem:[#allocation5 + $0xc8] sm:$0xff] }
 0x183   :  { %v1040_v26 = vsel %vm919_vm9, %v1039_v63, %v1038_v56  ;;  %v1258_v58 = vor.u32 %v1257_v45, %v1256_v39  ;;  %vm1262_vm2 = vcmp.lt.s32.totalorder %v4640_v16, 4  ;;  %v1061_v49 = vadd.s32 3, %v1044_v40 }
 0x184   :  { %v1043_v13 = vsel %vm4594_vm12, %v5797_v61, %v1040_v26  ;;  %v1169_v7 = vsel %vm1167_vm0, %v1168_v11, %v1164_v41  ;;  %vm1259_vm3 = vcmp.lt.s32.totalorder %v4640_v16, 1  ;;  %v1268_v23 = vsel %vm1262_vm2, %v1255_v34, 920167782 }
 0x185   :  { %v1045_v36 = vmul.f32 %v1043_v13, %v1043_v13  ;;  %v1170_v43 = vadd.s32 %v1169_v7, %v1165_v44  ;;  %vm1261_vm4 = vcmp.lt.s32.totalorder %v4640_v16, 3  ;;  %v1267_v18 = vsel %vm1259_vm3, %v4675_v10, %v4677_v59 }
 0x186   :  { %v1269_v17 = vsel %vm1261_vm4, %v4685_v60, %v1268_v23  ;;  %v1271_v20 = vsel %vm1259_vm3, %v4677_v59, %v4685_v60  ;;  %v1272_v40 = vsel %vm1262_vm2, %v1258_v58, 1326507024  ;;  %v4711_v56 = vshll.u32 %v1235_v31, 8 }
 0x187   :  { %v1046_v48 = vmul.f32 -0.001358992, %v1045_v36  ;;  %v1053_v3 = vmul.f32 -0.00019511016, %v1045_v36  ;;  %v1171_v28 = vadd.s32 536870912, %v1170_v43  ;;  %vm1260_vm5 = vcmp.lt.s32.totalorder %v4640_v16, 2 }
 0x188   :  { %v1273_v30 = vsel %vm1261_vm4, %v1255_v34, %v1272_v40  ;;  %v4719_v27 = vsel %vm1260_vm5, %v1267_v18, %v1269_v17  ;;  %v1062_v6 = vand.u32 3, %v1061_v49  ;;  %v1276_v11 = vand.u32 65535, %v4711_v56  ;;  %v4732_v49 = vpop.f32.mrf.mxu2 }
 0x189   :  { %v1047_v51 = vadd.f32 0.041655596, %v1046_v48  ;;  %v1054_v35 = vadd.f32 0.008332121, %v1053_v3  ;;  %v4709_v44 = vshrl.u32 %v1171_v28, 30  ;;  %v1274_v63 = vsel %vm1260_vm5, %v1271_v20, %v1273_v30  ;;  %v4728_v34 = vpop.f32.mrf.mxu0 }
 0x18a   :  { %v1277_v50 = vshrl.u32 %v4711_v56, 16  ;;  %v1278_v39 = vand.u32 65535, %v1274_v63  ;;  %v1279_v45 = vshrl.u32 %v1274_v63, 16  ;;  %v1301_v26 = vshrl.u32 %v4719_v27, 16 }
 0x18b   :  { %v1048_v52 = vmul.f32 %v1047_v51, %v1045_v36  ;;  %v1055_v41 = vmul.f32 %v1054_v35, %v1045_v36  ;;  %v1173_v54 = vshll.u32 %v4709_v44, 30  ;;  %vm1060_vm7 = vweird.f32 %v5797_v61 }
 0x18c   :  { %vm1063_vm9 = vcmp.lt.s32.totalorder %v1062_v6, 2  ;;  %vm1064_vm8 = vcmp.eq.s32.totalorder %v1062_v6, 0  ;;  %v1300_v23 = vand.u32 65535, %v4719_v27  ;;  %v4737_v18 = vmul.u32 %v1278_v39, %v1277_v50 }
 0x18d   :  { %v1049_v21 = vadd.f32 -0.4999988, %v1048_v52  ;;  %v1056_v25 = vadd.f32 -0.16666654, %v1055_v41  ;;  %v4723_v22 = vsub.s32 %v1170_v43, %v1173_v54  ;;  %v1281_v43 = vmul.u32 %v1279_v45, %v1276_v11 }
 0x18e   :  { %vm1067_vm11 = vcmp.eq.s32.totalorder %v1062_v6, 2  ;;  %v4739_v20 = vmul.u32 %v1301_v26, %v1276_v11  ;;  %v1243_v35 = vshrl.u32 %v5746_v32, %v4552_v2  ;;  %v1280_v30 = vmul.u32 %v1278_v39, %v1276_v11 }
 0x18f   :  { %v1050_v7 = vmul.f32 %v1049_v21, %v1045_v36  ;;  %v1057_v58 = vmul.f32 %v1056_v25, %v1045_v36  ;;  %vm1175_vm6 = vcmp.lt.s32.totalorder %v4723_v22, 0  ;;  %v1176_v31 = vsub.s32 0, %v4723_v22 }
 0x190   :  { %v1284_v17 = vshll.u32 %v1281_v43, 16  ;;  %v1166_v52 = vadd.s32 %v4642_v46, %v4629_v19  ;;  %v1283_v54 = vmul.u32 %v1279_v45, %v1277_v50  ;;  %v4745_v27 = vmul.u32 %v1300_v23, %v1277_v50 }
 0x191   :  { %v1051_v48 = vadd.f32 1.0, %v1050_v7  ;;  %v1058_v3 = vadd.f32 1.0, %v1057_v58  ;;  %v1177_v28 = vsel %vm1175_vm6, %v1176_v31, %v4723_v22  ;;  %v1286_v21 = vshll.u32 %v4737_v18, 16 }
 0x192   :  { %v1178_v36 = vclz %v1177_v28  ;;  %vm1288_vm12 = vc.u32 %v1280_v30, %v1284_v17  ;;  %v1290_v25 = vadd.s32 %v1284_v17, %v1280_v30  ;;  %v1306_v32 = vshll.u32 %v4739_v20, 16 }
 0x193   :  { %v1059_v40 = vmul.f32 %v1058_v3, %v1043_v13  ;;  %v1068_v51 = vxor.u32 2147483648, %v1051_v48  ;;  %v1289_v13 = vsel %vm1288_vm12, 1, %v5751_v29  ;;  %v1302_v31 = vmul.u32 %v1300_v23, %v1276_v11  ;;  %v4753_v3 = vpop.f32.mrf.mxu0 }
 0x194   :  { %v2828_v41 = vadd.s32 4294967294, %v1178_v36  ;;  %v1291_v19 = vadd.s32 %v1289_v13, %v1283_v54  ;;  %vm1292_vm10 = vc.u32 %v1290_v25, %v1286_v21  ;;  %v1285_v17 = vshrl.u32 %v1281_v43, 16  ;;  %v4772_v13 = vld [vmem:[#allocation5 + $0x138] sm:$0xff] }
 0x195   :  { %v1065_v63 = vxor.u32 2147483648, %v1059_v40  ;;  %v1069_v7 = vsel %vm1067_vm11, %v1068_v51, %v1059_v40  ;;  %v1293_v40 = vsel %vm1292_vm10, 1, %v5751_v29  ;;  %v4759_v51 = vpop.f32.mrf.mxu2  ;;  %v1305_v11 = vmul.u32 %v1301_v26, %v1277_v50  ;;  %5807 = vst [vmem:[#allocation18_spill] sm:$0xff] %v4772_v13  ;;  %v4774_v50 = vld [vmem:[#allocation5 + $0x48] sm:$0xff]  ;;  %2064 = vmatpush.msra.mxu3 %v4772_v13 }
 0x196   :  { %vm2829_vm13 = vcmp.lt.s32.totalorder %v2828_v41, 0  ;;  %5806 = vst [vmem:[#allocation13_spill] sm:$0xff] %v4759_v51  ;;  %v1308_v23 = vshll.u32 %v4745_v27, 16  ;;  %vm1310_vm14 = vc.u32 %v1302_v31, %v1306_v32  ;;  %v4776_v26 = vld [vmem:[#allocation5 + $0x128] sm:$0xff]  ;;  %2043 = vmatpush.msrb.mxu1 %v4774_v50  ;;  %v1196_v16 = vsub.s32 4, %v4709_v44 }
 0x197   :  { %v1066_v2 = vsel %vm1064_vm8, %v1051_v48, %v1065_v63  ;;  %v1181_v39 = vsel %vm2829_vm13, 0, %v2828_v41  ;;  %v1295_v41 = vadd.s32 %v1293_v40, %v1291_v19  ;;  %v1311_v21 = vsel %vm1310_vm14, 1, %v5751_v29  ;;  %5808 = vst [vmem:[#allocation20_spill] sm:$0xff] %v4776_v26  ;;  %2065 = vmatpush.msra.mxu3 %v4776_v26  ;;  %v4923_v51 = vld [vmem:[#allocation5 + $0xa8] sm:$0xff] }
 0x198   :  { %v1070_v46 = vsel %vm1063_vm9, %v1066_v2, %v1069_v7  ;;  %v1182_v45 = vsub.s32 32, %v1181_v39  ;;  %v1186_v58 = vsub.s32 4294967266, %v1181_v39  ;;  %v1183_v36 = vshll.u32 %v4723_v22, %v1181_v39  ;;  %v4781_v2 = vld [vmem:[#allocation5 + $0x38] sm:$0xff] }
 0x199   :  { %v1071_v28 = vsel %vm1060_vm7, nan, %v1070_v46  ;;  %v1312_v22 = vadd.s32 %v1306_v32, %v1302_v31  ;;  %v1296_v63 = vadd.s32 %v1295_v41, %v1285_v17  ;;  %v1313_v25 = vadd.s32 %v1311_v21, %v1305_v11  ;;  %2044 = vmatpush.msrb.mxu1 %v4781_v2 }
 0x19a   :  { %v1387_v6 = vsel %vm141_vm1, %v1071_v28, %v5797_v61  ;;  %v1184_v48 = vshrl.u32 %v1166_v52, %v1182_v45  ;;  %v1187_v30 = vadd.s32 127, %v1186_v58  ;;  %v1264_v61 = vsel %vm1262_vm2, %v4685_v60, 2102212464 }
 0x19b   :  { %2856 = vmatmul.msk.f32.gmra.mxu1 %vm1778_vm15, %v1387_v6  ;;  %2864 = vmatmul.msk.f32.gmra.mxu3 %vm1778_vm15, %v1387_v6  ;;  %v1287_v52 = vshrl.u32 %v4737_v18, 16  ;;  %vm1314_vm0 = vc.u32 %v1312_v22, %v1308_v23  ;;  %v1263_v60 = vsel %vm1259_vm3, %v1243_v35, %v4675_v10  ;;  %v1307_v18 = vshrl.u32 %v4739_v20, 16  ;;  %v4795_v35 = vpop.f32.mrf.mxu0 }
 0x19c   :  { %v1185_v43 = vor.u32 %v1184_v48, %v1183_v36  ;;  %v1188_v54 = vshll.u32 %v1187_v30, 23  ;;  %v1315_v32 = vsel %vm1314_vm0, 1, %v5751_v29  ;;  %v1265_v45 = vsel %vm1261_vm4, %v4677_v59, %v1264_v61 }
 0x19d   :  { %v1317_v39 = vadd.s32 %v1315_v32, %v1313_v25  ;;  %v4790_v29 = vadd.s32 %v1296_v63, %v1287_v52  ;;  %v1309_v58 = vshrl.u32 %v4745_v27, 16  ;;  %v1316_v10 = vadd.s32 %v1312_v22, %v1308_v23  ;;  %v4799_v17 = vpop.f32.mrf.mxu2 }
 0x19e   :  { %v1189_v7 = vor.u32 4788187, %v1188_v54  ;;  %v1192_v46 = vcvt.s32.f32 %v1185_v43  ;;  %v1266_v20 = vsel %vm1260_vm5, %v1263_v60, %v1265_v45  ;;  %5809 = vst [vmem:[#allocation22_spill] sm:$0xff] %v4799_v17  ;;  %vm1074_vm3 = vcmp.lt.s32.totalorder %v5800_v14, 0 }
 0x19f   :  { %v1318_v31 = vadd.s32 %v1317_v39, %v1307_v18  ;;  %vm1322_vm2 = vc.u32 %v4790_v29, %v1316_v10  ;;  %vm4805_vm4 = vcmp.le.f32.partialorder %v1072_v53, 0.7853982  ;;  %v1320_v48 = vmul.u32 %v4711_v56, %v1266_v20  ;;  %v4819_v56 = vpop.f32.mrf.mxu1 }
 0x1a0   :  { %v1190_v19 = vand.u32 2147483647, %v1189_v7  ;;  %v1197_v53 = vsel %vm1074_vm3, %v1196_v16, %v4709_v44  ;;  %vm1215_vm6 = vweird.f32 %v5800_v14  ;;  %vm1229_vm12 = vcmp.lt.s32.totalorder %v5804_v5, 0 }
 0x1a1   :  { %v1319_v36 = vadd.s32 %v1318_v31, %v1309_v58  ;;  %v1199_v7 = vsel %vm4805_vm4, 0, %v1197_v53  ;;  %vm4864_vm13 = vcmp.le.f32.partialorder %v1227_v12, 0.7853982 }
 0x1a2   :  { %v1193_v28 = vmul.f32 %v1192_v46, %v1190_v19  ;;  %v1216_v46 = vadd.s32 3, %v1199_v7 }
 0x1a3   :  { %v1323_v40 = vadd.s32 1, %v1319_v36  ;;  %v4817_v52 = vpop.f32.mrf.mxu0 }
 0x1a4   :  { %v1194_v59 = vxor.u32 2147483648, %v1193_v28 }
 0x1a5   :  { %v1324_v41 = vsel %vm1322_vm2, %v1323_v40, %v1319_v36  ;;  %v4821_v25 = vpop.f32.mrf.mxu2  ;;  %vm1370_vm2 = vweird.f32 %v5804_v5 }
 0x1a6   :  { %v1195_v6 = vsel %vm1074_vm3, %v1194_v59, %v1193_v28  ;;  %v1325_v23 = vadd.s32 %v1324_v41, %v1320_v48  ;;  %5812 = vst [vmem:[#allocation23_spill] sm:$0xff] %v4821_v25  ;;  %v1217_v59 = vand.u32 3, %v1216_v46 }
 0x1a7   :  { %v1198_v30 = vsel %vm4805_vm4, %v5800_v14, %v1195_v6  ;;  %v4828_v16 = vpop.f32.mrf.mxu1  ;;  %vm2794_vm4 = vcmask 23552  }
 0x1a8   :  { %v1200_v11 = vmul.f32 %v1198_v30, %v1198_v30  ;;  %v1326_v54 = vadd.s32 536870912, %v1325_v23  ;;  %5813 = vst [vmem:[#allocation24_spill] sm:$0xff] %v4828_v16  ;;  %vm1219_vm7 = vcmp.eq.s32.totalorder %v1217_v59, 0  ;;  %vm1222_vm9 = vcmp.eq.s32.totalorder %v1217_v59, 2 }
 0x1a9   :  { %vm1218_vm11 = vcmp.lt.s32.totalorder %v1217_v59, 2 }
 0x1aa   :  { %v1201_v22 = vmul.f32 -0.001358992, %v1200_v11  ;;  %v1208_v43 = vmul.f32 -0.00019511016, %v1200_v11  ;;  %v4815_v61 = vshrl.u32 %v1326_v54, 30 }
 0x1ab   :  { %v4826_v48 = vpop.f32.mrf.mxu0 }
 0x1ac   :  { %v1202_v63 = vadd.f32 0.041655596, %v1201_v22  ;;  %v1209_v21 = vadd.f32 0.008332121, %v1208_v43  ;;  %v1328_v18 = vshll.u32 %v4815_v61, 30 }
 0x1ad   :  { %v4830_v43 = vpop.f32.mrf.mxu2 }
 0x1ae   :  { %v1203_v32 = vmul.f32 %v1202_v63, %v1200_v11  ;;  %v1210_v60 = vmul.f32 %v1209_v21, %v1200_v11  ;;  %v1329_v44 = vsub.s32 %v1325_v23, %v1328_v18  ;;  %5814 = vst [vmem:[#allocation27_spill] sm:$0xff] %v4830_v43 }
 0x1b0   :  { %v1204_v39 = vadd.f32 -0.4999988, %v1203_v32  ;;  %v1211_v19 = vadd.f32 -0.16666654, %v1210_v60  ;;  %vm1330_vm5 = vcmp.lt.s32.totalorder %v1329_v44, 0  ;;  %v1331_v31 = vsub.s32 0, %v1329_v44 }
 0x1b2   :  { %v1205_v45 = vmul.f32 %v1204_v39, %v1200_v11  ;;  %v1212_v58 = vmul.f32 %v1211_v19, %v1200_v11  ;;  %v1332_v36 = vsel %vm1330_vm5, %v1331_v31, %v1329_v44 }
 0x1b3   :  { %v1333_v40 = vclz %v1332_v36  ;;  %v4845_v31 = vpop.f32.mrf.mxu0 }
 0x1b4   :  { %v1206_v28 = vadd.f32 1.0, %v1205_v45  ;;  %v1213_v20 = vadd.f32 1.0, %v1212_v58  ;;  %v4839_v58 = vld [vmem:[#allocation5 + $0x118] sm:$0xff] }
 0x1b5   :  { %v2831_v41 = vadd.s32 4294967294, %v1333_v40  ;;  %5815 = vst [vmem:[#allocation29_spill] sm:$0xff] %v4839_v58  ;;  %2066 = vmatpush.msra.mxu3 %v4839_v58  ;;  %v4855_v40 = vld [vmem:[#allocation5 + $0x1f8] sm:$0xff] }
 0x1b6   :  { %v1214_v6 = vmul.f32 %v1213_v20, %v1198_v30  ;;  %v1223_v27 = vxor.u32 2147483648, %v1206_v28  ;;  %v1321_v30 = vadd.s32 %v1316_v10, %v4790_v29  ;;  %v4841_v29 = vld [vmem:[#allocation5 + $0x28] sm:$0xff] }
 0x1b7   :  { %vm2832_vm8 = vcmp.lt.s32.totalorder %v2831_v41, 0  ;;  %5816 = vst [vmem:[#allocation30_spill] sm:$0xff] %v4841_v29  ;;  %v4843_v10 = vld [vmem:[#allocation5 + $0x108] sm:$0xff]  ;;  %2045 = vmatpush.msrb.mxu1 %v4841_v29 }
 0x1b8   :  { %v1220_v22 = vxor.u32 2147483648, %v1214_v6  ;;  %v1224_v23 = vsel %vm1222_vm9, %v1223_v27, %v1214_v6  ;;  %v1336_v54 = vsel %vm2832_vm8, 0, %v2831_v41  ;;  %5817 = vst [vmem:[#allocation31_spill] sm:$0xff] %v4843_v10  ;;  %2067 = vmatpush.msra.mxu3 %v4843_v10  ;;  %v4858_v27 = vld [vmem:[#allocation5 + $0x1e8] sm:$0xff]  ;;  %v4915_v41 = vld [vmem:[#allocation5 + $0xb8] sm:$0xff] }
 0x1b9   :  { %v1337_v63 = vsub.s32 32, %v1336_v54  ;;  %v1341_v21 = vsub.s32 4294967266, %v1336_v54  ;;  %v1338_v60 = vshll.u32 %v1329_v44, %v1336_v54  ;;  %v1713_v44 = vpop.f32.mrf.mxu2 }
 0x1ba   :  { %v1221_v11 = vsel %vm1219_vm7, %v1206_v28, %v1220_v22  ;;  %v4847_v28 = vpop.f32.mrf.mxu1  ;;  %2141 = vmatpush.msrb.mxu3 %v4855_v40 }
 0x1bb   :  { %v1225_v53 = vsel %vm1218_vm11, %v1221_v11, %v1224_v23  ;;  %v1339_v18 = vshrl.u32 %v1321_v30, %v1337_v63  ;;  %v1342_v39 = vadd.s32 127, %v1341_v21  ;;  %v1672_v11 = vpop.f32.mrf.mxu3  ;;  %v4870_v23 = vld [vmem:[#allocation5 + $0x8] sm:$0xff]  ;;  %v1351_v30 = vsub.s32 4, %v4815_v61  ;;  %v1754_v21 = vpop.f32.mrf.mxu0 }
 0x1bc   :  { %v1226_v7 = vsel %vm1215_vm6, nan, %v1225_v53  ;;  %2142 = vmatpush.msrb.mxu3 %v4858_v27  ;;  %5821 = vst [vmem:[#allocation32_spill] sm:$0xff] %v4870_v23  ;;  %v4874_v53 = vld [vmem:[#allocation5 + $0x1d8] sm:$0xff]  ;;  %v1714_v63 = vadd.f32 %v1713_v44, %v1672_v11 }
 0x1bd   :  { %v1388_v32 = vsel %vm141_vm1, %v1226_v7, %v5800_v14  ;;  %v1340_v19 = vor.u32 %v1339_v18, %v1338_v60  ;;  %v1343_v46 = vshll.u32 %v1342_v39, 23  ;;  %v4851_v14 = vld [vmem:[#allocation5 + $0x18] sm:$0xff]  ;;  %v4885_v18 = vld [vmem:[#allocation5 + $0x1c8] sm:$0xff] }
 0x1be   :  { %2857 = vmatmul.msk.f32.gmra.mxu1 %vm1778_vm15, %v1388_v32  ;;  %2865 = vmatmul.msk.f32.gmra.mxu3 %vm1778_vm15, %v1388_v32  ;;  %5818 = vst [vmem:[#allocation12_spill] sm:$0xff] %v4851_v14  ;;  %v4882_v60 = vld [vmem:[#allocation5 + $0xf8] sm:$0xff]  ;;  %v4888_v39 = vadd.f32 %v1754_v21, %v1714_v63 }
 0x1bf   :  { %v1344_v45 = vor.u32 4788187, %v1343_v46  ;;  %v1347_v36 = vcvt.s32.f32 %v1340_v19  ;;  %2046 = vmatpush.msrb.mxu1 %v4851_v14  ;;  %2143 = vmatpush.msrb.mxu3 %v4874_v53  ;;  %v4893_v44 = vld [vmem:[#allocation5 + $0x1b8] sm:$0xff] }
 0x1c0   :  { %5822 = vst [vmem:[#allocation33_spill] sm:$0xff] %v4888_v39 }
 0x1c1   :  { %v1345_v20 = vand.u32 2147483647, %v1344_v45  ;;  %2047 = vmatpush.msrb.mxu1 %v4870_v23  ;;  %v1716_v7 = vpop.f32.mrf.mxu2  ;;  %2144 = vmatpush.msrb.mxu3 %v4885_v18  ;;  %v4890_v45 = vld [vmem:[#allocation5 + $0xe8] sm:$0xff] }
 0x1c2   :  { %v4872_v54 = vpop.f32.mrf.mxu1 }
 0x1c3   :  { %v1348_v59 = vmul.f32 %v1347_v36, %v1345_v20  ;;  %2121 = vmatpush.msra.mxu1 %v4882_v60  ;;  %2145 = vmatpush.msrb.mxu3 %v4893_v44  ;;  %v1352_v20 = vsel %vm1229_vm12, %v1351_v30, %v4815_v61  ;;  %v1675_v42 = vpop.f32.mrf.mxu3  ;;  %v4912_v61 = vld [vmem:[#allocation5 + $0x198] sm:$0xff] }
 0x1c4   :  { %v1354_v11 = vsel %vm4864_vm13, 0, %v1352_v20  ;;  %v1717_v30 = vadd.f32 %v1716_v7, %v1675_v42  ;;  %v4918_v20 = vld [vmem:[#allocation5 + $0x188] sm:$0xff] }
 0x1c5   :  { %v1349_v6 = vxor.u32 2147483648, %v1348_v59  ;;  %2122 = vmatpush.msra.mxu1 %v4890_v45 }
 0x1c7   :  { %v1350_v22 = vsel %vm1229_vm12, %v1349_v6, %v1348_v59  ;;  %v4899_v6 = vld [vmem:[#allocation5 + $0xd8] sm:$0xff] }
 0x1c8   :  { %v1353_v12 = vsel %vm4864_vm13, %v5804_v5, %v1350_v22  ;;  %2123 = vmatpush.msra.mxu1 %v4899_v6  ;;  %v4902_v22 = vld [vmem:[#allocation5 + $0x1a8] sm:$0xff] }
 0x1c9   :  { %v1355_v32 = vmul.f32 %v1353_v12, %v1353_v12  ;;  %2146 = vmatpush.msrb.mxu3 %v4902_v22 }
 0x1ca   :  { %v4907_v16 = vpop.f32.mrf.mxu1  ;;  %2124 = vmatpush.msra.mxu1 %v4909_v38 }
 0x1cb   :  { %v1356_v19 = vmul.f32 -0.001358992, %v1355_v32  ;;  %v1363_v46 = vmul.f32 -0.00019511016, %v1355_v32  ;;  %2147 = vmatpush.msrb.mxu3 %v4912_v61 }
 0x1cc   :  { %2125 = vmatpush.msra.mxu1 %v4915_v41 }
 0x1cd   :  { %v1357_v36 = vadd.f32 0.041655596, %v1356_v19  ;;  %v1364_v59 = vadd.f32 0.008332121, %v1363_v46  ;;  %v1757_v19 = vpop.f32.mrf.mxu0  ;;  %v1719_v46 = vpop.f32.mrf.mxu2  ;;  %2148 = vmatpush.msrb.mxu3 %v4918_v20 }
 0x1ce   :  { %2126 = vmatpush.msra.mxu1 %v4923_v51 }
 0x1cf   :  { %v1358_v63 = vmul.f32 %v1357_v36, %v1355_v32  ;;  %v1365_v21 = vmul.f32 %v1364_v59, %v1355_v32  ;;  %v1371_v36 = vadd.s32 3, %v1354_v11  ;;  %v4921_v59 = vadd.f32 %v1757_v19, %v1717_v30  ;;  %2149 = vmatpush.msrb.mxu3 %v4469_v33  ;;  %v1678_v19 = vpop.f32.mrf.mxu3 }
 0x1d1   :  { %v1359_v39 = vadd.f32 -0.4999988, %v1358_v63  ;;  %v1366_v43 = vadd.f32 -0.16666654, %v1365_v21  ;;  %v4927_v63 = vld [vmem:[#allocation5 + $0x98] sm:$0xff]  ;;  %2150 = vmatpush.msrb.mxu3 %v4473_v62  ;;  %v1372_v21 = vand.u32 3, %v1371_v36 }
 0x1d2   :  { %2127 = vmatpush.msra.mxu1 %v4927_v63 }
 0x1d3   :  { %v1360_v25 = vmul.f32 %v1359_v39, %v1355_v32  ;;  %v1367_v17 = vmul.f32 %v1366_v43, %v1355_v32  ;;  %v1605_v39 = vpop.f32.mrf.mxu1  ;;  %2151 = vmatpush.msrb.mxu3 %v4623_v57  ;;  %v1720_v43 = vadd.f32 %v1719_v46, %v1678_v19  ;;  %vm1374_vm10 = vcmp.eq.s32.totalorder %v1372_v21, 0 }
 0x1d4   :  { %2128 = vmatpush.msra.mxu1 %v4471_v0  ;;  %v4934_v33 = vadd.f32 %v1605_v39, %v4817_v52  ;;  %vm1377_vm14 = vcmp.eq.s32.totalorder %v1372_v21, 2  ;;  %vm1373_vm0 = vcmp.lt.s32.totalorder %v1372_v21, 2 }
 0x1d5   :  { %v1361_v42 = vadd.f32 1.0, %v1360_v25  ;;  %v1368_v7 = vadd.f32 1.0, %v1367_v17  ;;  %v1760_v17 = vpop.f32.mrf.mxu0  ;;  %v1722_v25 = vpop.f32.mrf.mxu2  ;;  %2152 = vmatpush.msrb.mxu3 %v4627_v8 }
 0x1d6   :  { %2129 = vmatpush.msra.mxu1 %v4480_v9  ;;  %v4938_v62 = vadd.f32 %v1760_v17, %v1720_v43 }
 0x1d7   :  { %v1369_v11 = vmul.f32 %v1368_v7, %v1353_v12  ;;  %v1378_v30 = vxor.u32 2147483648, %v1361_v42  ;;  %2153 = vmatpush.msrb.mxu3 %v4772_v13  ;;  %v1681_v36 = vpop.f32.mrf.mxu3 }
 0x1d8   :  { %2130 = vmatpush.msra.mxu1 %v4625_v37  ;;  %v1723_v7 = vadd.f32 %v1722_v25, %v1681_v36  ;;  %v4990_v36 = vld [vmem:[#allocation5 + $0x88] sm:$0xff] }
 0x1d9   :  { %v1375_v32 = vxor.u32 2147483648, %v1369_v11  ;;  %v1379_v0 = vsel %vm1377_vm14, %v1378_v30, %v1369_v11  ;;  %2154 = vmatpush.msrb.mxu3 %v4776_v26 }
 0x1da   :  { %2131 = vmatpush.msra.mxu1 %v4636_v55 }
 0x1db   :  { %v1376_v12 = vsel %vm1374_vm10, %v1361_v42, %v1375_v32  ;;  %v1608_v42 = vpop.f32.mrf.mxu1  ;;  %2155 = vmatpush.msrb.mxu3 %v4839_v58 }
 0x1dc   :  { %v1380_v52 = vsel %vm1373_vm0, %v1376_v12, %v1379_v0  ;;  %v4951_v21 = vadd.f32 %v1608_v42, %v4826_v48  ;;  %2132 = vmatpush.msra.mxu1 %v4774_v50 }
 0x1dd   :  { %v1381_v46 = vsel %vm1370_vm2, nan, %v1380_v52  ;;  %v1763_v11 = vpop.f32.mrf.mxu0  ;;  %v1725_v30 = vpop.f32.mrf.mxu2  ;;  %2156 = vmatpush.msrb.mxu3 %v4843_v10 }
 0x1de   :  { %v1389_v9 = vsel %vm141_vm1, %v1381_v46, %v5804_v5  ;;  %v4955_v19 = vadd.f32 %v1763_v11, %v1723_v7  ;;  %2133 = vmatpush.msra.mxu1 %v4781_v2  ;;  %v4995_v11 = vld [vmem:[#allocation5 + $0x178] sm:$0xff] }
 0x1df   :  { %2858 = vmatmul.msk.f32.gmra.mxu1 %vm1778_vm15, %v1389_v9  ;;  %2866 = vmatmul.msk.f32.gmra.mxu3 %vm1778_vm15, %v1389_v9  ;;  %v1684_v47 = vpop.f32.mrf.mxu3 }
 0x1e0   :  { %2134 = vmatpush.msra.mxu1 %v4841_v29  ;;  %v1726_v48 = vadd.f32 %v1725_v30, %v1684_v47  ;;  %v4998_v30 = vld [vmem:[#allocation5 + $0x78] sm:$0xff]  ;;  %v1591_v47 = vadd.f32 %v4819_v56, %v4621_v4 }
 0x1e2   :  { %2135 = vmatpush.msra.mxu1 %v4851_v14 }
 0x1e3   :  { %v1611_v5 = vpop.f32.mrf.mxu1 }
 0x1e4   :  { %v4964_v39 = vadd.f32 %v1611_v5, %v4845_v31  ;;  %2136 = vmatpush.msra.mxu1 %v4870_v23  ;;  %v5003_v5 = vld [vmem:[#allocation5 + $0x168] sm:$0xff] }
 0x1e5   :  { %v1766_v43 = vpop.f32.mrf.mxu0  ;;  %v1728_v17 = vpop.f32.mrf.mxu2  ;;  %5823 = vst [vmem:[#allocation34_spill] sm:$0xff] %v5003_v5 }
 0x1e6   :  { %v4969_v25 = vadd.f32 %v1766_v43, %v1726_v48  ;;  %v5009_v48 = vld [vmem:[%s5625_s6] sm:$0x3]  ;;  %v1632_v43 = vadd.f32 %v4588_v15, %v1591_v47  ;;  %v1597_v47 = vadd.f32 %v4847_v28, %v4728_v34  ;;  %v5053_v34 = vld [vmem:[#allocation5 + $0xd0] sm:$0xff] }
 0x1e7   :  { %2068 = vmatmul.f32.vlgmr.msra.gmra.mxu3 %v5764_v24  ;;  %2048 = vmatmul.f32.vlgmr.msrb.gmra.mxu1 %v5764_v24  ;;  %v1687_v24 = vpop.f32.mrf.mxu3  ;;  %v5057_v28 = vld [vmem:[#allocation5 + $0xc0] sm:$0xff] }
 0x1e8   :  { %2230 = vmatpush.msra.mxu3 %v4855_v40  ;;  %2210 = vmatpush.msrb.mxu1 %v4882_v60  ;;  %v1729_v32 = vadd.f32 %v1728_v17, %v1687_v24  ;;  %v5016_v17 = vperm.slane %v5009_v48, 0 }
 0x1ea   :  { %2231 = vmatpush.msra.mxu3 %v4858_v27  ;;  %2211 = vmatpush.msrb.mxu1 %v4890_v45 }
 0x1eb   :  { %v4976_v31 = vpop.f32.mrf.mxu1 }
 0x1ec   :  { %2232 = vmatpush.msra.mxu3 %v4874_v53  ;;  %2212 = vmatpush.msrb.mxu1 %v4899_v6 }
 0x1ed   :  { %v1769_v12 = vpop.f32.mrf.mxu0  ;;  %v1731_v0 = vpop.f32.mrf.mxu2 }
 0x1ee   :  { %2233 = vmatpush.msra.mxu3 %v4885_v18  ;;  %2213 = vmatpush.msrb.mxu1 %v4909_v38  ;;  %v4981_v52 = vadd.f32 %v1769_v12, %v1729_v32 }
 0x1ef   :  { %v1690_v46 = vpop.f32.mrf.mxu3 }
 0x1f0   :  { %2234 = vmatpush.msra.mxu3 %v4893_v44  ;;  %2214 = vmatpush.msrb.mxu1 %v4915_v41  ;;  %v4993_v42 = vadd.f32 %v1731_v0, %v1690_v46 }
 0x1f2   :  { %2235 = vmatpush.msra.mxu3 %v4902_v22  ;;  %2215 = vmatpush.msrb.mxu1 %v4923_v51 }
 0x1f3   :  { %v4988_v9 = vpop.f32.mrf.mxu1 }
 0x1f4   :  { %2236 = vmatpush.msra.mxu3 %v4912_v61  ;;  %2216 = vmatpush.msrb.mxu1 %v4927_v63 }
 0x1f5   :  { %v1734_v7 = vpop.f32.mrf.mxu2  ;;  %v2029_v4 = vpop.f32.mrf.mxu0 }
 0x1f6   :  { %2237 = vmatpush.msra.mxu3 %v4918_v20  ;;  %2217 = vmatpush.msrb.mxu1 %v4990_v36 }
 0x1f7   :  { %v1693_v56 = vpop.f32.mrf.mxu3 }
 0x1f8   :  { %2238 = vmatpush.msra.mxu3 %v4995_v11  ;;  %2218 = vmatpush.msrb.mxu1 %v4998_v30  ;;  %v5020_v32 = vadd.f32 %v1734_v7, %v1693_v56  ;;  %v5038_v56 = vld [vmem:[#allocation5 + $0xf0] sm:$0xff] }
 0x1fa   :  { %2239 = vmatpush.msra.mxu3 %v5003_v5  ;;  %2219 = vmatpush.msrb.mxu1 %v4625_v37 }
 0x1fb   :  { %v1820_v24 = vpop.f32.mrf.mxu1 }
 0x1fc   :  { %2240 = vmatpush.msra.mxu3 %v4623_v57  ;;  %2220 = vmatpush.msrb.mxu1 %v4636_v55  ;;  %v1821_v12 = vadd.f32 %v1820_v24, %v1632_v43 }
 0x1fd   :  { %v2009_v0 = vpop.f32.mrf.mxu2 }
 0x1fe   :  { %2241 = vmatpush.msra.mxu3 %v4627_v8  ;;  %2221 = vmatpush.msrb.mxu1 %v4774_v50  ;;  %v2030_v57 = vadd.f32 %v2029_v4, %v2009_v0  ;;  %v1891_v15 = vadd.f32 %v5016_v17, %v1821_v12  ;;  %v1638_v4 = vadd.f32 %v4690_v1, %v1597_v47 }
 0x1ff   :  { %v5030_v46 = vpop.f32.mrf.mxu3  ;;  %v1600_v1 = vadd.f32 %v4872_v54, %v4753_v3 }
 0x200   :  { %2242 = vmatpush.msra.mxu3 %v4772_v13  ;;  %2222 = vmatpush.msrb.mxu1 %v4781_v2  ;;  %v2072_v8 = vadd.f32 %v2030_v57, %v1891_v15  ;;  %v5047_v15 = vld [vmem:[#allocation5 + $0xe0] sm:$0xff] }
 0x202   :  { %2243 = vmatpush.msra.mxu3 %v4776_v26  ;;  %2223 = vmatpush.msrb.mxu1 %v4841_v29  ;;  %2892 = vtanh.f32 %v2072_v8  ;;  %v5062_v8 = vld [vmem:[#allocation5 + $0xb0] sm:$0xff] }
 0x203   :  { %v5032_v7 = vpop.f32.mrf.mxu1 }
 0x204   :  { %2244 = vmatpush.msra.mxu3 %v4839_v58  ;;  %2224 = vmatpush.msrb.mxu1 %v4851_v14 }
 0x206   :  { %2245 = vmatpush.msra.mxu3 %v4843_v10  ;;  %2225 = vmatpush.msrb.mxu1 %v4870_v23 }
 0x207   :  { %v1864_v24 = vpop.f32.mrf.mxu3 }
 0x208   :  { %v2893_v43 = vpop.eup %2892  ;;  %v5043_v0 = vadd.f32 %v1864_v24, %v4921_v59  ;;  %v1641_v59 = vadd.f32 %v4732_v49, %v1600_v1  ;;  %v1603_v49 = vadd.f32 %v4907_v16, %v4795_v35  ;;  %v5077_v24 = vld [vmem:[#allocation5 + $0x90] sm:$0xff]  ;;  %v5827_v1 = vld [vmem:[#allocation13_spill] sm:$0xff] }
 0x209   :  { %2097 = vmatmul.f32.vlgmr.msrb.gmra.mxu2 %v2893_v43  ;;  %2137 = vmatmul.f32.vlgmr.msra.gmra.mxu1 %v2893_v43 }
 0x20a   :  { %2259 = vmatpush.msrb.mxu2 %v5038_v56  ;;  %2299 = vmatpush.msra.mxu1 %v4882_v60 }
 0x20b   :  { %v1826_v12 = vpop.f32.mrf.mxu1 }
 0x20c   :  { %v5045_v57 = vadd.f32 %v1826_v12, %v1638_v4  ;;  %2260 = vmatpush.msrb.mxu2 %v5047_v15  ;;  %2300 = vmatpush.msra.mxu1 %v4890_v45  ;;  %v5071_v4 = vld [vmem:[#allocation5 + $0xa0] sm:$0xff] }
 0x20d   :  { %v5083_v12 = vld [vmem:[#allocation5 + $0x80] sm:$0xff] }
 0x20e   :  { %5824 = vst [vmem:[#allocation35_spill] sm:$0xff] %v5045_v57  ;;  %2261 = vmatpush.msrb.mxu2 %v5053_v34  ;;  %2301 = vmatpush.msra.mxu1 %v4899_v6 }
 0x20f   :  { %v1867_v3 = vpop.f32.mrf.mxu3 }
 0x210   :  { %2262 = vmatpush.msrb.mxu2 %v5057_v28  ;;  %2302 = vmatpush.msra.mxu1 %v4909_v38  ;;  %v5067_v47 = vadd.f32 %v1867_v3, %v4938_v62  ;;  %v1773_v62 = vadd.f32 %v4976_v31, %v4993_v42  ;;  %v5088_v3 = vld [vmem:[#allocation5 + $0x70] sm:$0xff]  ;;  %v5097_v42 = vld [vmem:[#allocation5 + $0x60] sm:$0xff] }
 0x212   :  { %2263 = vmatpush.msrb.mxu2 %v5062_v8  ;;  %2303 = vmatpush.msra.mxu1 %v4915_v41  ;;  %5825 = vst [vmem:[#allocation21_spill] sm:$0xff] %v5067_v47 }
 0x213   :  { %v1829_v54 = vpop.f32.mrf.mxu1 }
 0x214   :  { %v5069_v43 = vadd.f32 %v1829_v54, %v1641_v59  ;;  %2264 = vmatpush.msrb.mxu2 %v5071_v4  ;;  %2304 = vmatpush.msra.mxu1 %v4923_v51  ;;  %v1644_v59 = vadd.f32 %v5827_v1, %v1603_v49  ;;  %v5101_v49 = vld [vmem:[#allocation5 + $0x50] sm:$0xff]  ;;  %v5105_v1 = vld [vmem:[#allocation5 + $0x40] sm:$0xff] }
 0x216   :  { %5826 = vst [vmem:[#allocation28_spill] sm:$0xff] %v5069_v43  ;;  %2265 = vmatpush.msrb.mxu2 %v5077_v24  ;;  %2305 = vmatpush.msra.mxu1 %v4927_v63 }
 0x217   :  { %v1870_v35 = vpop.f32.mrf.mxu3 }
 0x218   :  { %2266 = vmatpush.msrb.mxu2 %v5083_v12  ;;  %2306 = vmatpush.msra.mxu1 %v4990_v36  ;;  %v5093_v54 = vadd.f32 %v1870_v35, %v4955_v19  ;;  %v5830_v19 = vld [vmem:[#allocation22_spill] sm:$0xff]  ;;  %v5111_v35 = vld [vmem:[#allocation5 + $0x30] sm:$0xff] }
 0x21a   :  { %2267 = vmatpush.msrb.mxu2 %v5088_v3  ;;  %2307 = vmatpush.msra.mxu1 %v4998_v30  ;;  %5828 = vst [vmem:[#allocation11_spill] sm:$0xff] %v5093_v54  ;;  %v5120_v54 = vld [vmem:[#allocation5 + $0x20] sm:$0xff] }
 0x21b   :  { %v1832_v16 = vpop.f32.mrf.mxu1  ;;  %5833 = vst [vmem:[#allocation25_spill] sm:$0xff] %v5120_v54 }
 0x21c   :  { %v5095_v31 = vadd.f32 %v1832_v16, %v1644_v59  ;;  %2268 = vmatpush.msrb.mxu2 %v5097_v42  ;;  %2308 = vmatpush.msra.mxu1 %v4625_v37  ;;  %v1647_v59 = vadd.f32 %v5830_v19, %v4934_v33  ;;  %v5124_v33 = vld [vmem:[#allocation5 + $0x10] sm:$0xff]  ;;  %v5128_v19 = vld [vmem:[#allocation5] sm:$0xff] }
 0x21d   :  { %5834 = vst [vmem:[#allocation10_spill] sm:$0xff] %v5124_v33 }
 0x21e   :  { %5829 = vst [vmem:[#allocation9_spill] sm:$0xff] %v5095_v31  ;;  %2269 = vmatpush.msrb.mxu2 %v5101_v49  ;;  %2309 = vmatpush.msra.mxu1 %v4636_v55 }
 0x21f   :  { %v1873_v37 = vpop.f32.mrf.mxu3  ;;  %5835 = vst [vmem:[#allocation17_spill] sm:$0xff] %v5128_v19 }
 0x220   :  { %2270 = vmatpush.msrb.mxu2 %v5105_v1  ;;  %2310 = vmatpush.msra.mxu1 %v4774_v50  ;;  %v5116_v31 = vadd.f32 %v1873_v37, %v4969_v25  ;;  %v1776_v37 = vadd.f32 %v4988_v9, %v5020_v32 }
 0x222   :  { %2271 = vmatpush.msrb.mxu2 %v5111_v35  ;;  %2311 = vmatpush.msra.mxu1 %v4781_v2  ;;  %5831 = vst [vmem:[#allocation19_spill] sm:$0xff] %v5116_v31 }
 0x223   :  { %v1835_v16 = vpop.f32.mrf.mxu1 }
 0x224   :  { %v5118_v55 = vadd.f32 %v1835_v16, %v1647_v59  ;;  %2272 = vmatpush.msrb.mxu2 %v5120_v54  ;;  %2312 = vmatpush.msra.mxu1 %v4841_v29  ;;  %v5837_v16 = vld [vmem:[#allocation23_spill] sm:$0xff] }
 0x226   :  { %5832 = vst [vmem:[#allocation26_spill] sm:$0xff] %v5118_v55  ;;  %2273 = vmatpush.msrb.mxu2 %v5124_v33  ;;  %2313 = vmatpush.msra.mxu1 %v4851_v14  ;;  %v1650_v55 = vadd.f32 %v5837_v16, %v4951_v21  ;;  %v5152_v21 = vperm.slane %v5009_v48, 1  ;;  %v5163_v48 = vld [vmem:[#allocation5 + $0x1d0] sm:$0xff]  ;;  %v5183_v16 = vld [vmem:[#allocation5 + $0x180] sm:$0xff] }
 0x227   :  { %v1876_v25 = vpop.f32.mrf.mxu3 }
 0x228   :  { %2274 = vmatpush.msrb.mxu2 %v5128_v19  ;;  %2314 = vmatpush.msra.mxu1 %v4870_v23  ;;  %v5133_v59 = vadd.f32 %v1876_v25, %v4981_v52  ;;  %v5840_v19 = vld [vmem:[#allocation27_spill] sm:$0xff] }
 0x229   :  { %v1653_v14 = vadd.f32 %v5840_v19, %v4964_v39  ;;  %v5171_v19 = vld [vmem:[#allocation5 + $0x1b0] sm:$0xff] }
 0x22a   :  { %5836 = vst [vmem:[#allocation15_spill] sm:$0xff] %v5133_v59  ;;  %v5843_v59 = vld [vmem:[#allocation33_spill] sm:$0xff] }
 0x22b   :  { %v1862_v9 = vadd.f32 %v5030_v46, %v5843_v59  ;;  %v5167_v46 = vld [vmem:[#allocation5 + $0x1c0] sm:$0xff] }
 0x22c   :  { %v5175_v59 = vld [vmem:[#allocation5 + $0x1a0] sm:$0xff] }
 0x23b   :  { %v1838_v31 = vpop.f32.mrf.mxu1 }
 0x23c   :  { %v5139_v43 = vadd.f32 %v1838_v31, %v1650_v55 }
 0x23e   :  { %5838 = vst [vmem:[#allocation13_spill] sm:$0xff] %v5139_v43  ;;  %v5853_v43 = vld [vmem:[#allocation24_spill] sm:$0xff] }
 0x241   :  { %v1879_v47 = vpop.f32.mrf.mxu3 }
 0x242   :  { %v5141_v57 = vadd.f32 %v1879_v47, %v1773_v62  ;;  %v1892_v47 = vadd.f32 %v5152_v21, %v1862_v9  ;;  %v5191_v9 = vld [vmem:[#allocation5 + $0x160] sm:$0xff] }
 0x244   :  { %5839 = vst [vmem:[#allocation22_spill] sm:$0xff] %v5141_v57  ;;  %v5852_v57 = vld [vmem:[#allocation16_spill] sm:$0xff] }
 0x25c   :  { %v1841_v23 = vpop.f32.mrf.mxu1 }
 0x25d   :  { %v5145_v33 = vadd.f32 %v1841_v23, %v1653_v14  ;;  %v5155_v14 = vld [vmem:[#allocation5 + $0x1f0] sm:$0xff]  ;;  %v5159_v23 = vld [vmem:[#allocation5 + $0x1e0] sm:$0xff] }
 0x25f   :  { %5841 = vst [vmem:[#allocation23_spill] sm:$0xff] %v5145_v33  ;;  %v5219_v33 = vld [vmem:[#allocation5 + $0x100] sm:$0xff] }
 0x260   :  { %5851 = vst [vmem:[#allocation42_spill] sm:$0xff] %v5219_v33 }
 0x262   :  { %v1882_v52 = vpop.f32.mrf.mxu3 }
 0x263   :  { %v5147_v25 = vadd.f32 %v1882_v52, %v1776_v37  ;;  %v5179_v37 = vld [vmem:[#allocation5 + $0x190] sm:$0xff] }
 0x264   :  { %v2049_v32 = vpop.f32.mrf.mxu1  ;;  %v5187_v52 = vld [vmem:[#allocation5 + $0x170] sm:$0xff] }
 0x265   :  { %5842 = vst [vmem:[#allocation27_spill] sm:$0xff] %v5147_v25  ;;  %v5215_v25 = vld [vmem:[#allocation5 + $0x110] sm:$0xff] }
 0x266   :  { %5850 = vst [vmem:[#allocation41_spill] sm:$0xff] %v5215_v25 }
 0x26a   :  { %v2069_v31 = vpop.f32.mrf.mxu3 }
 0x26b   :  { %v2070_v62 = vadd.f32 %v2069_v31, %v2049_v32  ;;  %v5195_v32 = vld [vmem:[#allocation5 + $0x150] sm:$0xff]  ;;  %v5198_v31 = vld [vmem:[#allocation5 + $0x158] sm:$0xff] }
 0x26c   :  { %5844 = vst [vmem:[#allocation33_spill] sm:$0xff] %v5195_v32 }
 0x26d   :  { %v2073_v55 = vadd.f32 %v2070_v62, %v1892_v47  ;;  %5845 = vst [vmem:[#allocation36_spill] sm:$0xff] %v5198_v31  ;;  %v5201_v47 = vld [vmem:[#allocation5 + $0x140] sm:$0xff]  ;;  %v5204_v62 = vld [vmem:[#allocation5 + $0x148] sm:$0xff] }
 0x26e   :  { %5846 = vst [vmem:[#allocation37_spill] sm:$0xff] %v5201_v47 }
 0x26f   :  { %2894 = vtanh.f32 %v2073_v55  ;;  %5847 = vst [vmem:[#allocation38_spill] sm:$0xff] %v5204_v62  ;;  %v5207_v55 = vld [vmem:[#allocation5 + $0x130] sm:$0xff] }
 0x270   :  { %5848 = vst [vmem:[#allocation39_spill] sm:$0xff] %v5207_v55 }
 0x275   :  { %v2895_v39 = vpop.eup %2894 }
 0x276   :  { %2117 = vmatmul.f32.vlgmr.msrb.gmra.mxu0 %v2895_v39  ;;  %2157 = vmatmul.f32.vlgmr.msrb.gmra.mxu3 %v2895_v39  ;;  %v5211_v39 = vld [vmem:[#allocation5 + $0x120] sm:$0xff] }
 0x277   :  { %2279 = vmatpush.msrb.mxu0 %v5155_v14  ;;  %2319 = vmatpush.msrb.mxu3 %v4855_v40  ;;  %5849 = vst [vmem:[#allocation40_spill] sm:$0xff] %v5211_v39 }
 0x279   :  { %2280 = vmatpush.msrb.mxu0 %v5159_v23  ;;  %2320 = vmatpush.msrb.mxu3 %v4858_v27 }
 0x27b   :  { %2281 = vmatpush.msrb.mxu0 %v5163_v48  ;;  %2321 = vmatpush.msrb.mxu3 %v4874_v53 }
 0x27d   :  { %2282 = vmatpush.msrb.mxu0 %v5167_v46  ;;  %2322 = vmatpush.msrb.mxu3 %v4885_v18 }
 0x27f   :  { %2283 = vmatpush.msrb.mxu0 %v5171_v19  ;;  %2323 = vmatpush.msrb.mxu3 %v4893_v44 }
 0x281   :  { %2284 = vmatpush.msrb.mxu0 %v5175_v59  ;;  %2324 = vmatpush.msrb.mxu3 %v4902_v22 }
 0x283   :  { %2285 = vmatpush.msrb.mxu0 %v5179_v37  ;;  %2325 = vmatpush.msrb.mxu3 %v4912_v61 }
 0x285   :  { %2286 = vmatpush.msrb.mxu0 %v5183_v16  ;;  %2326 = vmatpush.msrb.mxu3 %v4918_v20 }
 0x287   :  { %2287 = vmatpush.msrb.mxu0 %v5187_v52  ;;  %2327 = vmatpush.msrb.mxu3 %v4995_v11 }
 0x289   :  { %2288 = vmatpush.msrb.mxu0 %v5191_v9  ;;  %2328 = vmatpush.msrb.mxu3 %v5003_v5 }
 0x28b   :  { %2289 = vmatpush.msrb.mxu0 %v5195_v32  ;;  %2329 = vmatpush.msrb.mxu3 %v5198_v31 }
 0x28d   :  { %2290 = vmatpush.msrb.mxu0 %v5201_v47  ;;  %2330 = vmatpush.msrb.mxu3 %v5204_v62 }
 0x28f   :  { %2291 = vmatpush.msrb.mxu0 %v5207_v55  ;;  %2331 = vmatpush.msrb.mxu3 %v4772_v13  ;;  %v1594_v13 = vadd.f32 %v5853_v43, %v5852_v57  ;;  %v5854_v55 = vld [vmem:[#allocation14_spill] sm:$0xff]  ;;  %v5862_v43 = vld [vmem:[#allocation12_spill] sm:$0xff] }
 0x290   :  { %v5860_v57 = vld [vmem:[#allocation10_spill] sm:$0xff] }
 0x291   :  { %2292 = vmatpush.msrb.mxu0 %v5211_v39  ;;  %2332 = vmatpush.msrb.mxu3 %v4776_v26  ;;  %v1635_v62 = vadd.f32 %v5854_v55, %v1594_v13  ;;  %v2098_v26 = vpop.f32.mrf.mxu2  ;;  %v5871_v55 = vld [vmem:[#allocation29_spill] sm:$0xff] }
 0x293   :  { %2293 = vmatpush.msrb.mxu0 %v5215_v25  ;;  %2333 = vmatpush.msrb.mxu3 %v4839_v58  ;;  %v1824_v39 = vadd.f32 %v5032_v7, %v1635_v62  ;;  %v2138_v58 = vpop.f32.mrf.mxu1  ;;  %v5858_v7 = vld [vmem:[#allocation30_spill] sm:$0xff]  ;;  %v5870_v62 = vld [vmem:[#allocation41_spill] sm:$0xff] }
 0x295   :  { %2294 = vmatpush.msrb.mxu0 %v5219_v33  ;;  %2334 = vmatpush.msrb.mxu3 %v4843_v10  ;;  %v1893_v31 = vadd.f32 %v5016_v17, %v1824_v39  ;;  %v1894_v33 = vadd.f32 %v5152_v21, %v5043_v0  ;;  %v5859_v0 = vld [vmem:[#allocation36_spill] sm:$0xff]  ;;  %v5872_v39 = vld [vmem:[#allocation42_spill] sm:$0xff] }
 0x2f3   :  { %v2118_v47 = vpop.f32.mrf.mxu0 }
 0x2f4   :  { %v2119_v25 = vadd.f32 %v2118_v47, %v2098_v26  ;;  %v5262_v26 = vld [vmem:[#allocation5 + $0x68] sm:$0xff]  ;;  %v5869_v47 = vld [vmem:[#allocation20_spill] sm:$0xff] }
 0x2f6   :  { %v2161_v29 = vadd.f32 %v2119_v25, %v1893_v31  ;;  %v5866_v25 = vld [vmem:[#allocation32_spill] sm:$0xff] }
 0x2f7   :  { %v5868_v31 = vld [vmem:[#allocation40_spill] sm:$0xff] }
 0x2f8   :  { %2896 = vtanh.f32 %v2161_v29  ;;  %v5855_v29 = vld [vmem:[#allocation34_spill] sm:$0xff] }
 0x2f9   :  { %v2158_v32 = vpop.f32.mrf.mxu3 }
 0x2fa   :  { %v2159_v10 = vadd.f32 %v2158_v32, %v2138_v58  ;;  %v5268_v58 = vld [vmem:[#allocation5 + $0x58] sm:$0xff]  ;;  %v5867_v32 = vld [vmem:[#allocation18_spill] sm:$0xff] }
 0x2fc   :  { %v2162_v54 = vadd.f32 %v2159_v10, %v1894_v33  ;;  %v5856_v10 = vld [vmem:[#allocation25_spill] sm:$0xff] }
 0x2fd   :  { %v5864_v33 = vld [vmem:[#allocation17_spill] sm:$0xff] }
 0x2fe   :  { %v2897_v5 = vpop.eup %2896  ;;  %2898 = vtanh.f32 %v2162_v54  ;;  %v5863_v54 = vld [vmem:[#allocation38_spill] sm:$0xff] }
 0x2ff   :  { %2186 = vmatmul.f32.vlgmr.msra.gmra.mxu2 %v2897_v5  ;;  %2226 = vmatmul.f32.vlgmr.msrb.gmra.mxu1 %v2897_v5  ;;  %v5857_v5 = vld [vmem:[#allocation33_spill] sm:$0xff] }
 0x300   :  { %2348 = vmatpush.msra.mxu2 %v5038_v56  ;;  %2388 = vmatpush.msrb.mxu1 %v4882_v60 }
 0x302   :  { %2349 = vmatpush.msra.mxu2 %v5047_v15  ;;  %2389 = vmatpush.msrb.mxu1 %v4890_v45 }
 0x304   :  { %v2899_v13 = vpop.eup %2898  ;;  %2350 = vmatpush.msra.mxu2 %v5053_v34  ;;  %2390 = vmatpush.msrb.mxu1 %v4899_v6 }
 0x305   :  { %2206 = vmatmul.f32.vlgmr.msra.gmra.mxu0 %v2899_v13  ;;  %2246 = vmatmul.f32.vlgmr.msra.gmra.mxu3 %v2899_v13  ;;  %v5873_v13 = vld [vmem:[#allocation31_spill] sm:$0xff] }
 0x306   :  { %2351 = vmatpush.msra.mxu2 %v5057_v28  ;;  %2368 = vmatpush.msra.mxu0 %v5155_v14 }
 0x307   :  { %2391 = vmatpush.msrb.mxu1 %v4909_v38  ;;  %2408 = vmatpush.msra.mxu3 %v4855_v40 }
 0x308   :  { %2352 = vmatpush.msra.mxu2 %v5062_v8  ;;  %2369 = vmatpush.msra.mxu0 %v5159_v23 }
 0x309   :  { %2392 = vmatpush.msrb.mxu1 %v4915_v41  ;;  %2409 = vmatpush.msra.mxu3 %v4858_v27 }
 0x30a   :  { %2353 = vmatpush.msra.mxu2 %v5071_v4  ;;  %2370 = vmatpush.msra.mxu0 %v5163_v48 }
 0x30b   :  { %2393 = vmatpush.msrb.mxu1 %v4923_v51  ;;  %2410 = vmatpush.msra.mxu3 %v4874_v53 }
 0x30c   :  { %2354 = vmatpush.msra.mxu2 %v5077_v24  ;;  %2371 = vmatpush.msra.mxu0 %v5167_v46 }
 0x30d   :  { %2394 = vmatpush.msrb.mxu1 %v4927_v63  ;;  %2411 = vmatpush.msra.mxu3 %v4885_v18 }
 0x30e   :  { %2355 = vmatpush.msra.mxu2 %v5083_v12  ;;  %2372 = vmatpush.msra.mxu0 %v5171_v19 }
 0x30f   :  { %2395 = vmatpush.msrb.mxu1 %v4990_v36  ;;  %2412 = vmatpush.msra.mxu3 %v4893_v44 }
 0x310   :  { %2356 = vmatpush.msra.mxu2 %v5088_v3  ;;  %2373 = vmatpush.msra.mxu0 %v5175_v59 }
 0x311   :  { %2396 = vmatpush.msrb.mxu1 %v4998_v30  ;;  %2413 = vmatpush.msra.mxu3 %v4902_v22 }
 0x312   :  { %2357 = vmatpush.msra.mxu2 %v5097_v42  ;;  %2374 = vmatpush.msra.mxu0 %v5179_v37 }
 0x313   :  { %2397 = vmatpush.msrb.mxu1 %v5262_v26  ;;  %2414 = vmatpush.msra.mxu3 %v4912_v61 }
 0x314   :  { %2358 = vmatpush.msra.mxu2 %v5101_v49  ;;  %2375 = vmatpush.msra.mxu0 %v5183_v16 }
 0x315   :  { %2398 = vmatpush.msrb.mxu1 %v5268_v58  ;;  %2415 = vmatpush.msra.mxu3 %v4918_v20 }
 0x316   :  { %2359 = vmatpush.msra.mxu2 %v5105_v1  ;;  %2376 = vmatpush.msra.mxu0 %v5187_v52 }
 0x317   :  { %2399 = vmatpush.msrb.mxu1 %v4774_v50  ;;  %2416 = vmatpush.msra.mxu3 %v4995_v11  ;;  %v5861_v50 = vld [vmem:[#allocation37_spill] sm:$0xff] }
 0x318   :  { %2360 = vmatpush.msra.mxu2 %v5111_v35  ;;  %2377 = vmatpush.msra.mxu0 %v5191_v9 }
 0x319   :  { %2400 = vmatpush.msrb.mxu1 %v4781_v2  ;;  %2417 = vmatpush.msra.mxu3 %v5855_v29  ;;  %v5865_v2 = vld [vmem:[#allocation39_spill] sm:$0xff] }
 0x31a   :  { %2361 = vmatpush.msra.mxu2 %v5856_v10  ;;  %2378 = vmatpush.msra.mxu0 %v5857_v5 }
 0x31b   :  { %2401 = vmatpush.msrb.mxu1 %v5858_v7  ;;  %2418 = vmatpush.msra.mxu3 %v5859_v0 }
 0x31c   :  { %2362 = vmatpush.msra.mxu2 %v5860_v57  ;;  %2379 = vmatpush.msra.mxu0 %v5861_v50  ;;  %v5875_v57 = vld [vmem:[#allocation21_spill] sm:$0xff] }
 0x31d   :  { %2402 = vmatpush.msrb.mxu1 %v5862_v43  ;;  %2419 = vmatpush.msra.mxu3 %v5863_v54  ;;  %v5874_v43 = vld [vmem:[#allocation35_spill] sm:$0xff] }
 0x31e   :  { %2363 = vmatpush.msra.mxu2 %v5864_v33  ;;  %2380 = vmatpush.msra.mxu0 %v5865_v2  ;;  %v1895_v2 = vadd.f32 %v5016_v17, %v5874_v43  ;;  %v5876_v43 = vld [vmem:[#allocation36_spill] sm:$0xff] }
 0x31f   :  { %2403 = vmatpush.msrb.mxu1 %v5866_v25  ;;  %2420 = vmatpush.msra.mxu3 %v5867_v32 }
 0x320   :  { %2381 = vmatpush.msra.mxu0 %v5868_v31 }
 0x321   :  { %2421 = vmatpush.msra.mxu3 %v5869_v47  ;;  %v1896_v47 = vadd.f32 %v5152_v21, %v5875_v57  ;;  %v5348_v57 = vld [vmem:[#allocation5 + $0x38] sm:$0xff] }
 0x322   :  { %2382 = vmatpush.msra.mxu0 %v5870_v62 }
 0x323   :  { %2422 = vmatpush.msra.mxu3 %v5871_v55 }
 0x324   :  { %2383 = vmatpush.msra.mxu0 %v5872_v39 }
 0x325   :  { %2423 = vmatpush.msra.mxu3 %v5873_v13 }
 0x37c   :  { %v2227_v32 = vpop.f32.mrf.mxu1 }
 0x382   :  { %v2187_v54 = vpop.f32.mrf.mxu2  ;;  %v2207_v33 = vpop.f32.mrf.mxu0 }
 0x383   :  { %v2208_v25 = vadd.f32 %v2207_v33, %v2187_v54  ;;  %v5877_v54 = vld [vmem:[#allocation10_spill] sm:$0xff]  ;;  %v5878_v33 = vld [vmem:[#allocation37_spill] sm:$0xff] }
 0x385   :  { %v2250_v50 = vadd.f32 %v2208_v25, %v1895_v2  ;;  %v5879_v2 = vld [vmem:[#allocation12_spill] sm:$0xff]  ;;  %v5880_v25 = vld [vmem:[#allocation38_spill] sm:$0xff] }
 0x387   :  { %2900 = vtanh.f32 %v2250_v50 }
 0x388   :  { %v2247_v31 = vpop.f32.mrf.mxu3 }
 0x389   :  { %v2248_v62 = vadd.f32 %v2247_v31, %v2227_v32  ;;  %v5881_v31 = vld [vmem:[#allocation17_spill] sm:$0xff]  ;;  %v5363_v32 = vld [vmem:[#allocation5 + $0x138] sm:$0xff] }
 0x38a   :  { %5884 = vst [vmem:[#allocation16_spill] sm:$0xff] %v5363_v32 }
 0x38b   :  { %v2251_v0 = vadd.f32 %v2248_v62, %v1896_v47  ;;  %v5882_v62 = vld [vmem:[#allocation39_spill] sm:$0xff]  ;;  %v5367_v47 = vld [vmem:[#allocation5 + $0x128] sm:$0xff] }
 0x38c   :  { %5886 = vst [vmem:[#allocation24_spill] sm:$0xff] %v5367_v47 }
 0x38d   :  { %v2901_v55 = vpop.eup %2900  ;;  %2902 = vtanh.f32 %v2251_v0  ;;  %v5342_v0 = vld [vmem:[#allocation5 + $0x48] sm:$0xff] }
 0x38e   :  { %2275 = vmatmul.f32.vlgmr.msrb.gmra.mxu2 %v2901_v55  ;;  %2315 = vmatmul.f32.vlgmr.msra.gmra.mxu1 %v2901_v55  ;;  %v5883_v55 = vld [vmem:[#allocation32_spill] sm:$0xff] }
 0x38f   :  { %2437 = vmatpush.msrb.mxu2 %v5038_v56  ;;  %2477 = vmatpush.msra.mxu1 %v4882_v60 }
 0x391   :  { %2438 = vmatpush.msrb.mxu2 %v5047_v15  ;;  %2478 = vmatpush.msra.mxu1 %v4890_v45 }
 0x393   :  { %v2903_v50 = vpop.eup %2902  ;;  %2439 = vmatpush.msrb.mxu2 %v5053_v34  ;;  %2479 = vmatpush.msra.mxu1 %v4899_v6 }
 0x394   :  { %2295 = vmatmul.f32.vlgmr.msrb.gmra.mxu0 %v2903_v50  ;;  %2335 = vmatmul.f32.vlgmr.msrb.gmra.mxu3 %v2903_v50  ;;  %v5887_v50 = vld [vmem:[#allocation41_spill] sm:$0xff] }
 0x395   :  { %2440 = vmatpush.msrb.mxu2 %v5057_v28  ;;  %2457 = vmatpush.msrb.mxu0 %v5155_v14 }
 0x396   :  { %2480 = vmatpush.msra.mxu1 %v4909_v38  ;;  %2497 = vmatpush.msrb.mxu3 %v4855_v40 }
 0x397   :  { %2441 = vmatpush.msrb.mxu2 %v5062_v8  ;;  %2458 = vmatpush.msrb.mxu0 %v5159_v23 }
 0x398   :  { %2481 = vmatpush.msra.mxu1 %v4915_v41  ;;  %2498 = vmatpush.msrb.mxu3 %v4858_v27 }
 0x399   :  { %2442 = vmatpush.msrb.mxu2 %v5071_v4  ;;  %2459 = vmatpush.msrb.mxu0 %v5163_v48 }
 0x39a   :  { %2482 = vmatpush.msra.mxu1 %v4923_v51  ;;  %2499 = vmatpush.msrb.mxu3 %v4874_v53 }
 0x39b   :  { %2443 = vmatpush.msrb.mxu2 %v5077_v24  ;;  %2460 = vmatpush.msrb.mxu0 %v5167_v46 }
 0x39c   :  { %2483 = vmatpush.msra.mxu1 %v4927_v63  ;;  %2500 = vmatpush.msrb.mxu3 %v4885_v18 }
 0x39d   :  { %2444 = vmatpush.msrb.mxu2 %v5083_v12  ;;  %2461 = vmatpush.msrb.mxu0 %v5171_v19 }
 0x39e   :  { %2484 = vmatpush.msra.mxu1 %v4990_v36  ;;  %2501 = vmatpush.msrb.mxu3 %v4893_v44 }
 0x39f   :  { %2445 = vmatpush.msrb.mxu2 %v5088_v3  ;;  %2462 = vmatpush.msrb.mxu0 %v5175_v59 }
 0x3a0   :  { %2485 = vmatpush.msra.mxu1 %v4998_v30  ;;  %2502 = vmatpush.msrb.mxu3 %v4902_v22 }
 0x3a1   :  { %2446 = vmatpush.msrb.mxu2 %v5097_v42  ;;  %2463 = vmatpush.msrb.mxu0 %v5179_v37 }
 0x3a2   :  { %2486 = vmatpush.msra.mxu1 %v5262_v26  ;;  %2503 = vmatpush.msrb.mxu3 %v4912_v61 }
 0x3a3   :  { %2447 = vmatpush.msrb.mxu2 %v5101_v49  ;;  %2464 = vmatpush.msrb.mxu0 %v5183_v16 }
 0x3a4   :  { %2487 = vmatpush.msra.mxu1 %v5268_v58  ;;  %2504 = vmatpush.msrb.mxu3 %v4918_v20 }
 0x3a5   :  { %2448 = vmatpush.msrb.mxu2 %v5105_v1  ;;  %2465 = vmatpush.msrb.mxu0 %v5187_v52 }
 0x3a6   :  { %2488 = vmatpush.msra.mxu1 %v5342_v0  ;;  %2505 = vmatpush.msrb.mxu3 %v4995_v11 }
 0x3a7   :  { %2449 = vmatpush.msrb.mxu2 %v5111_v35  ;;  %2466 = vmatpush.msrb.mxu0 %v5191_v9 }
 0x3a8   :  { %2489 = vmatpush.msra.mxu1 %v5348_v57  ;;  %2506 = vmatpush.msrb.mxu3 %v5855_v29 }
 0x3a9   :  { %2450 = vmatpush.msrb.mxu2 %v5856_v10  ;;  %2467 = vmatpush.msrb.mxu0 %v5857_v5 }
 0x3aa   :  { %2490 = vmatpush.msra.mxu1 %v5858_v7  ;;  %2507 = vmatpush.msrb.mxu3 %v5876_v43  ;;  %v5885_v7 = vld [vmem:[#allocation40_spill] sm:$0xff]  ;;  %v5890_v43 = vld [vmem:[#allocation11_spill] sm:$0xff] }
 0x3ab   :  { %2451 = vmatpush.msrb.mxu2 %v5877_v54  ;;  %2468 = vmatpush.msrb.mxu0 %v5878_v33 }
 0x3ac   :  { %2491 = vmatpush.msra.mxu1 %v5879_v2  ;;  %2508 = vmatpush.msrb.mxu3 %v5880_v25  ;;  %v5888_v2 = vld [vmem:[#allocation29_spill] sm:$0xff] }
 0x3ad   :  { %2452 = vmatpush.msrb.mxu2 %v5881_v31  ;;  %2469 = vmatpush.msrb.mxu0 %v5882_v62  ;;  %v5889_v31 = vld [vmem:[#allocation28_spill] sm:$0xff] }
 0x3ae   :  { %2492 = vmatpush.msra.mxu1 %v5883_v55  ;;  %2509 = vmatpush.msrb.mxu3 %v5363_v32  ;;  %v1897_v25 = vadd.f32 %v5016_v17, %v5889_v31 }
 0x3af   :  { %2470 = vmatpush.msrb.mxu0 %v5885_v7 }
 0x3b0   :  { %2510 = vmatpush.msrb.mxu3 %v5367_v47  ;;  %v1898_v47 = vadd.f32 %v5152_v21, %v5890_v43 }
 0x3b1   :  { %2471 = vmatpush.msrb.mxu0 %v5887_v50 }
 0x3b2   :  { %2511 = vmatpush.msrb.mxu3 %v5888_v2 }
 0x3b3   :  { %2472 = vmatpush.msrb.mxu0 %v5872_v39 }
 0x3b4   :  { %2512 = vmatpush.msrb.mxu3 %v5873_v13 }
 0x40b   :  { %v2316_v7 = vpop.f32.mrf.mxu1 }
 0x411   :  { %v2276_v62 = vpop.f32.mrf.mxu2  ;;  %v2296_v55 = vpop.f32.mrf.mxu0 }
 0x412   :  { %v2297_v32 = vadd.f32 %v2296_v55, %v2276_v62 }
 0x414   :  { %v2339_v33 = vadd.f32 %v2297_v32, %v1897_v25 }
 0x416   :  { %2904 = vtanh.f32 %v2339_v33  ;;  %v5903_v33 = vld [vmem:[#allocation9_spill] sm:$0xff] }
 0x417   :  { %v2336_v54 = vpop.f32.mrf.mxu3  ;;  %v1899_v25 = vadd.f32 %v5016_v17, %v5903_v33  ;;  %v3009_v33 = vld [vmem:[#allocation5 + $0xd8] sm:$0xff] }
 0x418   :  { %v2337_v50 = vadd.f32 %v2336_v54, %v2316_v7 }
 0x41a   :  { %v2340_v5 = vadd.f32 %v2337_v50, %v1898_v47  ;;  %v5904_v47 = vld [vmem:[#allocation19_spill] sm:$0xff] }
 0x41b   :  { %v1900_v50 = vadd.f32 %v5152_v21, %v5904_v47  ;;  %v2706_v47 = vld [vmem:[%s5627_s8 + $0x38] sm:$0xff] }
 0x41c   :  { %v2905_v2 = vpop.eup %2904  ;;  %2906 = vtanh.f32 %v2340_v5  ;;  %v5449_v5 = vld [vmem:[#allocation5 + $0x108] sm:$0xff] }
 0x41d   :  { %2364 = vmatmul.f32.vlgmr.msra.gmra.mxu2 %v2905_v2  ;;  %2404 = vmatmul.f32.vlgmr.msrb.gmra.mxu1 %v2905_v2  ;;  %5902 = vst [vmem:[#allocation14_spill] sm:$0xff] %v5449_v5 }
 0x41e   :  { %2526 = vmatpush.msra.mxu2 %v5038_v56  ;;  %2566 = vmatpush.msrb.mxu1 %v4882_v60  ;;  %v5432_v60 = vld [vmem:[#allocation5 + $0x18] sm:$0xff] }
 0x420   :  { %2527 = vmatpush.msra.mxu2 %v5047_v15  ;;  %2567 = vmatpush.msrb.mxu1 %v4890_v45  ;;  %v5896_v45 = vld [vmem:[#allocation17_spill] sm:$0xff] }
 0x422   :  { %v2907_v13 = vpop.eup %2906  ;;  %2528 = vmatpush.msra.mxu2 %v5053_v34  ;;  %2568 = vmatpush.msrb.mxu1 %v4899_v6  ;;  %v5438_v6 = vld [vmem:[#allocation5 + $0x8] sm:$0xff] }
 0x423   :  { %2384 = vmatmul.f32.vlgmr.msra.gmra.mxu0 %v2907_v13  ;;  %2424 = vmatmul.f32.vlgmr.msra.gmra.mxu3 %v2907_v13 }
 0x424   :  { %2529 = vmatpush.msra.mxu2 %v5057_v28  ;;  %2546 = vmatpush.msra.mxu0 %v5155_v14 }
 0x425   :  { %2569 = vmatpush.msrb.mxu1 %v4909_v38  ;;  %2586 = vmatpush.msra.mxu3 %v4855_v40  ;;  %v5891_v38 = vld [vmem:[#allocation33_spill] sm:$0xff]  ;;  %v5892_v40 = vld [vmem:[#allocation36_spill] sm:$0xff] }
 0x426   :  { %2530 = vmatpush.msra.mxu2 %v5062_v8  ;;  %2547 = vmatpush.msra.mxu0 %v5159_v23 }
 0x427   :  { %2570 = vmatpush.msrb.mxu1 %v4915_v41  ;;  %2587 = vmatpush.msra.mxu3 %v4858_v27  ;;  %v5893_v27 = vld [vmem:[#allocation10_spill] sm:$0xff]  ;;  %v5900_v41 = vld [vmem:[#allocation24_spill] sm:$0xff] }
 0x428   :  { %2531 = vmatpush.msra.mxu2 %v5071_v4  ;;  %2548 = vmatpush.msra.mxu0 %v5163_v48 }
 0x429   :  { %2571 = vmatpush.msrb.mxu1 %v4923_v51  ;;  %2588 = vmatpush.msra.mxu3 %v4874_v53  ;;  %v5426_v51 = vld [vmem:[#allocation5 + $0x28] sm:$0xff]  ;;  %v5894_v53 = vld [vmem:[#allocation37_spill] sm:$0xff] }
 0x42a   :  { %2532 = vmatpush.msra.mxu2 %v5077_v24  ;;  %2549 = vmatpush.msra.mxu0 %v5167_v46 }
 0x42b   :  { %2572 = vmatpush.msrb.mxu1 %v4927_v63  ;;  %2589 = vmatpush.msra.mxu3 %v4885_v18  ;;  %v5895_v18 = vld [vmem:[#allocation38_spill] sm:$0xff]  ;;  %v5445_v63 = vld [vmem:[#allocation5 + $0x118] sm:$0xff] }
 0x42c   :  { %2533 = vmatpush.msra.mxu2 %v5083_v12  ;;  %2550 = vmatpush.msra.mxu0 %v5171_v19 }
 0x42d   :  { %2573 = vmatpush.msrb.mxu1 %v4990_v36  ;;  %2590 = vmatpush.msra.mxu3 %v4893_v44  ;;  %v5897_v44 = vld [vmem:[#allocation39_spill] sm:$0xff] }
 0x42e   :  { %2534 = vmatpush.msra.mxu2 %v5088_v3  ;;  %2551 = vmatpush.msra.mxu0 %v5175_v59 }
 0x42f   :  { %2574 = vmatpush.msrb.mxu1 %v4998_v30  ;;  %2591 = vmatpush.msra.mxu3 %v4902_v22  ;;  %v5898_v22 = vld [vmem:[#allocation16_spill] sm:$0xff] }
 0x430   :  { %2535 = vmatpush.msra.mxu2 %v5097_v42  ;;  %2552 = vmatpush.msra.mxu0 %v5179_v37 }
 0x431   :  { %2575 = vmatpush.msrb.mxu1 %v5262_v26  ;;  %2592 = vmatpush.msra.mxu3 %v4912_v61  ;;  %v5899_v61 = vld [vmem:[#allocation40_spill] sm:$0xff] }
 0x432   :  { %2536 = vmatpush.msra.mxu2 %v5101_v49  ;;  %2553 = vmatpush.msra.mxu0 %v5183_v16 }
 0x433   :  { %2576 = vmatpush.msrb.mxu1 %v5268_v58  ;;  %2593 = vmatpush.msra.mxu3 %v4918_v20  ;;  %v5901_v20 = vld [vmem:[#allocation41_spill] sm:$0xff] }
 0x434   :  { %2537 = vmatpush.msra.mxu2 %v5105_v1  ;;  %2554 = vmatpush.msra.mxu0 %v5187_v52 }
 0x435   :  { %2577 = vmatpush.msrb.mxu1 %v5342_v0  ;;  %2594 = vmatpush.msra.mxu3 %v4995_v11 }
 0x436   :  { %2538 = vmatpush.msra.mxu2 %v5111_v35  ;;  %2555 = vmatpush.msra.mxu0 %v5191_v9 }
 0x437   :  { %2578 = vmatpush.msrb.mxu1 %v5348_v57  ;;  %2595 = vmatpush.msra.mxu3 %v5855_v29 }
 0x438   :  { %2539 = vmatpush.msra.mxu2 %v5856_v10  ;;  %2556 = vmatpush.msra.mxu0 %v5891_v38 }
 0x439   :  { %2579 = vmatpush.msrb.mxu1 %v5426_v51  ;;  %2596 = vmatpush.msra.mxu3 %v5892_v40 }
 0x43a   :  { %2540 = vmatpush.msra.mxu2 %v5893_v27  ;;  %2557 = vmatpush.msra.mxu0 %v5894_v53 }
 0x43b   :  { %2580 = vmatpush.msrb.mxu1 %v5432_v60  ;;  %2597 = vmatpush.msra.mxu3 %v5895_v18 }
 0x43c   :  { %2541 = vmatpush.msra.mxu2 %v5896_v45  ;;  %2558 = vmatpush.msra.mxu0 %v5897_v44 }
 0x43d   :  { %2581 = vmatpush.msrb.mxu1 %v5438_v6  ;;  %2598 = vmatpush.msra.mxu3 %v5898_v22 }
 0x43e   :  { %2559 = vmatpush.msra.mxu0 %v5899_v61 }
 0x43f   :  { %2599 = vmatpush.msra.mxu3 %v5900_v41 }
 0x440   :  { %2560 = vmatpush.msra.mxu0 %v5901_v20 }
 0x441   :  { %2600 = vmatpush.msra.mxu3 %v5445_v63 }
 0x442   :  { %2561 = vmatpush.msra.mxu0 %v5872_v39 }
 0x443   :  { %2601 = vmatpush.msra.mxu3 %v5449_v5  ;;  %v3007_v5 = vld [vmem:[#allocation5 + $0xf8] sm:$0xff] }
 0x49a   :  { %v2405_v32 = vpop.f32.mrf.mxu1 }
 0x4a0   :  { %v2365_v43 = vpop.f32.mrf.mxu2  ;;  %v2385_v54 = vpop.f32.mrf.mxu0 }
 0x4a1   :  { %v2386_v31 = vadd.f32 %v2385_v54, %v2365_v43  ;;  %v3008_v43 = vld [vmem:[#allocation5 + $0xe8] sm:$0xff] }
 0x4a3   :  { %v2428_v62 = vadd.f32 %v2386_v31, %v1899_v25  ;;  %v3010_v25 = vld [vmem:[#allocation5 + $0xc8] sm:$0xff] }
 0x4a5   :  { %2908 = vtanh.f32 %v2428_v62 }
 0x4a6   :  { %v2425_v7 = vpop.f32.mrf.mxu3 }
 0x4a7   :  { %v2426_v55 = vadd.f32 %v2425_v7, %v2405_v32  ;;  %v2707_v32 = vld [vmem:[%s5627_s8 + $0x40] sm:$0xff]  ;;  %v2726_v7 = vld [vmem:[%s5627_s8 + $0xd8] sm:$0xff] }
 0x4a9   :  { %v2429_v2 = vadd.f32 %v2426_v55, %v1900_v50  ;;  %v2725_v50 = vld [vmem:[%s5627_s8 + $0xd0] sm:$0xff] }
 0x4aa   :  { %v2705_v55 = vld [vmem:[%s5627_s8 + $0x30] sm:$0xff] }
 0x4ab   :  { %v2909_v13 = vpop.eup %2908  ;;  %2910 = vtanh.f32 %v2429_v2  ;;  %v2724_v2 = vld [vmem:[%s5627_s8 + $0xc8] sm:$0xff] }
 0x4ac   :  { %2453 = vmatmul.f32.vlgmr.msrb.gmra.mxu2 %v2909_v13  ;;  %2493 = vmatmul.f32.vlgmr.msra.gmra.mxu1 %v2909_v13  ;;  %v2704_v13 = vld [vmem:[%s5627_s8 + $0x28] sm:$0xff] }
 0x4ad   :  { %2615 = vmatpush.msrb.mxu2 %v5038_v56  ;;  %2655 = vmatpush.msra.mxu1 %v3007_v5  ;;  %v3011_v56 = vld [vmem:[#allocation5 + $0x1f8] sm:$0xff]  ;;  %v3013_v5 = vld [vmem:[#allocation5 + $0x1e8] sm:$0xff] }
 0x4af   :  { %2616 = vmatpush.msrb.mxu2 %v5047_v15  ;;  %2656 = vmatpush.msra.mxu1 %v3008_v43  ;;  %v3012_v15 = vld [vmem:[#allocation5 + $0xb8] sm:$0xff]  ;;  %v2723_v43 = vld [vmem:[%s5627_s8 + $0xc0] sm:$0xff] }
 0x4b1   :  { %v2911_v54 = vpop.eup %2910  ;;  %2617 = vmatpush.msrb.mxu2 %v5053_v34  ;;  %2657 = vmatpush.msra.mxu1 %v3009_v33  ;;  %v3014_v34 = vld [vmem:[#allocation5 + $0xa8] sm:$0xff]  ;;  %v2722_v33 = vld [vmem:[%s5627_s8 + $0xb8] sm:$0xff] }
 0x4b2   :  { %2473 = vmatmul.f32.vlgmr.msrb.gmra.mxu0 %v2911_v54  ;;  %2513 = vmatmul.f32.vlgmr.msrb.gmra.mxu3 %v2911_v54  ;;  %v2703_v54 = vld [vmem:[%s5627_s8 + $0x20] sm:$0xff] }
 0x4b3   :  { %2618 = vmatpush.msrb.mxu2 %v5057_v28  ;;  %2635 = vmatpush.msrb.mxu0 %v5155_v14  ;;  %v3015_v28 = vld [vmem:[#allocation5 + $0x1d8] sm:$0xff] }
 0x4b4   :  { %2658 = vmatpush.msra.mxu1 %v3010_v25  ;;  %2675 = vmatpush.msrb.mxu3 %v3011_v56  ;;  %v3016_v14 = vld [vmem:[#allocation5 + $0x98] sm:$0xff]  ;;  %v2721_v56 = vld [vmem:[%s5627_s8 + $0xb0] sm:$0xff] }
 0x4b5   :  { %2619 = vmatpush.msrb.mxu2 %v5062_v8  ;;  %2636 = vmatpush.msrb.mxu0 %v5159_v23  ;;  %v3017_v8 = vld [vmem:[#allocation5 + $0x1c8] sm:$0xff]  ;;  %v2702_v25 = vld [vmem:[%s5627_s8 + $0x18] sm:$0xff] }
 0x4b6   :  { %2659 = vmatpush.msra.mxu1 %v3012_v15  ;;  %2676 = vmatpush.msrb.mxu3 %v3013_v5  ;;  %v2701_v15 = vld [vmem:[%s5627_s8 + $0x10] sm:$0xff]  ;;  %v2720_v5 = vld [vmem:[%s5627_s8 + $0xa8] sm:$0xff] }
 0x4b7   :  { %2620 = vmatpush.msrb.mxu2 %v5071_v4  ;;  %2637 = vmatpush.msrb.mxu0 %v5163_v48  ;;  %v3018_v4 = vld [vmem:[#allocation5 + $0x1b8] sm:$0xff] }
 0x4b8   :  { %2660 = vmatpush.msra.mxu1 %v3014_v34  ;;  %2677 = vmatpush.msrb.mxu3 %v3015_v28  ;;  %v2700_v34 = vld [vmem:[%s5627_s8 + $0x8] sm:$0xff]  ;;  %v2719_v28 = vld [vmem:[%s5627_s8 + $0xa0] sm:$0xff] }
 0x4b9   :  { %2621 = vmatpush.msrb.mxu2 %v5077_v24  ;;  %2638 = vmatpush.msrb.mxu0 %v5167_v46  ;;  %v3019_v24 = vld [vmem:[#allocation5 + $0x1a8] sm:$0xff]  ;;  %v5907_v46 = vld [vmem:[#allocation15_spill] sm:$0xff] }
 0x4ba   :  { %2661 = vmatpush.msra.mxu1 %v3016_v14  ;;  %2678 = vmatpush.msrb.mxu3 %v3017_v8  ;;  %v2699_v14 = vld [vmem:[%s5627_s8] sm:$0xff]  ;;  %v2718_v8 = vld [vmem:[%s5627_s8 + $0x98] sm:$0xff] }
 0x4bb   :  { %2622 = vmatpush.msrb.mxu2 %v5083_v12  ;;  %2639 = vmatpush.msrb.mxu0 %v5171_v19  ;;  %v3020_v12 = vld [vmem:[#allocation5 + $0x198] sm:$0xff]  ;;  %v1902_v19 = vadd.f32 %v5152_v21, %v5907_v46 }
 0x4bc   :  { %2662 = vmatpush.msra.mxu1 %v4990_v36  ;;  %2679 = vmatpush.msrb.mxu3 %v3018_v4  ;;  %v3021_v36 = vld [vmem:[#allocation5 + $0x188] sm:$0xff]  ;;  %v2717_v4 = vld [vmem:[%s5627_s8 + $0x90] sm:$0xff] }
 0x4bd   :  { %2623 = vmatpush.msrb.mxu2 %v5088_v3  ;;  %2640 = vmatpush.msrb.mxu0 %v5175_v59 }
 0x4be   :  { %2663 = vmatpush.msra.mxu1 %v4998_v30  ;;  %2680 = vmatpush.msrb.mxu3 %v3019_v24  ;;  %v2716_v24 = vld [vmem:[%s5627_s8 + $0x88] sm:$0xff] }
 0x4bf   :  { %2624 = vmatpush.msrb.mxu2 %v5097_v42  ;;  %2641 = vmatpush.msrb.mxu0 %v5179_v37  ;;  %v5906_v42 = vld [vmem:[#allocation26_spill] sm:$0xff] }
 0x4c0   :  { %2664 = vmatpush.msra.mxu1 %v5262_v26  ;;  %2681 = vmatpush.msrb.mxu3 %v3020_v12  ;;  %v2713_v26 = vld [vmem:[%s5627_s8 + $0x70] sm:$0xff]  ;;  %v2715_v12 = vld [vmem:[%s5627_s8 + $0x80] sm:$0xff] }
 0x4c1   :  { %2625 = vmatpush.msrb.mxu2 %v5101_v49  ;;  %2642 = vmatpush.msrb.mxu0 %v5183_v16  ;;  %v1901_v49 = vadd.f32 %v5016_v17, %v5906_v42 }
 0x4c2   :  { %2665 = vmatpush.msra.mxu1 %v5268_v58  ;;  %2682 = vmatpush.msrb.mxu3 %v3021_v36  ;;  %v2730_v58 = vld [vmem:[%s5627_s8 + $0xf8] sm:$0xff] }
 0x4c3   :  { %2626 = vmatpush.msrb.mxu2 %v5105_v1  ;;  %2643 = vmatpush.msrb.mxu0 %v5187_v52 }
 0x4c4   :  { %2666 = vmatpush.msra.mxu1 %v5342_v0  ;;  %2683 = vmatpush.msrb.mxu3 %v4995_v11  ;;  %v5905_v11 = vld [vmem:[#allocation14_spill] sm:$0xff]  ;;  %v2711_v0 = vld [vmem:[%s5627_s8 + $0x60] sm:$0xff] }
 0x4c5   :  { %2627 = vmatpush.msrb.mxu2 %v5111_v35  ;;  %2644 = vmatpush.msrb.mxu0 %v5191_v9  ;;  %v2714_v9 = vld [vmem:[%s5627_s8 + $0x78] sm:$0xff] }
 0x4c6   :  { %2667 = vmatpush.msra.mxu1 %v5348_v57  ;;  %2684 = vmatpush.msrb.mxu3 %v5855_v29  ;;  %v2712_v29 = vld [vmem:[%s5627_s8 + $0x68] sm:$0xff]  ;;  %v2727_v57 = vld [vmem:[%s5627_s8 + $0xe0] sm:$0xff] }
 0x4c7   :  { %2628 = vmatpush.msrb.mxu2 %v5856_v10  ;;  %2645 = vmatpush.msrb.mxu0 %v5891_v38  ;;  %v2729_v10 = vld [vmem:[%s5627_s8 + $0xf0] sm:$0xff]  ;;  %v2710_v38 = vld [vmem:[%s5627_s8 + $0x58] sm:$0xff] }
 0x4c8   :  { %2668 = vmatpush.msra.mxu1 %v5426_v51  ;;  %2685 = vmatpush.msrb.mxu3 %v5892_v40  ;;  %v2709_v51 = vld [vmem:[%s5627_s8 + $0x50] sm:$0xff]  ;;  %v2708_v40 = vld [vmem:[%s5627_s8 + $0x48] sm:$0xff] }
 0x4c9   :  { %2629 = vmatpush.msrb.mxu2 %v5893_v27  ;;  %2646 = vmatpush.msrb.mxu0 %v5894_v53 }
 0x4ca   :  { %2669 = vmatpush.msra.mxu1 %v5432_v60  ;;  %2686 = vmatpush.msrb.mxu3 %v5895_v18  ;;  %v5908_v60 = vld [vmem:[#allocation13_spill] sm:$0xff] }
 0x4cb   :  { %2630 = vmatpush.msrb.mxu2 %v5896_v45  ;;  %2647 = vmatpush.msrb.mxu0 %v5897_v44  ;;  %v1903_v18 = vadd.f32 %v5016_v17, %v5908_v60 }
 0x4cc   :  { %2670 = vmatpush.msra.mxu1 %v5438_v6  ;;  %2687 = vmatpush.msrb.mxu3 %v5898_v22 }
 0x4cd   :  { %2648 = vmatpush.msrb.mxu0 %v5899_v61  ;;  %v5909_v61 = vld [vmem:[#allocation22_spill] sm:$0xff] }
 0x4ce   :  { %2688 = vmatpush.msrb.mxu3 %v5900_v41  ;;  %v1904_v41 = vadd.f32 %v5152_v21, %v5909_v61 }
 0x4cf   :  { %2649 = vmatpush.msrb.mxu0 %v5901_v20 }
 0x4d0   :  { %2689 = vmatpush.msrb.mxu3 %v5445_v63 }
 0x4d1   :  { %2650 = vmatpush.msrb.mxu0 %v5872_v39  ;;  %v2728_v39 = vld [vmem:[%s5627_s8 + $0xe8] sm:$0xff] }
 0x4d2   :  { %2690 = vmatpush.msrb.mxu3 %v5905_v11 }
 0x529   :  { %v2494_v23 = vpop.f32.mrf.mxu1 }
 0x52f   :  { %v2454_v30 = vpop.f32.mrf.mxu2  ;;  %v2474_v3 = vpop.f32.mrf.mxu0 }
 0x530   :  { %v2475_v1 = vadd.f32 %v2474_v3, %v2454_v30  ;;  %v5910_v30 = vld [vmem:[#allocation23_spill] sm:$0xff] }
 0x531   :  { %v1905_v3 = vadd.f32 %v5016_v17, %v5910_v30 }
 0x532   :  { %v2517_v35 = vadd.f32 %v2475_v1, %v1901_v49 }
 0x534   :  { %2912 = vtanh.f32 %v2517_v35 }
 0x535   :  { %v2514_v48 = vpop.f32.mrf.mxu3 }
 0x536   :  { %v2515_v59 = vadd.f32 %v2514_v48, %v2494_v23  ;;  %v5911_v23 = vld [vmem:[#allocation27_spill] sm:$0xff] }
 0x537   :  { %v1906_v48 = vadd.f32 %v5152_v21, %v5911_v23 }
 0x538   :  { %v2518_v37 = vadd.f32 %v2515_v59, %v1902_v19 }
 0x53a   :  { %v2913_v16 = vpop.eup %2912  ;;  %2914 = vtanh.f32 %v2518_v37 }
 0x53b   :  { %2542 = vmatmul.f32.vlgmr.msra.gmra.mxu2 %v2913_v16  ;;  %2582 = vmatmul.f32.vlgmr.msrb.gmra.mxu1 %v2913_v16  ;;  %v2891_v16 = vld [vmem:[%s5628_s9] ss:$0 sm:$0xff] }
 0x53c   :  { %2735 = vmatpush.msra.mxu2 %v2714_v9 }
 0x53e   :  { %2736 = vmatpush.msra.mxu2 %v2713_v26 }
 0x540   :  { %v2915_v52 = vpop.eup %2914  ;;  %2737 = vmatpush.msra.mxu2 %v2712_v29 }
 0x541   :  { %2562 = vmatmul.f32.vlgmr.msra.gmra.mxu0 %v2915_v52  ;;  %2602 = vmatmul.f32.vlgmr.msra.gmra.mxu3 %v2915_v52 }
 0x542   :  { %2755 = vmatpush.msra.mxu0 %v2730_v58  ;;  %2738 = vmatpush.msra.mxu2 %v2711_v0 }
 0x544   :  { %2756 = vmatpush.msra.mxu0 %v2729_v10  ;;  %2739 = vmatpush.msra.mxu2 %v2710_v38 }
 0x546   :  { %2757 = vmatpush.msra.mxu0 %v2728_v39  ;;  %2740 = vmatpush.msra.mxu2 %v2709_v51 }
 0x548   :  { %2758 = vmatpush.msra.mxu0 %v2727_v57  ;;  %2741 = vmatpush.msra.mxu2 %v2708_v40 }
 0x54a   :  { %2742 = vmatpush.msra.mxu2 %v2707_v32  ;;  %2759 = vmatpush.msra.mxu0 %v2726_v7 }
 0x54c   :  { %2743 = vmatpush.msra.mxu2 %v2706_v47  ;;  %2760 = vmatpush.msra.mxu0 %v2725_v50 }
 0x54e   :  { %2744 = vmatpush.msra.mxu2 %v2705_v55  ;;  %2761 = vmatpush.msra.mxu0 %v2724_v2 }
 0x550   :  { %2745 = vmatpush.msra.mxu2 %v2704_v13  ;;  %2762 = vmatpush.msra.mxu0 %v2723_v43 }
 0x552   :  { %2746 = vmatpush.msra.mxu2 %v2703_v54  ;;  %2763 = vmatpush.msra.mxu0 %v2722_v33 }
 0x554   :  { %2747 = vmatpush.msra.mxu2 %v2702_v25  ;;  %2764 = vmatpush.msra.mxu0 %v2721_v56 }
 0x556   :  { %2748 = vmatpush.msra.mxu2 %v2701_v15  ;;  %2765 = vmatpush.msra.mxu0 %v2720_v5 }
 0x558   :  { %2749 = vmatpush.msra.mxu2 %v2700_v34  ;;  %2766 = vmatpush.msra.mxu0 %v2719_v28 }
 0x55a   :  { %2750 = vmatpush.msra.mxu2 %v2699_v14  ;;  %2767 = vmatpush.msra.mxu0 %v2718_v8 }
 0x55c   :  { %2768 = vmatpush.msra.mxu0 %v2717_v4 }
 0x55e   :  { %2769 = vmatpush.msra.mxu0 %v2716_v24 }
 0x560   :  { %2770 = vmatpush.msra.mxu0 %v2715_v12 }
 0x5b8   :  { %v2583_v6 = vpop.f32.mrf.mxu1 }
 0x5be   :  { %v2543_v27 = vpop.f32.mrf.mxu2  ;;  %v2563_v53 = vpop.f32.mrf.mxu0 }
 0x5bf   :  { %v2564_v45 = vadd.f32 %v2563_v53, %v2543_v27 }
 0x5c1   :  { %v2606_v44 = vadd.f32 %v2564_v45, %v1903_v18 }
 0x5c3   :  { %2916 = vtanh.f32 %v2606_v44 }
 0x5c4   :  { %v2603_v22 = vpop.f32.mrf.mxu3 }
 0x5c5   :  { %v2604_v20 = vadd.f32 %v2603_v22, %v2583_v6 }
 0x5c7   :  { %v2607_v63 = vadd.f32 %v2604_v20, %v1904_v41 }
 0x5c9   :  { %v2917_v31 = vpop.eup %2916  ;;  %2918 = vtanh.f32 %v2607_v63 }
 0x5ca   :  { %2631 = vmatmul.f32.vlgmr.msrb.gmra.mxu2 %v2917_v31  ;;  %2671 = vmatmul.f32.vlgmr.msra.gmra.mxu1 %v2917_v31 }
 0x5cf   :  { %v2919_v62 = vpop.eup %2918 }
 0x5d0   :  { %2651 = vmatmul.f32.vlgmr.msrb.gmra.mxu0 %v2919_v62  ;;  %2691 = vmatmul.f32.vlgmr.msrb.gmra.mxu3 %v2919_v62 }
 0x647   :  { %v2672_v1 = vpop.f32.mrf.mxu1 }
 0x64d   :  { %v2632_v36 = vpop.f32.mrf.mxu2  ;;  %v2652_v11 = vpop.f32.mrf.mxu0 }
 0x64e   :  { %v2653_v42 = vadd.f32 %v2652_v11, %v2632_v36 }
 0x650   :  { %v2695_v49 = vadd.f32 %v2653_v42, %v1905_v3 }
 0x652   :  { %2920 = vtanh.f32 %v2695_v49 }
 0x653   :  { %v2692_v35 = vpop.f32.mrf.mxu3 }
 0x654   :  { %v2693_v46 = vadd.f32 %v2692_v35, %v2672_v1 }
 0x656   :  { %v2696_v19 = vadd.f32 %v2693_v46, %v1906_v48 }
 0x658   :  { %v2921_v59 = vpop.eup %2920  ;;  %2922 = vtanh.f32 %v2696_v19 }
 0x659   :  { %2751 = vmatmul.f32.vlgmr.msra.gmra.mxu2 %v2921_v59 }
 0x65e   :  { %v2923_v37 = vpop.eup %2922 }
 0x65f   :  { %2771 = vmatmul.f32.vlgmr.msra.gmra.mxu0 %v2923_v37 }
 0x6dc   :  { %v2752_v17 = vpop.f32.mrf.mxu2  ;;  %v2772_v9 = vpop.f32.mrf.mxu0 }
 0x6dd   :  { %v2753_v52 = vadd.f32 %v2891_v16, %v2752_v17 }
 0x6df   :  { %v2773_v26 = vadd.f32 %v2772_v9, %v2753_v52 }
 0x6e1   :  { %v2867_v58 = vmul.f32 -1.442695, %v2773_v26 }
 0x6e3   :  { %2924 = vpow2.f32 %v2867_v58 }
 0x6e9   :  { %v2925_v29 = vpop.eup %2924 }
 0x6ea   :  { %v2778_v10 = vadd.f32 1.0, %v2925_v29 }
 0x6ec   :  { %2926 = vrcp.f32 %v2778_v10  ;;  %v2790_v57 = vand.u32 2147483648, %v2778_v10  ;;  %v2788_v51 = vand.u32 2147483647, %v2778_v10  ;;  %vm2784_vm15 = vweird.f32 %v2778_v10 }
 0x6ee   :  { %v2791_v27 = vor.u32 1.1754944e-38, %v2790_v57  ;;  %vm2789_vm5 = vcmp.eq.f32.partialorder %v2788_v51, 8.507059e+37 }
 0x6f2   :  { %v2927_v21 = vpop.eup %2926 }
 0x6f3   :  { %v2780_v39 = vmul.f32 %v2927_v21, %v2778_v10  ;;  %vm2785_vm1 = vweird.f32 %v2927_v21 }
 0x6f4   :  { %vm2786_vm3 = vmor %vm2784_vm15, %vm2785_vm1 }
 0x6f5   :  { %v2781_v0 = vsub.f32 1.0, %v2780_v39 }
 0x6f7   :  { %v2782_v38 = vmul.f32 %v2927_v21, %v2781_v0 }
 0x6f9   :  { %v2783_v40 = vadd.f32 %v2927_v21, %v2782_v38 }
 0x6fb   :  { %v2787_v53 = vsel %vm2786_vm3, %v2927_v21, %v2783_v40 }
 0x6fc   :  { %v2792_v60 = vsel %vm2789_vm5, %v2791_v27, %v2787_v53 }
 0x6fd   :  { %2795 = vst.msk [vmem:[%s5629_s10] sm:$0xff] %vm2794_vm4, %v2792_v60 }
 0x6fe   :  { %2800 = vsyncpa [#allocation4], 1 }
 0x6ff   :  { %2801 = vsyncpa [#allocation6], 1 }

</bundles_post_ra>
